<compile_context>
chip_gen: v6e
topology: v6e:2x2x1
jax: 0.10.0
libtpu: 0.0.40
codegen_flags: <defaults>
</compile_context>

<pallas_src>
import jax
import jax.numpy as jnp
from jax.experimental import pallas as pl
from jax.experimental.pallas import tpu as pltpu


def _round_up(x, m):
    return ((x + m - 1) // m) * m


# -----------------------------------------------------------------------------
# Fused kernel (one batch tile per grid step; weights resident across steps)
# -----------------------------------------------------------------------------
def _fused_autoencoder_kernel(
        x_ref,
        w1_ref, b1_ref, w2_ref, b2_ref, w3_ref, b3_ref,
        w4_ref, b4_ref, w5_ref, b5_ref, w6_ref, b6_ref,
        out_ref, mid_ref):
    """Whole autoencoder forward for one (TM, input_size) batch tile.

    x tile:  bf16 [TM, input_size]
    weights: bf16 [K, N] (N on lanes -> fast MXU path, f32 accumulation)
    biases:  f32  [1, N]
    Bias-add + tanh are done in f32 (v5e has no bf16 VPU/EUP path).
    """

    def linear(h_bf16, w_ref, b_ref, apply_tanh):
        acc = jnp.dot(h_bf16, w_ref[...], preferred_element_type=jnp.float32)
        acc = acc + b_ref[...]
        if apply_tanh:
            acc = jnp.tanh(acc)          # transcendental -> EUP slot
        return acc                       # f32

    h = x_ref[...]                                        # bf16 tile
    # encoder
    h = linear(h, w1_ref, b1_ref, True).astype(jnp.bfloat16)
    h = linear(h, w2_ref, b2_ref, True).astype(jnp.bfloat16)
    mid = linear(h, w3_ref, b3_ref, True)                 # f32 [TM, middle]
    mid_ref[...] = mid.astype(mid_ref.dtype)
    # decoder (no activation on the last layer)
    h = linear(mid.astype(jnp.bfloat16), w4_ref, b4_ref, True).astype(jnp.bfloat16)
    h = linear(h, w5_ref, b5_ref, True).astype(jnp.bfloat16)
    out = linear(h, w6_ref, b6_ref, False)
    out_ref[...] = out.astype(out_ref.dtype)


def autoencoder_forward(params, x):
    """Returns (reconstruction, middle_x), matching the PyTorch forward.

    params: list of 6 (weight_bf16 [K, N], bias_f32 [N]) tuples.
    x: [batch, input_size] float32.
    """
    M, input_size = x.shape
    middle_size = params[2][0].shape[1]

    # Batch tile: multiple of 8 (sublane granularity), capped at 256 so a
    # single grid step fills the 256-row MXU on v6e/v7x (128 on v5e is a
    # subset of that).  Pad the batch up to a multiple of TM; padded rows are
    # computed on garbage-free zeros and sliced off afterwards.
    TM = min(256, _round_up(M, 8))
    M_pad = _round_up(M, TM)
    grid = (M_pad // TM,)

    x_bf16 = x.astype(jnp.bfloat16)
    if M_pad != M:
        x_bf16 = jnp.pad(x_bf16, ((0, M_pad - M), (0, 0)))

    flat_args = []
    weight_specs = []
    for (w, b) in params:
        b2 = b.reshape(1, -1)                 # f32 [1, N]
        flat_args += [w, b2]
        # Full-array blocks with a constant index_map: loaded once, resident
        # in VMEM across all batch-grid steps (no re-DMA).
        weight_specs += [
            pl.BlockSpec(w.shape, lambda i: (0, 0)),
            pl.BlockSpec(b2.shape, lambda i: (0, 0)),
        ]

    out, mid = pl.pallas_call(
        _fused_autoencoder_kernel,
        out_shape=(
            jax.ShapeDtypeStruct((M_pad, input_size), jnp.float32),
            jax.ShapeDtypeStruct((M_pad, middle_size), jnp.float32),
        ),
        grid=grid,
        in_specs=[pl.BlockSpec((TM, input_size), lambda i: (i, 0))] + weight_specs,
        out_specs=(
            pl.BlockSpec((TM, input_size), lambda i: (i, 0)),
            pl.BlockSpec((TM, middle_size), lambda i: (i, 0)),
        ),
        compiler_params=pltpu.CompilerParams(
            # Independent batch tiles: megacore/dual-TC sharding on v7x.
            dimension_semantics=("parallel",),
            # Residency budget: ~3.3 MB bf16 weights (+ double buffers) plus
            # <1 MB of activation tiles -> comfortably inside the default
            # scoped-VMEM limit on every generation, so no override needed.
        ),
    )(x_bf16, *flat_args)

    if M_pad != M:
        out = out[:M]
        mid = mid[:M]
    return out, mid


# -----------------------------------------------------------------------------
# Parameter construction (PyTorch nn.Linear default init), weights -> bf16
# -----------------------------------------------------------------------------
def init_linear_params(key, fan_in, fan_out):
    """U(-1/sqrt(fan_in), 1/sqrt(fan_in)); weight returned as bf16 [fan_in, fan_out]."""
    kw, kb = jax.random.split(key)
    bound = 1.0 / jnp.sqrt(jnp.asarray(fan_in, jnp.float32))
    w = jax.random.uniform(kw, (fan_in, fan_out), jnp.float32,
                           minval=-bound, maxval=bound)
    b = jax.random.uniform(kb, (fan_out,), jnp.float32,
                           minval=-bound, maxval=bound)
    return w.astype(jnp.bfloat16), b


def make_autoencoder_params(key, input_size, middle_size):
    dims = [
        (input_size, 1024), (1024, 512), (512, middle_size),   # encoder
        (middle_size, 512), (512, 1024), (1024, input_size),   # decoder
    ]
    keys = jax.random.split(key, len(dims))
    return [init_linear_params(k, fi, fo) for k, (fi, fo) in zip(keys, dims)]


# -----------------------------------------------------------------------------
# Pure-JAX reference (same bf16-quantized weights and bf16-quantized input,
# upcast to f32 for the math)
# -----------------------------------------------------------------------------
def autoencoder_reference(params, x):
    ws = [(w.astype(jnp.float32), b) for (w, b) in params]
    h = x.astype(jnp.bfloat16).astype(jnp.float32)   # same input quantization as kernel
    for (w, b) in ws[:3]:
        h = jnp.tanh(h @ w + b)
    mid = h
    h = jnp.tanh(mid @ ws[3][0] + ws[3][1])
    h = jnp.tanh(h @ ws[4][0] + ws[4][1])
    return h @ ws[5][0] + ws[5][1], mid


if __name__ == "__main__":
    input_size = 256
    middle_size = 32
    batch = 8

    key = jax.random.PRNGKey(0)
    k_params, k_x = jax.random.split(key)
    params = make_autoencoder_params(k_params, input_size, middle_size)
    x = jax.random.normal(k_x, (batch, input_size), dtype=jnp.float32)

    out, middle = autoencoder_forward(params, x)
    out = jax.block_until_ready(out)
    middle = jax.block_until_ready(middle)

    ref_out, ref_mid = autoencoder_reference(params, x)
    assert out.shape == (batch, input_size)
    assert middle.shape == (batch, middle_size)
    # Kernel feeds bf16 operands to the MXU -> tolerance loosened vs f32 ref.
    assert jnp.allclose(out, ref_out, atol=1e-2, rtol=1e-2), \
        float(jnp.max(jnp.abs(out - ref_out)))
    assert jnp.allclose(middle, ref_mid, atol=1e-2, rtol=1e-2), \
        float(jnp.max(jnp.abs(middle - ref_mid)))

    print("KERNEL_OK")
</pallas_src>

<mosaic_0001>
module attributes {stable_mosaic.version = 11 : i64} {
  func.func @_fused_autoencoder_kernel(%arg0: i32, %arg1: memref<8x256xbf16, #tpu.memory_space<vmem>>, %arg2: memref<256x1024xbf16, #tpu.memory_space<vmem>>, %arg3: memref<1x1024xf32, #tpu.memory_space<vmem>>, %arg4: memref<1024x512xbf16, #tpu.memory_space<vmem>>, %arg5: memref<1x512xf32, #tpu.memory_space<vmem>>, %arg6: memref<512x32xbf16, #tpu.memory_space<vmem>>, %arg7: memref<1x32xf32, #tpu.memory_space<vmem>>, %arg8: memref<32x512xbf16, #tpu.memory_space<vmem>>, %arg9: memref<1x512xf32, #tpu.memory_space<vmem>>, %arg10: memref<512x1024xbf16, #tpu.memory_space<vmem>>, %arg11: memref<1x1024xf32, #tpu.memory_space<vmem>>, %arg12: memref<1024x256xbf16, #tpu.memory_space<vmem>>, %arg13: memref<1x256xf32, #tpu.memory_space<vmem>>, %arg14: memref<8x256xf32, #tpu.memory_space<vmem>>, %arg15: memref<8x32xf32, #tpu.memory_space<vmem>>) attributes {dimension_semantics = [#tpu.dimension_semantics<parallel>], iteration_bounds = array<i64: 1>, scalar_prefetch = 0 : i64, scratch_operands = 0 : i64, tpu.core_type = #tpu.core_type<tc>, window_params = [{transform_indices = @transform_0, window_bounds = array<i64: 8, 256>}, {pipeline_mode = #tpu.pipeline_mode<synchronous>, transform_indices = @transform_1, window_bounds = array<i64: 256, 1024>}, {pipeline_mode = #tpu.pipeline_mode<synchronous>, transform_indices = @transform_2, window_bounds = array<i64: 1, 1024>}, {pipeline_mode = #tpu.pipeline_mode<synchronous>, transform_indices = @transform_3, window_bounds = array<i64: 1024, 512>}, {pipeline_mode = #tpu.pipeline_mode<synchronous>, transform_indices = @transform_4, window_bounds = array<i64: 1, 512>}, {pipeline_mode = #tpu.pipeline_mode<synchronous>, transform_indices = @transform_5, window_bounds = array<i64: 512, 32>}, {pipeline_mode = #tpu.pipeline_mode<synchronous>, transform_indices = @transform_6, window_bounds = array<i64: 1, 32>}, {pipeline_mode = #tpu.pipeline_mode<synchronous>, transform_indices = @transform_7, window_bounds = array<i64: 32, 512>}, {pipeline_mode = #tpu.pipeline_mode<synchronous>, transform_indices = @transform_8, window_bounds = array<i64: 1, 512>}, {pipeline_mode = #tpu.pipeline_mode<synchronous>, transform_indices = @transform_9, window_bounds = array<i64: 512, 1024>}, {pipeline_mode = #tpu.pipeline_mode<synchronous>, transform_indices = @transform_10, window_bounds = array<i64: 1, 1024>}, {pipeline_mode = #tpu.pipeline_mode<synchronous>, transform_indices = @transform_11, window_bounds = array<i64: 1024, 256>}, {pipeline_mode = #tpu.pipeline_mode<synchronous>, transform_indices = @transform_12, window_bounds = array<i64: 1, 256>}, {transform_indices = @transform_13, window_bounds = array<i64: 8, 256>}, {transform_indices = @transform_14, window_bounds = array<i64: 8, 32>}]} {
    %c0 = arith.constant 0 : index
    %c0_0 = arith.constant 0 : index
    %0 = vector.load %arg1[%c0, %c0_0] : memref<8x256xbf16, #tpu.memory_space<vmem>>, vector<8x256xbf16>
    %c0_1 = arith.constant 0 : index
    %c0_2 = arith.constant 0 : index
    %1 = vector.load %arg2[%c0_1, %c0_2] : memref<256x1024xbf16, #tpu.memory_space<vmem>>, vector<256x1024xbf16>
    %cst = arith.constant dense<0.000000e+00> : vector<8x1024xf32>
    %2 = tpu.matmul %0, %1, %cst {dimension_numbers = #tpu.dot_dimension_numbers<[1], [0], [0], [1], [0, 0, 1, 1], [], []>} : vector<8x256xbf16>, vector<256x1024xbf16>, vector<8x1024xf32> -> vector<8x1024xf32>
    %c0_3 = arith.constant 0 : index
    %c0_4 = arith.constant 0 : index
    %3 = vector.load %arg3[%c0_3, %c0_4] : memref<1x1024xf32, #tpu.memory_space<vmem>>, vector<1x1024xf32>
    %4 = vector.broadcast %3 : vector<1x1024xf32> to vector<8x1024xf32>
    %5 = arith.addf %2, %4 : vector<8x1024xf32>
    %6 = math.tanh %5 : vector<8x1024xf32>
    %7 = arith.truncf %6 : vector<8x1024xf32> to vector<8x1024xbf16>
    %c0_5 = arith.constant 0 : index
    %c0_6 = arith.constant 0 : index
    %8 = vector.load %arg4[%c0_5, %c0_6] : memref<1024x512xbf16, #tpu.memory_space<vmem>>, vector<1024x512xbf16>
    %cst_7 = arith.constant dense<0.000000e+00> : vector<8x512xf32>
    %9 = tpu.matmul %7, %8, %cst_7 {dimension_numbers = #tpu.dot_dimension_numbers<[1], [0], [0], [1], [0, 0, 1, 1], [], []>} : vector<8x1024xbf16>, vector<1024x512xbf16>, vector<8x512xf32> -> vector<8x512xf32>
    %c0_8 = arith.constant 0 : index
    %c0_9 = arith.constant 0 : index
    %10 = vector.load %arg5[%c0_8, %c0_9] : memref<1x512xf32, #tpu.memory_space<vmem>>, vector<1x512xf32>
    %11 = vector.broadcast %10 : vector<1x512xf32> to vector<8x512xf32>
    %12 = arith.addf %9, %11 : vector<8x512xf32>
    %13 = math.tanh %12 : vector<8x512xf32>
    %14 = arith.truncf %13 : vector<8x512xf32> to vector<8x512xbf16>
    %c0_10 = arith.constant 0 : index
    %c0_11 = arith.constant 0 : index
    %15 = vector.load %arg6[%c0_10, %c0_11] : memref<512x32xbf16, #tpu.memory_space<vmem>>, vector<512x32xbf16>
    %cst_12 = arith.constant dense<0.000000e+00> : vector<8x32xf32>
    %16 = tpu.matmul %14, %15, %cst_12 {dimension_numbers = #tpu.dot_dimension_numbers<[1], [0], [0], [1], [0, 0, 1, 1], [], []>} : vector<8x512xbf16>, vector<512x32xbf16>, vector<8x32xf32> -> vector<8x32xf32>
    %c0_13 = arith.constant 0 : index
    %c0_14 = arith.constant 0 : index
    %17 = vector.load %arg7[%c0_13, %c0_14] : memref<1x32xf32, #tpu.memory_space<vmem>>, vector<1x32xf32>
    %18 = vector.broadcast %17 : vector<1x32xf32> to vector<8x32xf32>
    %19 = arith.addf %16, %18 : vector<8x32xf32>
    %20 = math.tanh %19 : vector<8x32xf32>
    %c0_15 = arith.constant 0 : index
    %c0_16 = arith.constant 0 : index
    %21 = vector.load %arg15[%c0_15, %c0_16] : memref<8x32xf32, #tpu.memory_space<vmem>>, vector<8x32xf32>
    tpu.vector_store %arg15[%c0_15, %c0_16], %20 {strides = array<i32>} : memref<8x32xf32, #tpu.memory_space<vmem>>, vector<8x32xf32>,
    %22 = arith.truncf %20 : vector<8x32xf32> to vector<8x32xbf16>
    %c0_17 = arith.constant 0 : index
    %c0_18 = arith.constant 0 : index
    %23 = vector.load %arg8[%c0_17, %c0_18] : memref<32x512xbf16, #tpu.memory_space<vmem>>, vector<32x512xbf16>
    %cst_19 = arith.constant dense<0.000000e+00> : vector<8x512xf32>
    %24 = tpu.matmul %22, %23, %cst_19 {dimension_numbers = #tpu.dot_dimension_numbers<[1], [0], [0], [1], [0, 0, 1, 1], [], []>} : vector<8x32xbf16>, vector<32x512xbf16>, vector<8x512xf32> -> vector<8x512xf32>
    %c0_20 = arith.constant 0 : index
    %c0_21 = arith.constant 0 : index
    %25 = vector.load %arg9[%c0_20, %c0_21] : memref<1x512xf32, #tpu.memory_space<vmem>>, vector<1x512xf32>
    %26 = vector.broadcast %25 : vector<1x512xf32> to vector<8x512xf32>
    %27 = arith.addf %24, %26 : vector<8x512xf32>
    %28 = math.tanh %27 : vector<8x512xf32>
    %29 = arith.truncf %28 : vector<8x512xf32> to vector<8x512xbf16>
    %c0_22 = arith.constant 0 : index
    %c0_23 = arith.constant 0 : index
    %30 = vector.load %arg10[%c0_22, %c0_23] : memref<512x1024xbf16, #tpu.memory_space<vmem>>, vector<512x1024xbf16>
    %cst_24 = arith.constant dense<0.000000e+00> : vector<8x1024xf32>
    %31 = tpu.matmul %29, %30, %cst_24 {dimension_numbers = #tpu.dot_dimension_numbers<[1], [0], [0], [1], [0, 0, 1, 1], [], []>} : vector<8x512xbf16>, vector<512x1024xbf16>, vector<8x1024xf32> -> vector<8x1024xf32>
    %c0_25 = arith.constant 0 : index
    %c0_26 = arith.constant 0 : index
    %32 = vector.load %arg11[%c0_25, %c0_26] : memref<1x1024xf32, #tpu.memory_space<vmem>>, vector<1x1024xf32>
    %33 = vector.broadcast %32 : vector<1x1024xf32> to vector<8x1024xf32>
    %34 = arith.addf %31, %33 : vector<8x1024xf32>
    %35 = math.tanh %34 : vector<8x1024xf32>
    %36 = arith.truncf %35 : vector<8x1024xf32> to vector<8x1024xbf16>
    %c0_27 = arith.constant 0 : index
    %c0_28 = arith.constant 0 : index
    %37 = vector.load %arg12[%c0_27, %c0_28] : memref<1024x256xbf16, #tpu.memory_space<vmem>>, vector<1024x256xbf16>
    %cst_29 = arith.constant dense<0.000000e+00> : vector<8x256xf32>
    %38 = tpu.matmul %36, %37, %cst_29 {dimension_numbers = #tpu.dot_dimension_numbers<[1], [0], [0], [1], [0, 0, 1, 1], [], []>} : vector<8x1024xbf16>, vector<1024x256xbf16>, vector<8x256xf32> -> vector<8x256xf32>
    %c0_30 = arith.constant 0 : index
    %c0_31 = arith.constant 0 : index
    %39 = vector.load %arg13[%c0_30, %c0_31] : memref<1x256xf32, #tpu.memory_space<vmem>>, vector<1x256xf32>
    %40 = vector.broadcast %39 : vector<1x256xf32> to vector<8x256xf32>
    %41 = arith.addf %38, %40 : vector<8x256xf32>
    %c0_32 = arith.constant 0 : index
    %c0_33 = arith.constant 0 : index
    %42 = vector.load %arg14[%c0_32, %c0_33] : memref<8x256xf32, #tpu.memory_space<vmem>>, vector<8x256xf32>
    tpu.vector_store %arg14[%c0_32, %c0_33], %41 {strides = array<i32>} : memref<8x256xf32, #tpu.memory_space<vmem>>, vector<8x256xf32>,
    return
  }
  func.func @transform_0(%arg0: i32) -> (i32, i32) {
    %c0_i32 = arith.constant 0 : i32
    %c0_i32_0 = arith.constant 0 : i32
    return %arg0, %c0_i32 : i32, i32
  }
  func.func @transform_1(%arg0: i32) -> (i32, i32) {
    %c0_i32 = arith.constant 0 : i32
    %c0_i32_0 = arith.constant 0 : i32
    %c0_i32_1 = arith.constant 0 : i32
    return %c0_i32, %c0_i32_0 : i32, i32
  }
  func.func @transform_2(%arg0: i32) -> (i32, i32) {
    %c0_i32 = arith.constant 0 : i32
    %c0_i32_0 = arith.constant 0 : i32
    %c0_i32_1 = arith.constant 0 : i32
    return %c0_i32, %c0_i32_0 : i32, i32
  }
  func.func @transform_3(%arg0: i32) -> (i32, i32) {
    %c0_i32 = arith.constant 0 : i32
    %c0_i32_0 = arith.constant 0 : i32
    %c0_i32_1 = arith.constant 0 : i32
    return %c0_i32, %c0_i32_0 : i32, i32
  }
  func.func @transform_4(%arg0: i32) -> (i32, i32) {
    %c0_i32 = arith.constant 0 : i32
    %c0_i32_0 = arith.constant 0 : i32
    %c0_i32_1 = arith.constant 0 : i32
    return %c0_i32, %c0_i32_0 : i32, i32
  }
  func.func @transform_5(%arg0: i32) -> (i32, i32) {
    %c0_i32 = arith.constant 0 : i32
    %c0_i32_0 = arith.constant 0 : i32
    %c0_i32_1 = arith.constant 0 : i32
    return %c0_i32, %c0_i32_0 : i32, i32
  }
  func.func @transform_6(%arg0: i32) -> (i32, i32) {
    %c0_i32 = arith.constant 0 : i32
    %c0_i32_0 = arith.constant 0 : i32
    %c0_i32_1 = arith.constant 0 : i32
    return %c0_i32, %c0_i32_0 : i32, i32
  }
  func.func @transform_7(%arg0: i32) -> (i32, i32) {
    %c0_i32 = arith.constant 0 : i32
    %c0_i32_0 = arith.constant 0 : i32
    %c0_i32_1 = arith.constant 0 : i32
    return %c0_i32, %c0_i32_0 : i32, i32
  }
  func.func @transform_8(%arg0: i32) -> (i32, i32) {
    %c0_i32 = arith.constant 0 : i32
    %c0_i32_0 = arith.constant 0 : i32
    %c0_i32_1 = arith.constant 0 : i32
    return %c0_i32, %c0_i32_0 : i32, i32
  }
  func.func @transform_9(%arg0: i32) -> (i32, i32) {
    %c0_i32 = arith.constant 0 : i32
    %c0_i32_0 = arith.constant 0 : i32
    %c0_i32_1 = arith.constant 0 : i32
    return %c0_i32, %c0_i32_0 : i32, i32
  }
  func.func @transform_10(%arg0: i32) -> (i32, i32) {
    %c0_i32 = arith.constant 0 : i32
    %c0_i32_0 = arith.constant 0 : i32
    %c0_i32_1 = arith.constant 0 : i32
    return %c0_i32, %c0_i32_0 : i32, i32
  }
  func.func @transform_11(%arg0: i32) -> (i32, i32) {
    %c0_i32 = arith.constant 0 : i32
    %c0_i32_0 = arith.constant 0 : i32
    %c0_i32_1 = arith.constant 0 : i32
    return %c0_i32, %c0_i32_0 : i32, i32
  }
  func.func @transform_12(%arg0: i32) -> (i32, i32) {
    %c0_i32 = arith.constant 0 : i32
    %c0_i32_0 = arith.constant 0 : i32
    %c0_i32_1 = arith.constant 0 : i32
    return %c0_i32, %c0_i32_0 : i32, i32
  }
  func.func @transform_13(%arg0: i32) -> (i32, i32) {
    %c0_i32 = arith.constant 0 : i32
    %c0_i32_0 = arith.constant 0 : i32
    return %arg0, %c0_i32 : i32, i32
  }
  func.func @transform_14(%arg0: i32) -> (i32, i32) {
    %c0_i32 = arith.constant 0 : i32
    %c0_i32_0 = arith.constant 0 : i32
    return %arg0, %c0_i32 : i32, i32
  }
}

</mosaic_0001>

<bundles_post_ra>
// kernel: tpu_custom_call.1
= control target key start
LH: loop header
LB: loop body
LE: loop exit
PB: predicated region body
PF: predicated region fallthrough
CT: control target
= control target key end

     0   :  { %20 = vsyncpa [#allocation3], 0  ;;  %s8482_s0 = inlined_call_operand.vmem [shape: bf16[8,256], index: 0, kind: input, shape index: {}]   ;;  %s8483_s1 = inlined_call_operand.hbm [shape: bf16[256,1024], index: 1, kind: input, shape index: {}]   ;;  %s8484_s2 = inlined_call_operand.vmem [shape: f32[1,1024], index: 2, kind: input, shape index: {}]   ;;  %s8485_s3 = inlined_call_operand.hbm [shape: bf16[1024,512], index: 3, kind: input, shape index: {}]   ;;  %s8486_s4 = inlined_call_operand.vmem [shape: f32[1,512], index: 4, kind: input, shape index: {}]   ;;  %s8487_s5 = inlined_call_operand.vmem [shape: bf16[512,32], index: 5, kind: input, shape index: {}]   ;;  %s8488_s6 = inlined_call_operand.vmem [shape: f32[1,32], index: 6, kind: input, shape index: {}]   ;;  %s8489_s7 = inlined_call_operand.vmem [shape: bf16[32,512], index: 7, kind: input, shape index: {}]   ;;  %s8490_s8 = inlined_call_operand.vmem [shape: f32[1,512], index: 8, kind: input, shape index: {}]   ;;  %s8491_s9 = inlined_call_operand.hbm [shape: bf16[512,1024], index: 9, kind: input, shape index: {}]   ;;  %s8492_s10 = inlined_call_operand.vmem [shape: f32[1,1024], index: 10, kind: input, shape index: {}]   ;;  %s8493_s11 = inlined_call_operand.hbm [shape: bf16[1024,256], index: 11, kind: input, shape index: {}]   ;;  %s8494_s12 = inlined_call_operand.vmem [shape: f32[1,256], index: 12, kind: input, shape index: {}]   ;;  %s8495_s13 = inlined_call_operand.hbm [shape: f32[8,256], index: 13, kind: output, shape index: {0}]   ;;  %s8496_s14 = inlined_call_operand.hbm [shape: f32[8,32], index: 14, kind: output, shape index: {1}]  }
   0x1   :  { %21 = vsyncpa [#allocation6], 0 }
   0x2   :  { %22 = vsyncpa [#allocation9], 0 }
   0x3   :  { %23 = vsyncpa [#allocation4], 0 }
   0x4   :  { %24 = vsyncpa [#allocation12], 0  ;;  %s8077_s29 = smov [#allocation5]  }
   0x5   :  { %s46_s30 = sshll.u32 %s8077_s29, 4  ;;  %s47_s30 = int_to_ptr.vmem [resolvable:$true] %s46_s30 }
   0x6   :  { %s7955_s15 = scalar_lea.vmem %s47_s30, 32768  ;;  %p7960_p1 = scmp.lt.s32.totalorder %s47_s30, %s47_s30 }
   0x7   :  { %p7956_p0 = scmp.ne.s32.totalorder %s47_s30, %s7955_s15  ;;  %p7961_p2 = scmp.lt.s32.totalorder %s7955_s15, %s7955_s15 }
   0x9   :  { %p7962_p3 = por %p7961_p2, %p7960_p1 }
   0xb   :  { %p7963_p4 = pnand %p7962_p3, %p7956_p0 }
   0xd   :  { %7966 = shalt.err (!%p7963_p4)
}
   0xe   :  { %s8078_s16 = smov 256   ;;  %s8079_s17 = smov 16  }
   0xf   :  { %52 = dma.hbm_to_vmem [thread:$0]  %s8485_s3, 32768, %s47_s30, [#allocation6], %s8078_s16, %s8078_s16, %s8079_s17  }
  0x10   :  { %s8080_s20 = smov [#allocation2]  }
  0x11   :  { %s32_s21 = sshll.u32 %s8080_s20, 4  ;;  %s33_s21 = int_to_ptr.vmem [resolvable:$true] %s32_s21 }
  0x12   :  { %s7975_s22 = scalar_lea.vmem %s33_s21, 16384  ;;  %p7980_p6 = scmp.lt.s32.totalorder %s33_s21, %s33_s21 }
  0x13   :  { %p7976_p5 = scmp.ne.s32.totalorder %s33_s21, %s7975_s22  ;;  %p7981_p7 = scmp.lt.s32.totalorder %s7975_s22, %s7975_s22 }
  0x15   :  { %p7982_p8 = por %p7981_p7, %p7980_p6 }
  0x17   :  { %p7983_p9 = pnand %p7982_p8, %p7976_p5 }
  0x19   :  { %7986 = shalt.err (!%p7983_p9)
}
  0x1a   :  { %s8081_s23 = smov 512   ;;  %s8082_s24 = smov 32  }
  0x1b   :  { %38 = dma.hbm_to_vmem [thread:$0]  %s8483_s1, 16384, %s33_s21, [#allocation3], %s8081_s23, %s8081_s23, %s8082_s24  }
  0x1c   :  { %s8083_s27 = smov [#allocation7]   ;;  %s8084_s29 = smov [#allocation8]  }
  0x1d   :  { %s68_s28 = sshll.u32 %s8083_s27, 4  ;;  %s82_s3 = sshll.u32 %s8084_s29, 4  ;;  %s69_s28 = int_to_ptr.vmem [resolvable:$true] %s68_s28  ;;  %s83_s3 = int_to_ptr.vmem [resolvable:$true] %s82_s3 }
  0x1e   :  { %s7995_s30 = scalar_lea.vmem %s69_s28, 32768  ;;  %p8000_p11 = scmp.lt.s32.totalorder %s69_s28, %s69_s28 }
  0x1f   :  { %p7996_p10 = scmp.ne.s32.totalorder %s69_s28, %s7995_s30  ;;  %p8001_p12 = scmp.lt.s32.totalorder %s7995_s30, %s7995_s30 }
  0x21   :  { %p8002_p13 = por %p8001_p12, %p8000_p11 }
  0x23   :  { %p8003_p0 = pnand %p8002_p13, %p7996_p10 }
  0x25   :  { %8006 = shalt.err (!%p8003_p0)
}
  0x26   :  { %74 = dma.hbm_to_vmem [thread:$0]  %s8491_s9, 32768, %s69_s28, [#allocation6], %s8081_s23, %s8081_s23, %s8082_s24  }
  0x27   :  { %s8015_s17 = scalar_lea.vmem %s83_s3, 16384  ;;  %p8020_p2 = scmp.lt.s32.totalorder %s83_s3, %s83_s3 }
  0x28   :  { %p8016_p1 = scmp.ne.s32.totalorder %s83_s3, %s8015_s17  ;;  %p8021_p3 = scmp.lt.s32.totalorder %s8015_s17, %s8015_s17 }
  0x2a   :  { %p8022_p4 = por %p8021_p3, %p8020_p2 }
  0x2c   :  { %p8023_p5 = pnand %p8022_p4, %p8016_p1 }
  0x2e   :  { %8026 = shalt.err (!%p8023_p5)
}
  0x2f   :  { %s8085_s1 = smov 128   ;;  %s8086_s18 = smov 8  }
  0x30   :  { %88 = dma.hbm_to_vmem [thread:$0]  %s8493_s11, 16384, %s83_s3, [#allocation9], %s8085_s1, %s8085_s1, %s8086_s18  }
  0x31   :  { %8067 = dma.done.wait [#allocation3], 16384  }
  0x32   :  { %8068 = vsyncadd [#allocation3], 4294950912 }
  0x33   :  { %8069 = dma.done.wait [#allocation6], 65536  }
  0x34   :  { %8070 = vsyncadd [#allocation6], 4294901760 }
  0x35   :  { %8071 = dma.done.wait [#allocation9], 16384  }
  0x36   :  { %8072 = vsyncadd [#allocation9], 4294950912  ;;  %v161_v0 = vld [vmem:[#allocation2 + $0x1c0] sm:$0xff]  ;;  %v162_v2 = vld [vmem:[#allocation2 + $0x1c8] sm:$0xff]  ;;  %vm3340_vm0 = vcmask 261120   ;;  %s8088_s20 = smov [#allocation11]  }
  0x37   :  { %v165_v1 = vld [vmem:[#allocation2 + $0x1e0] sm:$0xff]  ;;  %v166_v4 = vld [vmem:[#allocation2 + $0x1e8] sm:$0xff]  ;;  %s6390_s9 = sshll.u32 %s8088_s20, 4  ;;  %s6391_s9 = int_to_ptr.vmem [resolvable:$true] %s6390_s9 }
  0x38   :  { %v6464_v3 = vcombine.high %v161_v0, %v165_v1  ;;  %v6463_v5 = vcombine.low %v161_v0, %v165_v1  ;;  %v153_v6 = vld [vmem:[#allocation2 + $0x180] sm:$0xff]  ;;  %v6466_v8 = vcombine.high %v162_v2, %v166_v4  ;;  %v6465_v9 = vcombine.low %v162_v2, %v166_v4  ;;  %v154_v11 = vld [vmem:[#allocation2 + $0x188] sm:$0xff]  ;;  %s8027_s11 = scalar_lea.vmem %s6391_s9, 128  ;;  %p8032_p7 = scmp.lt.s32.totalorder %s6391_s9, %s6391_s9 }
  0x39   :  { %v157_v7 = vld [vmem:[#allocation2 + $0x1a0] sm:$0xff]  ;;  %v158_v12 = vld [vmem:[#allocation2 + $0x1a8] sm:$0xff]  ;;  %p8028_p6 = scmp.ne.s32.totalorder %s6391_s9, %s8027_s11  ;;  %p8033_p8 = scmp.lt.s32.totalorder %s8027_s11, %s8027_s11 }
  0x3a   :  { %v6456_v10 = vcombine.high %v153_v6, %v157_v7  ;;  %v145_v13 = vld [vmem:[#allocation2 + $0x140] sm:$0xff]  ;;  %922 = vmatprep.subr.bf16.mxu0 %v6464_v3  ;;  %v6458_v14 = vcombine.high %v154_v11, %v158_v12  ;;  %v146_v16 = vld [vmem:[#allocation2 + $0x148] sm:$0xff]  ;;  %963 = vmatprep.subr.bf16.mxu1 %v6466_v8  ;;  %v6455_v18 = vcombine.low %v153_v6, %v157_v7 }
  0x3b   :  { %v149_v15 = vld [vmem:[#allocation2 + $0x160] sm:$0xff]  ;;  %v150_v17 = vld [vmem:[#allocation2 + $0x168] sm:$0xff]  ;;  %923 = vmatpush1.bf16.msra.mxu0 %v6463_v5  ;;  %964 = vmatpush1.bf16.msra.mxu1 %v6465_v9  ;;  %v6457_v19 = vcombine.low %v154_v11, %v158_v12  ;;  %p8034_p9 = por %p8033_p8, %p8032_p7 }
  0x3c   :  { %924 = vmatprep.subr.bf16.mxu0 %v6456_v10  ;;  %v6448_v20 = vcombine.high %v145_v13, %v149_v15  ;;  %965 = vmatprep.subr.bf16.mxu1 %v6458_v14  ;;  %v6450_v21 = vcombine.high %v146_v16, %v150_v17  ;;  %v137_v22 = vld [vmem:[#allocation2 + $0x100] sm:$0xff]  ;;  %v138_v24 = vld [vmem:[#allocation2 + $0x108] sm:$0xff]  ;;  %v6447_v26 = vcombine.low %v145_v13, %v149_v15 }
  0x3d   :  { %v141_v23 = vld [vmem:[#allocation2 + $0x120] sm:$0xff]  ;;  %v142_v25 = vld [vmem:[#allocation2 + $0x128] sm:$0xff]  ;;  %v6449_v27 = vcombine.low %v146_v16, %v150_v17  ;;  %p8035_p10 = pnand %p8034_p9, %p8028_p6 }
  0x3e   :  { %v6440_v28 = vcombine.high %v137_v22, %v141_v23  ;;  %v6442_v29 = vcombine.high %v138_v24, %v142_v25  ;;  %v129_v30 = vld [vmem:[#allocation2 + $0xc0] sm:$0xff]  ;;  %v130_v32 = vld [vmem:[#allocation2 + $0xc8] sm:$0xff]  ;;  %v6439_v34 = vcombine.low %v137_v22, %v141_v23  ;;  %v6441_v35 = vcombine.low %v138_v24, %v142_v25 }
  0x3f   :  { %925 = vmatpush1.bf16.msra.mxu0 %v6455_v18  ;;  %966 = vmatpush1.bf16.msra.mxu1 %v6457_v19  ;;  %v133_v31 = vld [vmem:[#allocation2 + $0xe0] sm:$0xff]  ;;  %v134_v33 = vld [vmem:[#allocation2 + $0xe8] sm:$0xff] }
  0x40   :  { %926 = vmatprep.subr.bf16.mxu0 %v6448_v20  ;;  %967 = vmatprep.subr.bf16.mxu1 %v6450_v21  ;;  %v6432_v36 = vcombine.high %v129_v30, %v133_v31  ;;  %v6434_v37 = vcombine.high %v130_v32, %v134_v33  ;;  %v121_v38 = vld [vmem:[#allocation2 + $0x80] sm:$0xff]  ;;  %v122_v40 = vld [vmem:[#allocation2 + $0x88] sm:$0xff]  ;;  %v6431_v42 = vcombine.low %v129_v30, %v133_v31 }
  0x41   :  { %v125_v39 = vld [vmem:[#allocation2 + $0xa0] sm:$0xff]  ;;  %v126_v41 = vld [vmem:[#allocation2 + $0xa8] sm:$0xff]  ;;  %v6433_v43 = vcombine.low %v130_v32, %v134_v33 }
  0x42   :  { %v6424_v44 = vcombine.high %v121_v38, %v125_v39  ;;  %v6426_v45 = vcombine.high %v122_v40, %v126_v41  ;;  %v113_v46 = vld [vmem:[#allocation2 + $0x40] sm:$0xff]  ;;  %v114_v48 = vld [vmem:[#allocation2 + $0x48] sm:$0xff]  ;;  %v6423_v50 = vcombine.low %v121_v38, %v125_v39  ;;  %v6425_v51 = vcombine.low %v122_v40, %v126_v41 }
  0x43   :  { %927 = vmatpush1.bf16.msra.mxu0 %v6447_v26  ;;  %968 = vmatpush1.bf16.msra.mxu1 %v6449_v27  ;;  %v117_v47 = vld [vmem:[#allocation2 + $0x60] sm:$0xff]  ;;  %v118_v49 = vld [vmem:[#allocation2 + $0x68] sm:$0xff] }
  0x44   :  { %928 = vmatprep.subr.bf16.mxu0 %v6440_v28  ;;  %969 = vmatprep.subr.bf16.mxu1 %v6442_v29  ;;  %v6416_v52 = vcombine.high %v113_v46, %v117_v47  ;;  %v8180_v53 = vld [vmem:[%s8482_s0] sm:$0xff]  ;;  %v6418_v54 = vcombine.high %v114_v48, %v118_v49  ;;  %v106_v58 = vld [vmem:[#allocation2 + $0x8] sm:$0xff]  ;;  %v6415_v60 = vcombine.low %v113_v46, %v117_v47 }
  0x45   :  { %v105_v55 = vld [vmem:[#allocation2] sm:$0xff]  ;;  %v8184_v57 = vcombine.high %v8180_v53, %v8180_v53  ;;  %v110_v59 = vld [vmem:[#allocation2 + $0x28] sm:$0xff]  ;;  %v6417_v61 = vcombine.low %v114_v48, %v118_v49 }
  0x46   :  { %v109_v56 = vld [vmem:[#allocation2 + $0x20] sm:$0xff]  ;;  %v6410_v63 = vcombine.high %v106_v58, %v110_v59  ;;  %v226_v2 = vld [vmem:[#allocation2 + $0x3c8] sm:$0xff]  ;;  %v6409_v5 = vcombine.low %v106_v58, %v110_v59 }
  0x47   :  { %929 = vmatpush1.bf16.msra.mxu0 %v6439_v34  ;;  %970 = vmatpush1.bf16.msra.mxu1 %v6441_v35  ;;  %v6408_v62 = vcombine.high %v105_v55, %v109_v56  ;;  %v225_v0 = vld [vmem:[#allocation2 + $0x3c0] sm:$0xff]  ;;  %v230_v3 = vld [vmem:[#allocation2 + $0x3e8] sm:$0xff]  ;;  %v6407_v4 = vcombine.low %v105_v55, %v109_v56 }
  0x48   :  { %930 = vmatprep.subr.bf16.mxu0 %v6432_v36  ;;  %971 = vmatprep.subr.bf16.mxu1 %v6434_v37  ;;  %v229_v1 = vld [vmem:[#allocation2 + $0x3e0] sm:$0xff]  ;;  %v6530_v7 = vcombine.high %v226_v2, %v230_v3  ;;  %v218_v10 = vld [vmem:[#allocation2 + $0x388] sm:$0xff]  ;;  %v6529_v13 = vcombine.low %v226_v2, %v230_v3  ;;  %v167_v3 = vld [vmem:[#allocation2 + $0x1f0] sm:$0xff] }
  0x49   :  { %954 = vmatprep.mubr.bf16.mxu0 %v8184_v57  ;;  %995 = vmatprep.mubr.bf16.mxu1 %v8184_v57  ;;  %v6528_v6 = vcombine.high %v225_v0, %v229_v1  ;;  %v217_v8 = vld [vmem:[#allocation2 + $0x380] sm:$0xff]  ;;  %v222_v11 = vld [vmem:[#allocation2 + $0x3a8] sm:$0xff]  ;;  %v6527_v12 = vcombine.low %v225_v0, %v229_v1  ;;  %v163_v1 = vld [vmem:[#allocation2 + $0x1d0] sm:$0xff] }
  0x4a   :  { %v221_v9 = vld [vmem:[#allocation2 + $0x3a0] sm:$0xff]  ;;  %v6522_v15 = vcombine.high %v218_v10, %v222_v11  ;;  %v210_v18 = vld [vmem:[#allocation2 + $0x348] sm:$0xff]  ;;  %v6521_v21 = vcombine.low %v218_v10, %v222_v11  ;;  %v159_v11 = vld [vmem:[#allocation2 + $0x1b0] sm:$0xff] }
  0x4b   :  { %931 = vmatpush1.bf16.msra.mxu0 %v6431_v42  ;;  %972 = vmatpush1.bf16.msra.mxu1 %v6433_v43  ;;  %v6520_v14 = vcombine.high %v217_v8, %v221_v9  ;;  %v209_v16 = vld [vmem:[#allocation2 + $0x340] sm:$0xff]  ;;  %v214_v19 = vld [vmem:[#allocation2 + $0x368] sm:$0xff]  ;;  %v6519_v20 = vcombine.low %v217_v8, %v221_v9  ;;  %v6468_v8 = vcombine.high %v163_v1, %v167_v3  ;;  %v155_v9 = vld [vmem:[#allocation2 + $0x190] sm:$0xff] }
  0x4c   :  { %932 = vmatprep.subr.bf16.mxu0 %v6424_v44  ;;  %973 = vmatprep.subr.bf16.mxu1 %v6426_v45  ;;  %v213_v17 = vld [vmem:[#allocation2 + $0x360] sm:$0xff]  ;;  %v6514_v23 = vcombine.high %v210_v18, %v214_v19  ;;  %v202_v26 = vld [vmem:[#allocation2 + $0x308] sm:$0xff]  ;;  %v6513_v29 = vcombine.low %v210_v18, %v214_v19  ;;  %v147_v18 = vld [vmem:[#allocation2 + $0x150] sm:$0xff] }
  0x4d   :  { %v6512_v22 = vcombine.high %v209_v16, %v213_v17  ;;  %v201_v24 = vld [vmem:[#allocation2 + $0x300] sm:$0xff]  ;;  %v206_v27 = vld [vmem:[#allocation2 + $0x328] sm:$0xff]  ;;  %v6511_v28 = vcombine.low %v209_v16, %v213_v17  ;;  %v6460_v17 = vcombine.high %v155_v9, %v159_v11 }
  0x4e   :  { %v205_v25 = vld [vmem:[#allocation2 + $0x320] sm:$0xff]  ;;  %v6506_v31 = vcombine.high %v202_v26, %v206_v27  ;;  %v194_v34 = vld [vmem:[#allocation2 + $0x2c8] sm:$0xff]  ;;  %v6505_v37 = vcombine.low %v202_v26, %v206_v27  ;;  %v143_v27 = vld [vmem:[#allocation2 + $0x130] sm:$0xff] }
  0x4f   :  { %933 = vmatpush1.bf16.msra.mxu0 %v6423_v50  ;;  %974 = vmatpush1.bf16.msra.mxu1 %v6425_v51  ;;  %v6504_v30 = vcombine.high %v201_v24, %v205_v25  ;;  %v193_v32 = vld [vmem:[#allocation2 + $0x2c0] sm:$0xff]  ;;  %v198_v35 = vld [vmem:[#allocation2 + $0x2e8] sm:$0xff]  ;;  %v6503_v36 = vcombine.low %v201_v24, %v205_v25  ;;  %v139_v25 = vld [vmem:[#allocation2 + $0x110] sm:$0xff] }
  0x50   :  { %934 = vmatprep.subr.bf16.mxu0 %v6416_v52  ;;  %975 = vmatprep.subr.bf16.mxu1 %v6418_v54  ;;  %v197_v33 = vld [vmem:[#allocation2 + $0x2e0] sm:$0xff]  ;;  %v6498_v40 = vcombine.high %v194_v34, %v198_v35  ;;  %v186_v42 = vld [vmem:[#allocation2 + $0x288] sm:$0xff]  ;;  %v6497_v45 = vcombine.low %v194_v34, %v198_v35  ;;  %v6444_v34 = vcombine.high %v139_v25, %v143_v27  ;;  %v132_v35 = vld [vmem:[#allocation2 + $0xd8] sm:$0xff] }
  0x51   :  { %v6496_v38 = vcombine.high %v193_v32, %v197_v33  ;;  %v185_v39 = vld [vmem:[#allocation2 + $0x280] sm:$0xff]  ;;  %v190_v43 = vld [vmem:[#allocation2 + $0x2a8] sm:$0xff]  ;;  %v6495_v44 = vcombine.low %v193_v32, %v197_v33  ;;  %v135_v32 = vld [vmem:[#allocation2 + $0xf0] sm:$0xff] }
  0x52   :  { %v189_v41 = vld [vmem:[#allocation2 + $0x2a0] sm:$0xff]  ;;  %v6490_v48 = vcombine.high %v186_v42, %v190_v43  ;;  %v178_v50 = vld [vmem:[#allocation2 + $0x248] sm:$0xff]  ;;  %v6489_v54 = vcombine.low %v186_v42, %v190_v43  ;;  %v124_v42 = vld [vmem:[#allocation2 + $0x98] sm:$0xff] }
  0x53   :  { %935 = vmatpush1.bf16.msra.mxu0 %v6415_v60  ;;  %976 = vmatpush1.bf16.msra.mxu1 %v6417_v61  ;;  %v6488_v46 = vcombine.high %v185_v39, %v189_v41  ;;  %v177_v47 = vld [vmem:[#allocation2 + $0x240] sm:$0xff]  ;;  %v182_v51 = vld [vmem:[#allocation2 + $0x268] sm:$0xff]  ;;  %v6487_v52 = vcombine.low %v185_v39, %v189_v41  ;;  %v123_v39 = vld [vmem:[#allocation2 + $0x90] sm:$0xff] }
  0x54   :  { %936 = vmatprep.subr.bf16.mxu0 %v6408_v62  ;;  %977 = vmatprep.subr.bf16.mxu1 %v6410_v63  ;;  %v181_v49 = vld [vmem:[#allocation2 + $0x260] sm:$0xff]  ;;  %v6482_v58 = vcombine.high %v178_v50, %v182_v51  ;;  %v170_v60 = vld [vmem:[#allocation2 + $0x208] sm:$0xff]  ;;  %v6481_v63 = vcombine.low %v178_v50, %v182_v51  ;;  %v128_v43 = vld [vmem:[#allocation2 + $0xb8] sm:$0xff] }
  0x55   :  { %v6480_v55 = vcombine.high %v177_v47, %v181_v49  ;;  %v169_v56 = vld [vmem:[#allocation2 + $0x200] sm:$0xff]  ;;  %v174_v61 = vld [vmem:[#allocation2 + $0x228] sm:$0xff]  ;;  %v6479_v62 = vcombine.low %v177_v47, %v181_v49  ;;  %v119_v47 = vld [vmem:[#allocation2 + $0x70] sm:$0xff] }
  0x56   :  { %v173_v59 = vld [vmem:[#allocation2 + $0x220] sm:$0xff]  ;;  %v6474_v2 = vcombine.high %v170_v60, %v174_v61  ;;  %v116_v50 = vld [vmem:[#allocation2 + $0x58] sm:$0xff] }
  0x57   :  { %937 = vmatpush1.bf16.msra.mxu0 %v6407_v4  ;;  %978 = vmatpush1.bf16.msra.mxu1 %v6409_v5  ;;  %v6472_v0 = vcombine.high %v169_v56, %v173_v59  ;;  %v164_v4 = vld [vmem:[#allocation2 + $0x1d8] sm:$0xff] }
  0x58   :  { %938 = vmatprep.subr.bf16.mxu0 %v6528_v6  ;;  %979 = vmatprep.subr.bf16.mxu1 %v6530_v7  ;;  %v168_v5 = vld [vmem:[#allocation2 + $0x1f8] sm:$0xff]  ;;  %v6471_v6 = vcombine.low %v169_v56, %v173_v59  ;;  %v6473_v7 = vcombine.low %v170_v60, %v174_v61  ;;  %v111_v56 = vld [vmem:[#allocation2 + $0x30] sm:$0xff] }
  0x59   :  { %v6470_v10 = vcombine.high %v164_v4, %v168_v5  ;;  %v6469_v16 = vcombine.low %v164_v4, %v168_v5  ;;  %v120_v51 = vld [vmem:[#allocation2 + $0x78] sm:$0xff] }
  0x5a   :  { %v108_v60 = vld [vmem:[#allocation2 + $0x18] sm:$0xff] }
  0x5b   :  { %939 = vmatpush2.bf16.msra.mxu0 %v6527_v12  ;;  %980 = vmatpush2.bf16.msra.mxu1 %v6529_v13  ;;  %v156_v12 = vld [vmem:[#allocation2 + $0x198] sm:$0xff]  ;;  %v8190_v13 = vcombine.low %v8180_v53, %v8180_v53  ;;  %v6459_v53 = vcombine.low %v155_v9, %v159_v11  ;;  %v223_v9 = vld [vmem:[#allocation2 + $0x3b0] sm:$0xff] }
  0x5c   :  { %940 = vmatprep.subr.bf16.mxu0 %v6520_v14  ;;  %981 = vmatprep.subr.bf16.mxu1 %v6522_v15  ;;  %v160_v14 = vld [vmem:[#allocation2 + $0x1b8] sm:$0xff]  ;;  %v6467_v15 = vcombine.low %v163_v1, %v167_v3  ;;  %v231_v1 = vld [vmem:[#allocation2 + $0x3f0] sm:$0xff] }
  0x5d   :  { %v6462_v19 = vcombine.high %v156_v12, %v160_v14  ;;  %v112_v61 = vld [vmem:[#allocation2 + $0x38] sm:$0xff] }
  0x5e   :  { %v228_v4 = vld [vmem:[#allocation2 + $0x3d8] sm:$0xff] }
  0x5f   :  { %941 = vmatpush2.bf16.msra.mxu0 %v6519_v20  ;;  %982 = vmatpush2.bf16.msra.mxu1 %v6521_v21  ;;  %v151_v20 = vld [vmem:[#allocation2 + $0x170] sm:$0xff]  ;;  %v148_v21 = vld [vmem:[#allocation2 + $0x158] sm:$0xff] }
  0x60   :  { %942 = vmatprep.subr.bf16.mxu0 %v6512_v22  ;;  %983 = vmatprep.subr.bf16.mxu1 %v6514_v23  ;;  %v152_v22 = vld [vmem:[#allocation2 + $0x178] sm:$0xff]  ;;  %v6461_v23 = vcombine.low %v156_v12, %v160_v14  ;;  %v6452_v24 = vcombine.high %v147_v18, %v151_v20 }
  0x61   :  { %v6454_v26 = vcombine.high %v148_v21, %v152_v22  ;;  %v6453_v33 = vcombine.low %v148_v21, %v152_v22  ;;  %v232_v5 = vld [vmem:[#allocation2 + $0x3f8] sm:$0xff] }
  0x62   :  { %v220_v12 = vld [vmem:[#allocation2 + $0x398] sm:$0xff] }
  0x63   :  { %943 = vmatpush2.bf16.msra.mxu0 %v6511_v28  ;;  %984 = vmatpush2.bf16.msra.mxu1 %v6513_v29  ;;  %v140_v28 = vld [vmem:[#allocation2 + $0x118] sm:$0xff] }
  0x64   :  { %944 = vmatprep.subr.bf16.mxu0 %v6504_v30  ;;  %985 = vmatprep.subr.bf16.mxu1 %v6506_v31  ;;  %v144_v29 = vld [vmem:[#allocation2 + $0x138] sm:$0xff]  ;;  %v6451_v30 = vcombine.low %v147_v18, %v151_v20  ;;  %v131_v31 = vld [vmem:[#allocation2 + $0xd0] sm:$0xff] }
  0x65   :  { %v6445_v41 = vcombine.low %v140_v28, %v144_v29  ;;  %v224_v14 = vld [vmem:[#allocation2 + $0x3b8] sm:$0xff]  ;;  %v215_v18 = vld [vmem:[#allocation2 + $0x370] sm:$0xff] }
  0x66   :  { %v212_v21 = vld [vmem:[#allocation2 + $0x358] sm:$0xff] }
  0x67   :  { %945 = vmatpush2.bf16.msra.mxu0 %v6503_v36  ;;  %986 = vmatpush2.bf16.msra.mxu1 %v6505_v37  ;;  %v136_v36 = vld [vmem:[#allocation2 + $0xf8] sm:$0xff]  ;;  %v6446_v37 = vcombine.high %v140_v28, %v144_v29 }
  0x68   :  { %946 = vmatprep.subr.bf16.mxu0 %v6496_v38  ;;  %987 = vmatprep.subr.bf16.mxu1 %v6498_v40  ;;  %v6443_v38 = vcombine.low %v139_v25, %v143_v27  ;;  %v127_v40 = vld [vmem:[#allocation2 + $0xb0] sm:$0xff]  ;;  %v216_v22 = vld [vmem:[#allocation2 + $0x378] sm:$0xff] }
  0x69   :  { %v6428_v49 = vcombine.high %v123_v39, %v127_v40  ;;  %v207_v25 = vld [vmem:[#allocation2 + $0x330] sm:$0xff]  ;;  %v204_v28 = vld [vmem:[#allocation2 + $0x318] sm:$0xff] }
  0x6a   :  { %v208_v29 = vld [vmem:[#allocation2 + $0x338] sm:$0xff] }
  0x6b   :  { %947 = vmatpush2.bf16.msra.mxu0 %v6495_v44  ;;  %988 = vmatpush2.bf16.msra.mxu1 %v6497_v45  ;;  %v6438_v44 = vcombine.high %v132_v35, %v136_v36  ;;  %v6435_v45 = vcombine.low %v131_v31, %v135_v32 }
  0x6c   :  { %948 = vmatprep.subr.bf16.mxu0 %v6488_v46  ;;  %989 = vmatprep.subr.bf16.mxu1 %v6490_v48  ;;  %v115_v46 = vld [vmem:[#allocation2 + $0x50] sm:$0xff]  ;;  %v6437_v48 = vcombine.low %v132_v35, %v136_v36  ;;  %v196_v36 = vld [vmem:[#allocation2 + $0x2d8] sm:$0xff] }
  0x6d   :  { %v6420_v59 = vcombine.high %v115_v46, %v119_v47 }
  0x6f   :  { %949 = vmatpush2.bf16.msra.mxu0 %v6487_v52  ;;  %990 = vmatpush2.bf16.msra.mxu1 %v6489_v54  ;;  %v6430_v52 = vcombine.high %v124_v42, %v128_v43  ;;  %v6427_v54 = vcombine.low %v123_v39, %v127_v40  ;;  %v187_v40 = vld [vmem:[#allocation2 + $0x290] sm:$0xff] }
  0x70   :  { %950 = vmatprep.subr.bf16.mxu0 %v6480_v55  ;;  %991 = vmatprep.subr.bf16.mxu1 %v6482_v58  ;;  %v107_v55 = vld [vmem:[#allocation2 + $0x10] sm:$0xff]  ;;  %v6429_v58 = vcombine.low %v124_v42, %v128_v43  ;;  %v188_v43 = vld [vmem:[#allocation2 + $0x298] sm:$0xff] }
  0x71   :  { %v6412_v3 = vcombine.high %v107_v55, %v111_v56 }
  0x73   :  { %951 = vmatpush2.bf16.msra.mxu0 %v6479_v62  ;;  %992 = vmatpush2.bf16.msra.mxu1 %v6481_v63  ;;  %v6422_v62 = vcombine.high %v116_v50, %v120_v51  ;;  %v6419_v63 = vcombine.low %v115_v46, %v119_v47  ;;  %v179_v47 = vld [vmem:[#allocation2 + $0x250] sm:$0xff] }
  0x74   :  { %952 = vmatprep.subr.bf16.mxu0 %v6472_v0  ;;  %993 = vmatprep.subr.bf16.mxu1 %v6474_v2  ;;  %v227_v0 = vld [vmem:[#allocation2 + $0x3d0] sm:$0xff]  ;;  %v6421_v2 = vcombine.low %v116_v50, %v120_v51  ;;  %v180_v51 = vld [vmem:[#allocation2 + $0x258] sm:$0xff] }
  0x75   :  { %v6532_v11 = vcombine.high %v227_v0, %v231_v1 }
  0x77   :  { %953 = vmatpush2.bf16.msra.mxu0 %v6471_v6  ;;  %994 = vmatpush2.bf16.msra.mxu1 %v6473_v7  ;;  %v6414_v6 = vcombine.high %v108_v60, %v112_v61  ;;  %v6411_v7 = vcombine.low %v107_v55, %v111_v56  ;;  %v171_v56 = vld [vmem:[#allocation2 + $0x210] sm:$0xff] }
  0x78   :  { %1004 = vmatprep.subr.bf16.mxu0 %v6468_v8  ;;  %1045 = vmatprep.subr.bf16.mxu1 %v6470_v10  ;;  %v219_v8 = vld [vmem:[#allocation2 + $0x390] sm:$0xff]  ;;  %v6413_v10 = vcombine.low %v108_v60, %v112_v61  ;;  %v172_v61 = vld [vmem:[#allocation2 + $0x218] sm:$0xff] }
  0x79   :  { %v6524_v20 = vcombine.high %v219_v8, %v223_v9 }
  0x7a   :  { %955 = vmatmul.mubr.bf16.vlgmr.msra.gmra.mxu0 %v8190_v13  ;;  %996 = vmatmul.mubr.bf16.vlgmr.msra.gmra.mxu1 %v8190_v13 }
  0x7b   :  { %1005 = vmatpush1.bf16.msra.mxu0 %v6467_v15  ;;  %1046 = vmatpush1.bf16.msra.mxu1 %v6469_v16  ;;  %v6534_v15 = vcombine.high %v228_v4, %v232_v5  ;;  %v6531_v16 = vcombine.low %v227_v0, %v231_v1 }
  0x7c   :  { %1006 = vmatprep.subr.bf16.mxu0 %v6460_v17  ;;  %1047 = vmatprep.subr.bf16.mxu1 %v6462_v19  ;;  %v211_v17 = vld [vmem:[#allocation2 + $0x350] sm:$0xff]  ;;  %v6533_v19 = vcombine.low %v228_v4, %v232_v5 }
  0x7d   :  { %1036 = vmatprep.mubr.bf16.mxu0 %v8184_v57  ;;  %1077 = vmatprep.mubr.bf16.mxu1 %v8184_v57  ;;  %v6436_v57 = vcombine.high %v131_v31, %v135_v32  ;;  %v6516_v27 = vcombine.high %v211_v17, %v215_v18  ;;  %v6515_v31 = vcombine.low %v211_v17, %v215_v18  ;;  %v195_v32 = vld [vmem:[#allocation2 + $0x2d0] sm:$0xff] }
  0x7e   :  { %v7279_v4 = vld [vmem:[#allocation5 + $0xe4] ss:$16 sps:$4 sm:$0xff]   ;;  %v7289_v17 = vld [vmem:[#allocation5 + $0xa0] ss:$16 sps:$4 sm:$0xff]  }
  0x7f   :  { %1007 = vmatpush1.bf16.msra.mxu0 %v6459_v53  ;;  %1048 = vmatpush1.bf16.msra.mxu1 %v6461_v23  ;;  %v6526_v53 = vcombine.high %v220_v12, %v224_v14  ;;  %v6523_v23 = vcombine.low %v219_v8, %v223_v9  ;;  %v7277_v8 = vld [vmem:[#allocation5 + $0xe0] ss:$16 sps:$4 sm:$0xff]  }
  0x80   :  { %1008 = vmatprep.subr.bf16.mxu0 %v6452_v24  ;;  %1049 = vmatprep.subr.bf16.mxu1 %v6454_v26  ;;  %v203_v24 = vld [vmem:[#allocation2 + $0x310] sm:$0xff]  ;;  %v6525_v26 = vcombine.low %v220_v12, %v224_v14 }
  0x81   :  { %v6508_v35 = vcombine.high %v203_v24, %v207_v25  ;;  %v6507_v39 = vcombine.low %v203_v24, %v207_v25  ;;  %v7280_v9 = vld [vmem:[#allocation5 + $0x2e0] ss:$16 sps:$4 sm:$0xff]   ;;  %v7309_v25 = vld [vmem:[#allocation5 + $0x44] ss:$16 sps:$4 sm:$0xff]  }
  0x82   :  { %v7283_v12 = vld [vmem:[#allocation5 + $0xc0] ss:$16 sps:$4 sm:$0xff]  }
  0x83   :  { %1009 = vmatpush1.bf16.msra.mxu0 %v6451_v30  ;;  %1050 = vmatpush1.bf16.msra.mxu1 %v6453_v33  ;;  %v6518_v30 = vcombine.high %v212_v21, %v216_v22  ;;  %v199_v33 = vld [vmem:[#allocation2 + $0x2f0] sm:$0xff] }
  0x84   :  { %1010 = vmatprep.subr.bf16.mxu0 %v6444_v34  ;;  %1051 = vmatprep.subr.bf16.mxu1 %v6446_v37  ;;  %v6517_v34 = vcombine.low %v212_v21, %v216_v22  ;;  %v200_v37 = vld [vmem:[#allocation2 + $0x2f8] sm:$0xff]  ;;  %v6500_v42 = vcombine.high %v195_v32, %v199_v33  ;;  %v6499_v46 = vcombine.low %v195_v32, %v199_v33  ;;  %v7286_v14 = vld [vmem:[#allocation5 + $0x2c0] ss:$16 sps:$4 sm:$0xff]   ;;  %v7321_v33 = vld [vmem:[#allocation5 + $0x4] ss:$16 sps:$4 sm:$0xff]  }
  0x85   :  { %v7292_v18 = vld [vmem:[#allocation5 + $0x2a0] ss:$16 sps:$4 sm:$0xff]  }
  0x86   :  { %v7295_v21 = vld [vmem:[#allocation5 + $0x80] ss:$16 sps:$4 sm:$0xff]  }
  0x87   :  { %1011 = vmatpush1.bf16.msra.mxu0 %v6443_v38  ;;  %1052 = vmatpush1.bf16.msra.mxu1 %v6445_v41  ;;  %v6510_v38 = vcombine.high %v204_v28, %v208_v29  ;;  %v191_v41 = vld [vmem:[#allocation2 + $0x2b0] sm:$0xff] }
  0x88   :  { %1012 = vmatprep.subr.bf16.mxu0 %v6436_v57  ;;  %1053 = vmatprep.subr.bf16.mxu1 %v6438_v44  ;;  %v6509_v57 = vcombine.low %v204_v28, %v208_v29  ;;  %v192_v44 = vld [vmem:[#allocation2 + $0x2b8] sm:$0xff]  ;;  %v6492_v50 = vcombine.high %v187_v40, %v191_v41  ;;  %v6491_v55 = vcombine.low %v187_v40, %v191_v41  ;;  %v7298_v22 = vld [vmem:[#allocation5 + $0x280] ss:$16 sps:$4 sm:$0xff]   ;;  %v7315_v29 = vld [vmem:[#allocation5 + $0x24] ss:$16 sps:$4 sm:$0xff]  }
  0x89   :  { %v7304_v24 = vld [vmem:[#allocation5 + $0x260] ss:$16 sps:$4 sm:$0xff]   ;;  %v7333_v41 = vld [vmem:[#allocation5 + $0x1c4] ss:$16 sps:$4 sm:$0xff]  }
  0x8a   :  { %v7310_v28 = vld [vmem:[#allocation5 + $0x240] ss:$16 sps:$4 sm:$0xff]  }
  0x8b   :  { %1013 = vmatpush1.bf16.msra.mxu0 %v6435_v45  ;;  %1054 = vmatpush1.bf16.msra.mxu1 %v6437_v48  ;;  %v6502_v45 = vcombine.high %v196_v36, %v200_v37  ;;  %v183_v48 = vld [vmem:[#allocation2 + $0x270] sm:$0xff] }
  0x8c   :  { %1014 = vmatprep.subr.bf16.mxu0 %v6428_v49  ;;  %1055 = vmatprep.subr.bf16.mxu1 %v6430_v52  ;;  %v6501_v49 = vcombine.low %v196_v36, %v200_v37  ;;  %v184_v52 = vld [vmem:[#allocation2 + $0x278] sm:$0xff]  ;;  %v6484_v60 = vcombine.high %v179_v47, %v183_v48  ;;  %v6483_v0 = vcombine.low %v179_v47, %v183_v48  ;;  %v7316_v32 = vld [vmem:[#allocation5 + $0x220] ss:$16 sps:$4 sm:$0xff]   ;;  %v7327_v37 = vld [vmem:[#allocation5 + $0x1e4] ss:$16 sps:$4 sm:$0xff]  }
  0x8d   :  { %v6485_v1 = vcombine.low %v180_v51, %v184_v52  ;;  %v7322_v36 = vld [vmem:[#allocation5 + $0x200] ss:$16 sps:$4 sm:$0xff]   ;;  %v7345_v48 = vld [vmem:[#allocation5 + $0x184] ss:$16 sps:$4 sm:$0xff]  }
  0x8e   :  { %v7328_v40 = vld [vmem:[#allocation5 + $0x3e0] ss:$16 sps:$4 sm:$0xff]  }
  0x8f   :  { %1015 = vmatpush1.bf16.msra.mxu0 %v6427_v54  ;;  %1056 = vmatpush1.bf16.msra.mxu1 %v6429_v58  ;;  %v6494_v54 = vcombine.high %v188_v43, %v192_v44  ;;  %v175_v58 = vld [vmem:[#allocation2 + $0x230] sm:$0xff] }
  0x90   :  { %1016 = vmatprep.subr.bf16.mxu0 %v6420_v59  ;;  %1057 = vmatprep.subr.bf16.mxu1 %v6422_v62  ;;  %v6493_v59 = vcombine.low %v188_v43, %v192_v44  ;;  %v176_v62 = vld [vmem:[#allocation2 + $0x238] sm:$0xff]  ;;  %v6475_v5 = vcombine.low %v171_v56, %v175_v58  ;;  %v7334_v43 = vld [vmem:[#allocation5 + $0x3c0] ss:$16 sps:$4 sm:$0xff]   ;;  %v7339_v44 = vld [vmem:[#allocation5 + $0x1a4] ss:$16 sps:$4 sm:$0xff]  }
  0x91   :  { %v7340_v47 = vld [vmem:[#allocation5 + $0x3a0] ss:$16 sps:$4 sm:$0xff]  }
  0x93   :  { %1017 = vmatpush1.bf16.msra.mxu0 %v6419_v63  ;;  %1058 = vmatpush1.bf16.msra.mxu1 %v6421_v2  ;;  %v6486_v63 = vcombine.high %v180_v51, %v184_v52  ;;  %v6476_v2 = vcombine.high %v171_v56, %v175_v58  ;;  %v7346_v51 = vld [vmem:[#allocation5 + $0x380] ss:$16 sps:$4 sm:$0xff]   ;;  %v7351_v52 = vld [vmem:[#allocation5 + $0x164] ss:$16 sps:$4 sm:$0xff]  }
  0x94   :  { %1018 = vmatprep.subr.bf16.mxu0 %v6412_v3  ;;  %1059 = vmatprep.subr.bf16.mxu1 %v6414_v6  ;;  %v6478_v3 = vcombine.high %v172_v61, %v176_v62  ;;  %v7282_v6 = vld [vmem:[#allocation5 + $0x2e4] ss:$16 sps:$4 sm:$0xff]   ;;  %v7352_v56 = vld [vmem:[#allocation5 + $0x360] ss:$16 sps:$4 sm:$0xff]  }
  0x95   :  { %v7357_v58 = vld [vmem:[#allocation5 + $0x144] ss:$16 sps:$4 sm:$0xff]  }
  0x97   :  { %1019 = vmatpush1.bf16.msra.mxu0 %v6411_v7  ;;  %1060 = vmatpush1.bf16.msra.mxu1 %v6413_v10  ;;  %v6477_v7 = vcombine.low %v172_v61, %v176_v62  ;;  %v7285_v10 = vld [vmem:[#allocation5 + $0xc4] ss:$16 sps:$4 sm:$0xff]   ;;  %v7358_v61 = vld [vmem:[#allocation5 + $0x340] ss:$16 sps:$4 sm:$0xff]  }
  0x98   :  { %1020 = vmatprep.subr.bf16.mxu0 %v6532_v11  ;;  %1061 = vmatprep.subr.bf16.mxu1 %v6534_v15  ;;  %v7288_v11 = vld [vmem:[#allocation5 + $0x2c4] ss:$16 sps:$4 sm:$0xff]  }
  0x99   :  { %v7291_v15 = vld [vmem:[#allocation5 + $0xa4] ss:$16 sps:$4 sm:$0xff]  }
  0x9a   :  { %v7363_v62 = vld [vmem:[#allocation5 + $0x124] ss:$16 sps:$4 sm:$0xff]  }
  0x9b   :  { %1021 = vmatpush2.bf16.msra.mxu0 %v6531_v16  ;;  %1062 = vmatpush2.bf16.msra.mxu1 %v6533_v19  ;;  %v7294_v16 = vld [vmem:[#allocation5 + $0x2a4] ss:$16 sps:$4 sm:$0xff]  }
  0x9c   :  { %1022 = vmatprep.subr.bf16.mxu0 %v6524_v20  ;;  %1063 = vmatprep.subr.bf16.mxu1 %v6526_v53  ;;  %v7297_v19 = vld [vmem:[#allocation5 + $0x84] ss:$16 sps:$4 sm:$0xff]  }
  0x9d   :  { %v7300_v20 = vld [vmem:[#allocation5 + $0x284] ss:$16 sps:$4 sm:$0xff]  }
  0x9e   :  { %v7303_v53 = vld [vmem:[#allocation5 + $0x64] ss:$16 sps:$4 sm:$0xff]  }
  0x9f   :  { %1023 = vmatpush2.bf16.msra.mxu0 %v6523_v23  ;;  %1064 = vmatpush2.bf16.msra.mxu1 %v6525_v26  ;;  %v7306_v23 = vld [vmem:[#allocation5 + $0x264] ss:$16 sps:$4 sm:$0xff]  }
  0xa0   :  { %1024 = vmatprep.subr.bf16.mxu0 %v6516_v27  ;;  %1065 = vmatprep.subr.bf16.mxu1 %v6518_v30  ;;  %v7312_v26 = vld [vmem:[#allocation5 + $0x244] ss:$16 sps:$4 sm:$0xff]   ;;  %v7307_v27 = vld [vmem:[#allocation5 + $0x40] ss:$16 sps:$4 sm:$0xff]  }
  0xa1   :  { %v7318_v30 = vld [vmem:[#allocation5 + $0x224] ss:$16 sps:$4 sm:$0xff]  }
  0xa3   :  { %1025 = vmatpush2.bf16.msra.mxu0 %v6515_v31  ;;  %1066 = vmatpush2.bf16.msra.mxu1 %v6517_v34  ;;  %v7313_v31 = vld [vmem:[#allocation5 + $0x20] ss:$16 sps:$4 sm:$0xff]   ;;  %v7324_v34 = vld [vmem:[#allocation5 + $0x204] ss:$16 sps:$4 sm:$0xff]  }
  0xa4   :  { %1026 = vmatprep.subr.bf16.mxu0 %v6508_v35  ;;  %1067 = vmatprep.subr.bf16.mxu1 %v6510_v38  ;;  %v7319_v35 = vld [vmem:[#allocation5] ss:$16 sps:$4 sm:$0xff]   ;;  %v7330_v38 = vld [vmem:[#allocation5 + $0x3e4] ss:$16 sps:$4 sm:$0xff]  }
  0xa7   :  { %1027 = vmatpush2.bf16.msra.mxu0 %v6507_v39  ;;  %1068 = vmatpush2.bf16.msra.mxu1 %v6509_v57  ;;  %v7325_v39 = vld [vmem:[#allocation5 + $0x1e0] ss:$16 sps:$4 sm:$0xff]   ;;  %v7336_v57 = vld [vmem:[#allocation5 + $0x3c4] ss:$16 sps:$4 sm:$0xff]  }
  0xa8   :  { %1028 = vmatprep.subr.bf16.mxu0 %v6500_v42  ;;  %1069 = vmatprep.subr.bf16.mxu1 %v6502_v45  ;;  %v7331_v42 = vld [vmem:[#allocation5 + $0x1c0] ss:$16 sps:$4 sm:$0xff]   ;;  %v7342_v45 = vld [vmem:[#allocation5 + $0x3a4] ss:$16 sps:$4 sm:$0xff]  }
  0xab   :  { %1029 = vmatpush2.bf16.msra.mxu0 %v6499_v46  ;;  %1070 = vmatpush2.bf16.msra.mxu1 %v6501_v49  ;;  %v7337_v46 = vld [vmem:[#allocation5 + $0x1a0] ss:$16 sps:$4 sm:$0xff]   ;;  %v7348_v49 = vld [vmem:[#allocation5 + $0x384] ss:$16 sps:$4 sm:$0xff]  }
  0xac   :  { %1030 = vmatprep.subr.bf16.mxu0 %v6492_v50  ;;  %1071 = vmatprep.subr.bf16.mxu1 %v6494_v54  ;;  %v7343_v50 = vld [vmem:[#allocation5 + $0x180] ss:$16 sps:$4 sm:$0xff]   ;;  %v7354_v54 = vld [vmem:[#allocation5 + $0x364] ss:$16 sps:$4 sm:$0xff]  }
  0xaf   :  { %1031 = vmatpush2.bf16.msra.mxu0 %v6491_v55  ;;  %1072 = vmatpush2.bf16.msra.mxu1 %v6493_v59  ;;  %v7349_v55 = vld [vmem:[#allocation5 + $0x160] ss:$16 sps:$4 sm:$0xff]   ;;  %v7360_v59 = vld [vmem:[#allocation5 + $0x344] ss:$16 sps:$4 sm:$0xff]  }
  0xb0   :  { %1032 = vmatprep.subr.bf16.mxu0 %v6484_v60  ;;  %1073 = vmatprep.subr.bf16.mxu1 %v6486_v63  ;;  %v7355_v60 = vld [vmem:[#allocation5 + $0x140] ss:$16 sps:$4 sm:$0xff]   ;;  %v7366_v63 = vld [vmem:[#allocation5 + $0x324] ss:$16 sps:$4 sm:$0xff]  }
  0xb3   :  { %1033 = vmatpush2.bf16.msra.mxu0 %v6483_v0  ;;  %1074 = vmatpush2.bf16.msra.mxu1 %v6485_v1  ;;  %v7361_v0 = vld [vmem:[#allocation5 + $0x120] ss:$16 sps:$4 sm:$0xff]  }
  0xb4   :  { %1034 = vmatprep.subr.bf16.mxu0 %v6476_v2  ;;  %1075 = vmatprep.subr.bf16.mxu1 %v6478_v3  ;;  %v7364_v1 = vld [vmem:[#allocation5 + $0x320] ss:$16 sps:$4 sm:$0xff]   ;;  %v7369_v2 = vld [vmem:[#allocation5 + $0x104] ss:$16 sps:$4 sm:$0xff]  }
  0xb5   :  { %v7372_v3 = vld [vmem:[#allocation5 + $0x304] ss:$16 sps:$4 sm:$0xff]  }
  0xb7   :  { %1035 = vmatpush2.bf16.msra.mxu0 %v6475_v5  ;;  %1076 = vmatpush2.bf16.msra.mxu1 %v6477_v7  ;;  %v7370_v5 = vld [vmem:[#allocation5 + $0x300] ss:$16 sps:$4 sm:$0xff]   ;;  %v7378_v7 = vld [vmem:[#allocation5 + $0x6e4] ss:$16 sps:$4 sm:$0xff]  }
  0xb8   :  { %2660 = vmatprep.subr.bf16.mxu0 %v7279_v4  ;;  %2701 = vmatprep.subr.bf16.mxu1 %v7282_v6  ;;  %v7367_v4 = vld [vmem:[#allocation5 + $0x100] ss:$16 sps:$4 sm:$0xff]   ;;  %v7375_v6 = vld [vmem:[#allocation5 + $0x4e4] ss:$16 sps:$4 sm:$0xff]  }
  0xba   :  { %1037 = vmatmul.mubr.bf16.vlgmr.msra.gmra.mxu0 %v8190_v13  ;;  %1078 = vmatmul.mubr.bf16.vlgmr.msra.gmra.mxu1 %v8190_v13  ;;  %v7301_v13 = vld [vmem:[#allocation5 + $0x60] ss:$16 sps:$4 sm:$0xff]  }
  0xbb   :  { %2661 = vmatpush1.bf16.msra.mxu0 %v7277_v8  ;;  %2702 = vmatpush1.bf16.msra.mxu1 %v7280_v9  ;;  %v235_v8 = vlaneseq }
  0xbc   :  { %2662 = vmatprep.subr.bf16.mxu0 %v7285_v10  ;;  %2703 = vmatprep.subr.bf16.mxu1 %v7288_v11  ;;  %v8206_v11 = vld [vmem:[%s8484_s2] sm:$0xff] }
  0xbd   :  { %v8198_v9 = vshrl.u32 %v235_v8, 7  ;;  %v7424_v8 = vld [vmem:[#allocation5 + $0x7e0] ss:$16 sps:$4 sm:$0xff]  }
  0xbf   :  { %2663 = vmatpush1.bf16.msra.mxu0 %v7283_v12  ;;  %2704 = vmatpush1.bf16.msra.mxu1 %v7286_v14  ;;  %v8201_v10 = vsub.s32 0, %v8198_v9  ;;  %v8209_v12 = vsub.s32 2, %v8198_v9  ;;  %v8212_v14 = vsub.s32 1, %v8198_v9 }
  0xc0   :  { %2664 = vmatprep.subr.bf16.mxu0 %v7291_v15  ;;  %2705 = vmatprep.subr.bf16.mxu1 %v7294_v16  ;;  %v8215_v15 = vsub.s32 3, %v8198_v9 }
  0xc1   :  { %v238_v16 = vrot.slane %v8206_v11, %v8201_v10 }
  0xc3   :  { %2665 = vmatpush1.bf16.msra.mxu0 %v7289_v17  ;;  %2706 = vmatpush1.bf16.msra.mxu1 %v7292_v18  ;;  %v246_v17 = vrot.slane %v8206_v11, %v8209_v12  ;;  %v242_v18 = vrot.slane %v8206_v11, %v8212_v14 }
  0xc4   :  { %2666 = vmatprep.subr.bf16.mxu0 %v7297_v19  ;;  %2707 = vmatprep.subr.bf16.mxu1 %v7300_v20  ;;  %v250_v20 = vrot.slane %v8206_v11, %v8215_v15 }
  0xc7   :  { %2667 = vmatpush1.bf16.msra.mxu0 %v7295_v21  ;;  %2708 = vmatpush1.bf16.msra.mxu1 %v7298_v22 }
  0xc8   :  { %2668 = vmatprep.subr.bf16.mxu0 %v7303_v53  ;;  %2709 = vmatprep.subr.bf16.mxu1 %v7306_v23 }
  0xcb   :  { %2669 = vmatpush1.bf16.msra.mxu0 %v7301_v13  ;;  %2710 = vmatpush1.bf16.msra.mxu1 %v7304_v24 }
  0xcc   :  { %2670 = vmatprep.subr.bf16.mxu0 %v7309_v25  ;;  %2711 = vmatprep.subr.bf16.mxu1 %v7312_v26 }
  0xcf   :  { %2671 = vmatpush1.bf16.msra.mxu0 %v7307_v27  ;;  %2712 = vmatpush1.bf16.msra.mxu1 %v7310_v28 }
  0xd0   :  { %2672 = vmatprep.subr.bf16.mxu0 %v7315_v29  ;;  %2713 = vmatprep.subr.bf16.mxu1 %v7318_v30 }
  0xd3   :  { %2673 = vmatpush1.bf16.msra.mxu0 %v7313_v31  ;;  %2714 = vmatpush1.bf16.msra.mxu1 %v7316_v32 }
  0xd4   :  { %2674 = vmatprep.subr.bf16.mxu0 %v7321_v33  ;;  %2715 = vmatprep.subr.bf16.mxu1 %v7324_v34 }
  0xd7   :  { %2675 = vmatpush1.bf16.msra.mxu0 %v7319_v35  ;;  %2716 = vmatpush1.bf16.msra.mxu1 %v7322_v36  ;;  %v7373_v36 = vld [vmem:[#allocation5 + $0x4e0] ss:$16 sps:$4 sm:$0xff]  }
  0xd8   :  { %2676 = vmatprep.subr.bf16.mxu0 %v7327_v37  ;;  %2717 = vmatprep.subr.bf16.mxu1 %v7330_v38 }
  0xdb   :  { %2677 = vmatpush2.bf16.msra.mxu0 %v7325_v39  ;;  %2718 = vmatpush2.bf16.msra.mxu1 %v7328_v40  ;;  %v7376_v39 = vld [vmem:[#allocation5 + $0x6e0] ss:$16 sps:$4 sm:$0xff]   ;;  %v7381_v40 = vld [vmem:[#allocation5 + $0x4c4] ss:$16 sps:$4 sm:$0xff]  }
  0xdc   :  { %2678 = vmatprep.subr.bf16.mxu0 %v7333_v41  ;;  %2719 = vmatprep.subr.bf16.mxu1 %v7336_v57  ;;  %v7384_v41 = vld [vmem:[#allocation5 + $0x6c4] ss:$16 sps:$4 sm:$0xff]   ;;  %v7379_v57 = vld [vmem:[#allocation5 + $0x4c0] ss:$16 sps:$4 sm:$0xff]  }
  0xdf   :  { %2679 = vmatpush2.bf16.msra.mxu0 %v7331_v42  ;;  %2720 = vmatpush2.bf16.msra.mxu1 %v7334_v43  ;;  %v7382_v42 = vld [vmem:[#allocation5 + $0x6c0] ss:$16 sps:$4 sm:$0xff]   ;;  %v7387_v43 = vld [vmem:[#allocation5 + $0x4a4] ss:$16 sps:$4 sm:$0xff]  }
  0xe0   :  { %2680 = vmatprep.subr.bf16.mxu0 %v7339_v44  ;;  %2721 = vmatprep.subr.bf16.mxu1 %v7342_v45  ;;  %v7390_v44 = vld [vmem:[#allocation5 + $0x6a4] ss:$16 sps:$4 sm:$0xff]   ;;  %v7385_v45 = vld [vmem:[#allocation5 + $0x4a0] ss:$16 sps:$4 sm:$0xff]  }
  0xe3   :  { %2681 = vmatpush2.bf16.msra.mxu0 %v7337_v46  ;;  %2722 = vmatpush2.bf16.msra.mxu1 %v7340_v47  ;;  %v7388_v46 = vld [vmem:[#allocation5 + $0x6a0] ss:$16 sps:$4 sm:$0xff]   ;;  %v7393_v47 = vld [vmem:[#allocation5 + $0x484] ss:$16 sps:$4 sm:$0xff]  }
  0xe4   :  { %2682 = vmatprep.subr.bf16.mxu0 %v7345_v48  ;;  %2723 = vmatprep.subr.bf16.mxu1 %v7348_v49  ;;  %v7396_v48 = vld [vmem:[#allocation5 + $0x684] ss:$16 sps:$4 sm:$0xff]   ;;  %v7391_v49 = vld [vmem:[#allocation5 + $0x480] ss:$16 sps:$4 sm:$0xff]  }
  0xe7   :  { %2683 = vmatpush2.bf16.msra.mxu0 %v7343_v50  ;;  %2724 = vmatpush2.bf16.msra.mxu1 %v7346_v51  ;;  %v7394_v50 = vld [vmem:[#allocation5 + $0x680] ss:$16 sps:$4 sm:$0xff]   ;;  %v7399_v51 = vld [vmem:[#allocation5 + $0x464] ss:$16 sps:$4 sm:$0xff]  }
  0xe8   :  { %2684 = vmatprep.subr.bf16.mxu0 %v7351_v52  ;;  %2725 = vmatprep.subr.bf16.mxu1 %v7354_v54  ;;  %v7402_v52 = vld [vmem:[#allocation5 + $0x664] ss:$16 sps:$4 sm:$0xff]   ;;  %v7397_v54 = vld [vmem:[#allocation5 + $0x460] ss:$16 sps:$4 sm:$0xff]  }
  0xeb   :  { %2685 = vmatpush2.bf16.msra.mxu0 %v7349_v55  ;;  %2726 = vmatpush2.bf16.msra.mxu1 %v7352_v56  ;;  %v7400_v55 = vld [vmem:[#allocation5 + $0x660] ss:$16 sps:$4 sm:$0xff]   ;;  %v7405_v56 = vld [vmem:[#allocation5 + $0x444] ss:$16 sps:$4 sm:$0xff]  }
  0xec   :  { %2686 = vmatprep.subr.bf16.mxu0 %v7357_v58  ;;  %2727 = vmatprep.subr.bf16.mxu1 %v7360_v59  ;;  %v7408_v58 = vld [vmem:[#allocation5 + $0x644] ss:$16 sps:$4 sm:$0xff]   ;;  %v7403_v59 = vld [vmem:[#allocation5 + $0x440] ss:$16 sps:$4 sm:$0xff]  }
  0xef   :  { %2687 = vmatpush2.bf16.msra.mxu0 %v7355_v60  ;;  %2728 = vmatpush2.bf16.msra.mxu1 %v7358_v61  ;;  %v7406_v60 = vld [vmem:[#allocation5 + $0x640] ss:$16 sps:$4 sm:$0xff]   ;;  %v7411_v61 = vld [vmem:[#allocation5 + $0x424] ss:$16 sps:$4 sm:$0xff]  }
  0xf0   :  { %2688 = vmatprep.subr.bf16.mxu0 %v7363_v62  ;;  %2729 = vmatprep.subr.bf16.mxu1 %v7366_v63  ;;  %v7414_v62 = vld [vmem:[#allocation5 + $0x624] ss:$16 sps:$4 sm:$0xff]   ;;  %v7409_v63 = vld [vmem:[#allocation5 + $0x420] ss:$16 sps:$4 sm:$0xff]  }
  0xf3   :  { %2689 = vmatpush2.bf16.msra.mxu0 %v7361_v0  ;;  %2730 = vmatpush2.bf16.msra.mxu1 %v7364_v1  ;;  %v7412_v0 = vld [vmem:[#allocation5 + $0x620] ss:$16 sps:$4 sm:$0xff]   ;;  %v7417_v1 = vld [vmem:[#allocation5 + $0x404] ss:$16 sps:$4 sm:$0xff]  }
  0xf4   :  { %2690 = vmatprep.subr.bf16.mxu0 %v7369_v2  ;;  %2731 = vmatprep.subr.bf16.mxu1 %v7372_v3  ;;  %v7420_v2 = vld [vmem:[#allocation5 + $0x604] ss:$16 sps:$4 sm:$0xff]   ;;  %v7415_v3 = vld [vmem:[#allocation5 + $0x400] ss:$16 sps:$4 sm:$0xff]  }
  0xf7   :  { %2691 = vmatpush2.bf16.msra.mxu0 %v7367_v4  ;;  %2732 = vmatpush2.bf16.msra.mxu1 %v7370_v5  ;;  %v7418_v4 = vld [vmem:[#allocation5 + $0x600] ss:$16 sps:$4 sm:$0xff]   ;;  %v7423_v5 = vld [vmem:[#allocation5 + $0x5e4] ss:$16 sps:$4 sm:$0xff]  }
  0xf8   :  { %2742 = vmatprep.subr.bf16.mxu0 %v7375_v6  ;;  %2783 = vmatprep.subr.bf16.mxu1 %v7378_v7  ;;  %v7426_v6 = vld [vmem:[#allocation5 + $0x7e4] ss:$16 sps:$4 sm:$0xff]   ;;  %v7421_v7 = vld [vmem:[#allocation5 + $0x5e0] ss:$16 sps:$4 sm:$0xff]  }
 0x13a   :  { %v956_v19 = vpop.f32.mrf.mxu0  ;;  %v997_v22 = vpop.f32.mrf.mxu1 }
 0x13b   :  { %v957_v21 = vadd.f32 %v956_v19, %v238_v16  ;;  %v998_v53 = vadd.f32 %v997_v22, %v246_v17  ;;  %v7429_v16 = vld [vmem:[#allocation5 + $0x5c4] ss:$16 sps:$4 sm:$0xff]   ;;  %v7430_v19 = vld [vmem:[#allocation5 + $0x7c0] ss:$16 sps:$4 sm:$0xff]   ;;  %v253_v22 = vsub.s32 4, %v8198_v9 }
 0x13c   :  { %v958_v23 = vpop.f32.mrf.mxu0  ;;  %v999_v24 = vpop.f32.mrf.mxu1  ;;  %v7432_v17 = vld [vmem:[#allocation5 + $0x7c4] ss:$16 sps:$4 sm:$0xff]  }
 0x13d   :  { %7897 = vtanh.f32 %v957_v21  ;;  %v959_v13 = vadd.f32 %v958_v23, %v242_v18  ;;  %v1000_v25 = vadd.f32 %v999_v24, %v250_v20  ;;  %v7427_v18 = vld [vmem:[#allocation5 + $0x5c0] ss:$16 sps:$4 sm:$0xff]   ;;  %v7435_v20 = vld [vmem:[#allocation5 + $0x5a4] ss:$16 sps:$4 sm:$0xff]  }
 0x13e   :  { %7899 = vtanh.f32 %v998_v53  ;;  %v960_v26 = vpop.f32.mrf.mxu0  ;;  %v1001_v27 = vpop.f32.mrf.mxu1  ;;  %v7438_v21 = vld [vmem:[#allocation5 + $0x7a4] ss:$16 sps:$4 sm:$0xff]   ;;  %v261_v53 = vsub.s32 6, %v8198_v9  ;;  %v7433_v23 = vld [vmem:[#allocation5 + $0x5a0] ss:$16 sps:$4 sm:$0xff]  }
 0x13f   :  { %7901 = vtanh.f32 %v959_v13  ;;  %v257_v13 = vsub.s32 5, %v8198_v9  ;;  %v7436_v24 = vld [vmem:[#allocation5 + $0x7a0] ss:$16 sps:$4 sm:$0xff]   ;;  %v265_v26 = vsub.s32 7, %v8198_v9  ;;  %v254_v27 = vrot.slane %v8206_v11, %v253_v22 }
 0x140   :  { %7903 = vtanh.f32 %v1000_v25  ;;  %v961_v28 = vpop.f32.mrf.mxu0  ;;  %v1002_v29 = vpop.f32.mrf.mxu1  ;;  %v7441_v25 = vld [vmem:[#allocation5 + $0x584] ss:$16 sps:$4 sm:$0xff]  }
 0x141   :  { %v7444_v28 = vld [vmem:[#allocation5 + $0x784] ss:$16 sps:$4 sm:$0xff]   ;;  %v262_v29 = vrot.slane %v8206_v11, %v261_v53 }
 0x14a   :  { %v7898_v30 = vpop.eup %7897 }
 0x14b   :  { %v7900_v31 = vpop.eup %7899  ;;  %v8229_v37 = vpack.c.bf16 %v7898_v30, %v7898_v30  ;;  %v7439_v30 = vld [vmem:[#allocation5 + $0x580] ss:$16 sps:$4 sm:$0xff]  }
 0x14c   :  { %v7902_v32 = vpop.eup %7901  ;;  %v8225_v34 = vpack.c.bf16 %v7900_v31, %v7900_v31  ;;  %v258_v31 = vrot.slane %v8206_v11, %v257_v13 }
 0x14d   :  { %v7904_v33 = vpop.eup %7903  ;;  %v8227_v35 = vpack.c.bf16 %v7902_v32, %v7902_v32 }
 0x14e   :  { %v8231_v38 = vpack.c.bf16 %v7904_v33, %v7904_v33  ;;  %v7442_v33 = vld [vmem:[#allocation5 + $0x780] ss:$16 sps:$4 sm:$0xff]  }
 0x14f   :  { %2692 = vmatprep.mubr.bf16.mxu0 %v8227_v35 }
 0x150   :  { %2733 = vmatprep.mubr.bf16.mxu1 %v8231_v38  ;;  %2693 = vmatmul.mubr.bf16.vlgmr.msra.gmra.mxu0 %v8229_v37 }
 0x151   :  { %2734 = vmatmul.mubr.bf16.vlgmr.msra.gmra.mxu1 %v8225_v34  ;;  %2743 = vmatpush1.bf16.msra.mxu0 %v7373_v36  ;;  %v266_v36 = vrot.slane %v8206_v11, %v265_v26 }
 0x152   :  { %2784 = vmatpush1.bf16.msra.mxu1 %v7376_v39  ;;  %2744 = vmatprep.subr.bf16.mxu0 %v7381_v40  ;;  %v7447_v39 = vld [vmem:[#allocation5 + $0x564] ss:$16 sps:$4 sm:$0xff]  }
 0x153   :  { %2785 = vmatprep.subr.bf16.mxu1 %v7384_v41 }
 0x155   :  { %2745 = vmatpush1.bf16.msra.mxu0 %v7379_v57  ;;  %v7450_v57 = vld [vmem:[#allocation5 + $0x764] ss:$16 sps:$4 sm:$0xff]  }
 0x156   :  { %2786 = vmatpush1.bf16.msra.mxu1 %v7382_v42  ;;  %2746 = vmatprep.subr.bf16.mxu0 %v7387_v43 }
 0x157   :  { %2787 = vmatprep.subr.bf16.mxu1 %v7390_v44 }
 0x159   :  { %2747 = vmatpush1.bf16.msra.mxu0 %v7385_v45 }
 0x15a   :  { %2788 = vmatpush1.bf16.msra.mxu1 %v7388_v46  ;;  %2748 = vmatprep.subr.bf16.mxu0 %v7393_v47  ;;  %v7445_v46 = vld [vmem:[#allocation5 + $0x560] ss:$16 sps:$4 sm:$0xff]  }
 0x15b   :  { %2789 = vmatprep.subr.bf16.mxu1 %v7396_v48 }
 0x15d   :  { %2749 = vmatpush1.bf16.msra.mxu0 %v7391_v49  ;;  %v7448_v49 = vld [vmem:[#allocation5 + $0x760] ss:$16 sps:$4 sm:$0xff]  }
 0x15e   :  { %2790 = vmatpush1.bf16.msra.mxu1 %v7394_v50  ;;  %2750 = vmatprep.subr.bf16.mxu0 %v7399_v51  ;;  %v7453_v50 = vld [vmem:[#allocation5 + $0x544] ss:$16 sps:$4 sm:$0xff]  }
 0x15f   :  { %2791 = vmatprep.subr.bf16.mxu1 %v7402_v52  ;;  %v7456_v51 = vld [vmem:[#allocation5 + $0x744] ss:$16 sps:$4 sm:$0xff]  }
 0x161   :  { %2751 = vmatpush1.bf16.msra.mxu0 %v7397_v54 }
 0x162   :  { %2792 = vmatpush1.bf16.msra.mxu1 %v7400_v55  ;;  %2752 = vmatprep.subr.bf16.mxu0 %v7405_v56  ;;  %v7451_v55 = vld [vmem:[#allocation5 + $0x540] ss:$16 sps:$4 sm:$0xff]  }
 0x163   :  { %2793 = vmatprep.subr.bf16.mxu1 %v7408_v58  ;;  %v7454_v56 = vld [vmem:[#allocation5 + $0x740] ss:$16 sps:$4 sm:$0xff]   ;;  %v7459_v58 = vld [vmem:[#allocation5 + $0x524] ss:$16 sps:$4 sm:$0xff]  }
 0x165   :  { %2753 = vmatpush1.bf16.msra.mxu0 %v7403_v59  ;;  %v7462_v59 = vld [vmem:[#allocation5 + $0x724] ss:$16 sps:$4 sm:$0xff]  }
 0x166   :  { %2794 = vmatpush1.bf16.msra.mxu1 %v7406_v60  ;;  %2754 = vmatprep.subr.bf16.mxu0 %v7411_v61  ;;  %v7457_v60 = vld [vmem:[#allocation5 + $0x520] ss:$16 sps:$4 sm:$0xff]  }
 0x167   :  { %2795 = vmatprep.subr.bf16.mxu1 %v7414_v62  ;;  %v7460_v61 = vld [vmem:[#allocation5 + $0x720] ss:$16 sps:$4 sm:$0xff]   ;;  %v7465_v62 = vld [vmem:[#allocation5 + $0x504] ss:$16 sps:$4 sm:$0xff]  }
 0x169   :  { %2755 = vmatpush1.bf16.msra.mxu0 %v7409_v63  ;;  %v7468_v63 = vld [vmem:[#allocation5 + $0x704] ss:$16 sps:$4 sm:$0xff]  }
 0x16a   :  { %2796 = vmatpush1.bf16.msra.mxu1 %v7412_v0  ;;  %2756 = vmatprep.subr.bf16.mxu0 %v7417_v1  ;;  %v7463_v0 = vld [vmem:[#allocation5 + $0x500] ss:$16 sps:$4 sm:$0xff]  }
 0x16b   :  { %2797 = vmatprep.subr.bf16.mxu1 %v7420_v2  ;;  %v7466_v2 = vld [vmem:[#allocation5 + $0x700] ss:$16 sps:$4 sm:$0xff]  }
 0x16d   :  { %2757 = vmatpush1.bf16.msra.mxu0 %v7415_v3  ;;  %v7471_v3 = vld [vmem:[#allocation5 + $0xec] ss:$16 sps:$4 sm:$0xff]  }
 0x16e   :  { %2798 = vmatpush1.bf16.msra.mxu1 %v7418_v4  ;;  %2758 = vmatprep.subr.bf16.mxu0 %v7423_v5  ;;  %v7474_v5 = vld [vmem:[#allocation5 + $0x2ec] ss:$16 sps:$4 sm:$0xff]  }
 0x16f   :  { %2799 = vmatprep.subr.bf16.mxu1 %v7426_v6 }
 0x171   :  { %2759 = vmatpush2.bf16.msra.mxu0 %v7421_v7 }
 0x172   :  { %2800 = vmatpush2.bf16.msra.mxu1 %v7424_v8  ;;  %2760 = vmatprep.subr.bf16.mxu0 %v7429_v16 }
 0x173   :  { %2801 = vmatprep.subr.bf16.mxu1 %v7432_v17  ;;  %v7469_v17 = vld [vmem:[#allocation5 + $0xe8] ss:$16 sps:$4 sm:$0xff]  }
 0x175   :  { %2761 = vmatpush2.bf16.msra.mxu0 %v7427_v18 }
 0x176   :  { %2802 = vmatpush2.bf16.msra.mxu1 %v7430_v19  ;;  %2762 = vmatprep.subr.bf16.mxu0 %v7435_v20  ;;  %v7472_v20 = vld [vmem:[#allocation5 + $0x2e8] ss:$16 sps:$4 sm:$0xff]  }
 0x177   :  { %2803 = vmatprep.subr.bf16.mxu1 %v7438_v21  ;;  %v7477_v21 = vld [vmem:[#allocation5 + $0xcc] ss:$16 sps:$4 sm:$0xff]  }
 0x179   :  { %2763 = vmatpush2.bf16.msra.mxu0 %v7433_v23  ;;  %v7480_v23 = vld [vmem:[#allocation5 + $0x2cc] ss:$16 sps:$4 sm:$0xff]  }
 0x17a   :  { %2804 = vmatpush2.bf16.msra.mxu1 %v7436_v24  ;;  %v1038_v32 = vpop.f32.mrf.mxu0  ;;  %2764 = vmatprep.subr.bf16.mxu0 %v7441_v25  ;;  %v1079_v41 = vpop.f32.mrf.mxu1  ;;  %v7475_v24 = vld [vmem:[#allocation5 + $0xc8] ss:$16 sps:$4 sm:$0xff]  }
 0x17b   :  { %v1039_v40 = vadd.f32 %v1038_v32, %v254_v27  ;;  %2805 = vmatprep.subr.bf16.mxu1 %v7444_v28  ;;  %v1080_v42 = vadd.f32 %v1079_v41, %v262_v29  ;;  %v7478_v25 = vld [vmem:[#allocation5 + $0x2c8] ss:$16 sps:$4 sm:$0xff]   ;;  %v7483_v27 = vld [vmem:[#allocation5 + $0xac] ss:$16 sps:$4 sm:$0xff]  }
 0x17c   :  { %v1040_v43 = vpop.f32.mrf.mxu0  ;;  %v1081_v45 = vpop.f32.mrf.mxu1  ;;  %v7486_v28 = vld [vmem:[#allocation5 + $0x2ac] ss:$16 sps:$4 sm:$0xff]   ;;  %v7481_v29 = vld [vmem:[#allocation5 + $0xa8] ss:$16 sps:$4 sm:$0xff]  }
 0x17d   :  { %7905 = vtanh.f32 %v1039_v40  ;;  %v1041_v44 = vadd.f32 %v1040_v43, %v258_v31  ;;  %2765 = vmatpush2.bf16.msra.mxu0 %v7439_v30  ;;  %v1082_v47 = vadd.f32 %v1081_v45, %v266_v36  ;;  %v7484_v30 = vld [vmem:[#allocation5 + $0x2a8] ss:$16 sps:$4 sm:$0xff]   ;;  %v7489_v31 = vld [vmem:[#allocation5 + $0x8c] ss:$16 sps:$4 sm:$0xff]  }
 0x17e   :  { %7907 = vtanh.f32 %v1080_v42  ;;  %2806 = vmatpush2.bf16.msra.mxu1 %v7442_v33  ;;  %v1042_v48 = vpop.f32.mrf.mxu0  ;;  %2766 = vmatprep.subr.bf16.mxu0 %v7447_v39  ;;  %v1083_v11 = vpop.f32.mrf.mxu1  ;;  %v7492_v32 = vld [vmem:[#allocation5 + $0x28c] ss:$16 sps:$4 sm:$0xff]   ;;  %v7487_v33 = vld [vmem:[#allocation5 + $0x88] ss:$16 sps:$4 sm:$0xff]  }
 0x17f   :  { %7909 = vtanh.f32 %v1041_v44  ;;  %2807 = vmatprep.subr.bf16.mxu1 %v7450_v57  ;;  %v7495_v36 = vld [vmem:[#allocation5 + $0x6c] ss:$16 sps:$4 sm:$0xff]   ;;  %v7496_v40 = vld [vmem:[#allocation5 + $0x268] ss:$16 sps:$4 sm:$0xff]  }
 0x180   :  { %7911 = vtanh.f32 %v1082_v47  ;;  %v1043_v52 = vpop.f32.mrf.mxu0  ;;  %v1084_v54 = vpop.f32.mrf.mxu1  ;;  %v7498_v39 = vld [vmem:[#allocation5 + $0x26c] ss:$16 sps:$4 sm:$0xff]   ;;  %v7499_v42 = vld [vmem:[#allocation5 + $0x48] ss:$16 sps:$4 sm:$0xff]  }
 0x181   :  { %2767 = vmatpush2.bf16.msra.mxu0 %v7445_v46  ;;  %v7501_v41 = vld [vmem:[#allocation5 + $0x4c] ss:$16 sps:$4 sm:$0xff]   ;;  %v7502_v43 = vld [vmem:[#allocation5 + $0x248] ss:$16 sps:$4 sm:$0xff]  }
 0x182   :  { %2808 = vmatpush2.bf16.msra.mxu1 %v7448_v49  ;;  %2768 = vmatprep.subr.bf16.mxu0 %v7453_v50  ;;  %v7504_v57 = vld [vmem:[#allocation5 + $0x24c] ss:$16 sps:$4 sm:$0xff]   ;;  %v7505_v46 = vld [vmem:[#allocation5 + $0x28] ss:$16 sps:$4 sm:$0xff]  }
 0x183   :  { %2809 = vmatprep.subr.bf16.mxu1 %v7456_v51  ;;  %v7507_v44 = vld [vmem:[#allocation5 + $0x2c] ss:$16 sps:$4 sm:$0xff]   ;;  %v7508_v47 = vld [vmem:[#allocation5 + $0x228] ss:$16 sps:$4 sm:$0xff]  }
 0x184   :  { %v7510_v45 = vld [vmem:[#allocation5 + $0x22c] ss:$16 sps:$4 sm:$0xff]   ;;  %v7511_v50 = vld [vmem:[#allocation5 + $0x8] ss:$16 sps:$4 sm:$0xff]  }
 0x185   :  { %2769 = vmatpush2.bf16.msra.mxu0 %v7451_v55  ;;  %v7513_v48 = vld [vmem:[#allocation5 + $0xc] ss:$16 sps:$4 sm:$0xff]   ;;  %v7514_v11 = vld [vmem:[#allocation5 + $0x208] ss:$16 sps:$4 sm:$0xff]  }
 0x186   :  { %2810 = vmatpush2.bf16.msra.mxu1 %v7454_v56  ;;  %2770 = vmatprep.subr.bf16.mxu0 %v7459_v58  ;;  %v7516_v49 = vld [vmem:[#allocation5 + $0x20c] ss:$16 sps:$4 sm:$0xff]   ;;  %v7517_v54 = vld [vmem:[#allocation5 + $0x1e8] ss:$16 sps:$4 sm:$0xff]  }
 0x187   :  { %2811 = vmatprep.subr.bf16.mxu1 %v7462_v59  ;;  %v7519_v51 = vld [vmem:[#allocation5 + $0x1ec] ss:$16 sps:$4 sm:$0xff]   ;;  %v7520_v55 = vld [vmem:[#allocation5 + $0x3e8] ss:$16 sps:$4 sm:$0xff]  }
 0x188   :  { %v7522_v52 = vld [vmem:[#allocation5 + $0x3ec] ss:$16 sps:$4 sm:$0xff]   ;;  %v7523_v59 = vld [vmem:[#allocation5 + $0x1c8] ss:$16 sps:$4 sm:$0xff]  }
 0x189   :  { %2771 = vmatpush2.bf16.msra.mxu0 %v7457_v60  ;;  %v7525_v56 = vld [vmem:[#allocation5 + $0x1cc] ss:$16 sps:$4 sm:$0xff]   ;;  %v7526_v60 = vld [vmem:[#allocation5 + $0x3c8] ss:$16 sps:$4 sm:$0xff]  }
 0x18a   :  { %v7906_v1 = vpop.eup %7905  ;;  %2812 = vmatpush2.bf16.msra.mxu1 %v7460_v61  ;;  %2772 = vmatprep.subr.bf16.mxu0 %v7465_v62  ;;  %v7528_v58 = vld [vmem:[#allocation5 + $0x3cc] ss:$16 sps:$4 sm:$0xff]  }
 0x18b   :  { %v7908_v4 = vpop.eup %7907  ;;  %2813 = vmatprep.subr.bf16.mxu1 %v7468_v63  ;;  %v8257_v18 = vpack.c.bf16 %v7906_v1, %v7906_v1  ;;  %v7531_v61 = vld [vmem:[#allocation5 + $0x1ac] ss:$16 sps:$4 sm:$0xff]   ;;  %v7529_v63 = vld [vmem:[#allocation5 + $0x1a8] ss:$16 sps:$4 sm:$0xff]  }
 0x18c   :  { %v7910_v6 = vpop.eup %7909  ;;  %v8253_v8 = vpack.c.bf16 %v7908_v4, %v7908_v4  ;;  %v7534_v62 = vld [vmem:[#allocation5 + $0x3ac] ss:$16 sps:$4 sm:$0xff]   ;;  %v7538_v4 = vld [vmem:[#allocation5 + $0x388] ss:$16 sps:$4 sm:$0xff]  }
 0x18d   :  { %v7912_v7 = vpop.eup %7911  ;;  %2773 = vmatpush2.bf16.msra.mxu0 %v7463_v0  ;;  %v8255_v16 = vpack.c.bf16 %v7910_v6, %v7910_v6  ;;  %v7532_v0 = vld [vmem:[#allocation5 + $0x3a8] ss:$16 sps:$4 sm:$0xff]   ;;  %v7537_v1 = vld [vmem:[#allocation5 + $0x18c] ss:$16 sps:$4 sm:$0xff]  }
 0x18e   :  { %2814 = vmatpush2.bf16.msra.mxu1 %v7466_v2  ;;  %v8259_v19 = vpack.c.bf16 %v7912_v7, %v7912_v7  ;;  %2824 = vmatprep.subr.bf16.mxu0 %v7471_v3  ;;  %v7540_v2 = vld [vmem:[#allocation5 + $0x38c] ss:$16 sps:$4 sm:$0xff]   ;;  %v7535_v3 = vld [vmem:[#allocation5 + $0x188] ss:$16 sps:$4 sm:$0xff]  }
 0x18f   :  { %2774 = vmatprep.mubr.bf16.mxu0 %v8255_v16  ;;  %2865 = vmatprep.subr.bf16.mxu1 %v7474_v5  ;;  %v7543_v5 = vld [vmem:[#allocation5 + $0x16c] ss:$16 sps:$4 sm:$0xff]   ;;  %v7541_v7 = vld [vmem:[#allocation5 + $0x168] ss:$16 sps:$4 sm:$0xff]  }
 0x190   :  { %2815 = vmatprep.mubr.bf16.mxu1 %v8259_v19  ;;  %2775 = vmatmul.mubr.bf16.vlgmr.msra.gmra.mxu0 %v8257_v18  ;;  %v7546_v6 = vld [vmem:[#allocation5 + $0x36c] ss:$16 sps:$4 sm:$0xff]  }
 0x191   :  { %2816 = vmatmul.mubr.bf16.vlgmr.msra.gmra.mxu1 %v8253_v8  ;;  %2825 = vmatpush1.bf16.msra.mxu0 %v7469_v17  ;;  %v7544_v17 = vld [vmem:[#allocation5 + $0x368] ss:$16 sps:$4 sm:$0xff]  }
 0x192   :  { %2866 = vmatpush1.bf16.msra.mxu1 %v7472_v20  ;;  %2856 = vmatprep.mubr.bf16.mxu0 %v8227_v35  ;;  %v7490_v35 = vld [vmem:[#allocation5 + $0x288] ss:$16 sps:$4 sm:$0xff]   ;;  %v7549_v20 = vld [vmem:[#allocation5 + $0x14c] ss:$16 sps:$4 sm:$0xff]  }
 0x193   :  { %2897 = vmatprep.mubr.bf16.mxu1 %v8231_v38  ;;  %2826 = vmatprep.subr.bf16.mxu0 %v7477_v21  ;;  %v7493_v38 = vld [vmem:[#allocation5 + $0x68] ss:$16 sps:$4 sm:$0xff]   ;;  %v7552_v21 = vld [vmem:[#allocation5 + $0x34c] ss:$16 sps:$4 sm:$0xff]  }
 0x194   :  { %2867 = vmatprep.subr.bf16.mxu1 %v7480_v23  ;;  %v7547_v23 = vld [vmem:[#allocation5 + $0x148] ss:$16 sps:$4 sm:$0xff]  }
 0x195   :  { %2827 = vmatpush1.bf16.msra.mxu0 %v7475_v24  ;;  %v7550_v24 = vld [vmem:[#allocation5 + $0x348] ss:$16 sps:$4 sm:$0xff]  }
 0x196   :  { %2868 = vmatpush1.bf16.msra.mxu1 %v7478_v25  ;;  %2828 = vmatprep.subr.bf16.mxu0 %v7483_v27  ;;  %v7555_v25 = vld [vmem:[#allocation5 + $0x12c] ss:$16 sps:$4 sm:$0xff]  }
 0x197   :  { %2869 = vmatprep.subr.bf16.mxu1 %v7486_v28  ;;  %v7558_v27 = vld [vmem:[#allocation5 + $0x32c] ss:$16 sps:$4 sm:$0xff]   ;;  %v7553_v28 = vld [vmem:[#allocation5 + $0x128] ss:$16 sps:$4 sm:$0xff]  }
 0x199   :  { %2829 = vmatpush1.bf16.msra.mxu0 %v7481_v29  ;;  %v7556_v29 = vld [vmem:[#allocation5 + $0x328] ss:$16 sps:$4 sm:$0xff]  }
 0x19a   :  { %2870 = vmatpush1.bf16.msra.mxu1 %v7484_v30  ;;  %2830 = vmatprep.subr.bf16.mxu0 %v7489_v31  ;;  %v7561_v30 = vld [vmem:[#allocation5 + $0x10c] ss:$16 sps:$4 sm:$0xff]  }
 0x19b   :  { %2871 = vmatprep.subr.bf16.mxu1 %v7492_v32  ;;  %v7564_v31 = vld [vmem:[#allocation5 + $0x30c] ss:$16 sps:$4 sm:$0xff]   ;;  %v7559_v32 = vld [vmem:[#allocation5 + $0x108] ss:$16 sps:$4 sm:$0xff]  }
 0x19d   :  { %2831 = vmatpush1.bf16.msra.mxu0 %v7487_v33  ;;  %v7562_v33 = vld [vmem:[#allocation5 + $0x308] ss:$16 sps:$4 sm:$0xff]  }
 0x19e   :  { %2872 = vmatpush1.bf16.msra.mxu1 %v7490_v35  ;;  %2832 = vmatprep.subr.bf16.mxu0 %v7495_v36  ;;  %v7567_v35 = vld [vmem:[#allocation5 + $0x4ec] ss:$16 sps:$4 sm:$0xff]  }
 0x19f   :  { %2873 = vmatprep.subr.bf16.mxu1 %v7498_v39  ;;  %v7570_v36 = vld [vmem:[#allocation5 + $0x6ec] ss:$16 sps:$4 sm:$0xff]   ;;  %v7565_v39 = vld [vmem:[#allocation5 + $0x4e8] ss:$16 sps:$4 sm:$0xff]  }
 0x1a1   :  { %2833 = vmatpush1.bf16.msra.mxu0 %v7493_v38  ;;  %v7568_v38 = vld [vmem:[#allocation5 + $0x6e8] ss:$16 sps:$4 sm:$0xff]  }
 0x1a2   :  { %2874 = vmatpush1.bf16.msra.mxu1 %v7496_v40  ;;  %2834 = vmatprep.subr.bf16.mxu0 %v7501_v41  ;;  %v7573_v40 = vld [vmem:[#allocation5 + $0x4cc] ss:$16 sps:$4 sm:$0xff]  }
 0x1a3   :  { %2875 = vmatprep.subr.bf16.mxu1 %v7504_v57  ;;  %v7576_v41 = vld [vmem:[#allocation5 + $0x6cc] ss:$16 sps:$4 sm:$0xff]   ;;  %v7571_v57 = vld [vmem:[#allocation5 + $0x4c8] ss:$16 sps:$4 sm:$0xff]  }
 0x1a5   :  { %2835 = vmatpush1.bf16.msra.mxu0 %v7499_v42  ;;  %v7574_v42 = vld [vmem:[#allocation5 + $0x6c8] ss:$16 sps:$4 sm:$0xff]  }
 0x1a6   :  { %2876 = vmatpush1.bf16.msra.mxu1 %v7502_v43  ;;  %2836 = vmatprep.subr.bf16.mxu0 %v7507_v44  ;;  %v7579_v43 = vld [vmem:[#allocation5 + $0x4ac] ss:$16 sps:$4 sm:$0xff]  }
 0x1a7   :  { %2877 = vmatprep.subr.bf16.mxu1 %v7510_v45  ;;  %v7582_v44 = vld [vmem:[#allocation5 + $0x6ac] ss:$16 sps:$4 sm:$0xff]   ;;  %v7577_v45 = vld [vmem:[#allocation5 + $0x4a8] ss:$16 sps:$4 sm:$0xff]  }
 0x1a9   :  { %2837 = vmatpush1.bf16.msra.mxu0 %v7505_v46  ;;  %v7585_v46 = vld [vmem:[#allocation5 + $0x48c] ss:$16 sps:$4 sm:$0xff]  }
 0x1aa   :  { %2878 = vmatpush1.bf16.msra.mxu1 %v7508_v47  ;;  %2838 = vmatprep.subr.bf16.mxu0 %v7513_v48  ;;  %v7583_v47 = vld [vmem:[#allocation5 + $0x488] ss:$16 sps:$4 sm:$0xff]   ;;  %v7591_v48 = vld [vmem:[#allocation5 + $0x46c] ss:$16 sps:$4 sm:$0xff]  }
 0x1ab   :  { %2879 = vmatprep.subr.bf16.mxu1 %v7516_v49  ;;  %v7594_v49 = vld [vmem:[#allocation5 + $0x66c] ss:$16 sps:$4 sm:$0xff]  }
 0x1ad   :  { %2839 = vmatpush1.bf16.msra.mxu0 %v7511_v50  ;;  %v7592_v50 = vld [vmem:[#allocation5 + $0x668] ss:$16 sps:$4 sm:$0xff]  }
 0x1ae   :  { %2880 = vmatpush1.bf16.msra.mxu1 %v7514_v11  ;;  %2840 = vmatprep.subr.bf16.mxu0 %v7519_v51  ;;  %v7597_v11 = vld [vmem:[#allocation5 + $0x44c] ss:$16 sps:$4 sm:$0xff]  }
 0x1af   :  { %2881 = vmatprep.subr.bf16.mxu1 %v7522_v52  ;;  %v7600_v51 = vld [vmem:[#allocation5 + $0x64c] ss:$16 sps:$4 sm:$0xff]   ;;  %v7595_v52 = vld [vmem:[#allocation5 + $0x448] ss:$16 sps:$4 sm:$0xff]  }
 0x1b1   :  { %2841 = vmatpush2.bf16.msra.mxu0 %v7517_v54  ;;  %v7598_v54 = vld [vmem:[#allocation5 + $0x648] ss:$16 sps:$4 sm:$0xff]  }
 0x1b2   :  { %2882 = vmatpush2.bf16.msra.mxu1 %v7520_v55  ;;  %2842 = vmatprep.subr.bf16.mxu0 %v7525_v56  ;;  %v7603_v55 = vld [vmem:[#allocation5 + $0x42c] ss:$16 sps:$4 sm:$0xff]  }
 0x1b3   :  { %2883 = vmatprep.subr.bf16.mxu1 %v7528_v58  ;;  %v7606_v56 = vld [vmem:[#allocation5 + $0x62c] ss:$16 sps:$4 sm:$0xff]   ;;  %v7601_v58 = vld [vmem:[#allocation5 + $0x428] ss:$16 sps:$4 sm:$0xff]  }
 0x1b5   :  { %2843 = vmatpush2.bf16.msra.mxu0 %v7523_v59  ;;  %v7604_v59 = vld [vmem:[#allocation5 + $0x628] ss:$16 sps:$4 sm:$0xff]  }
 0x1b6   :  { %2884 = vmatpush2.bf16.msra.mxu1 %v7526_v60  ;;  %2844 = vmatprep.subr.bf16.mxu0 %v7531_v61  ;;  %v7609_v60 = vld [vmem:[#allocation5 + $0x40c] ss:$16 sps:$4 sm:$0xff]  }
 0x1b7   :  { %2885 = vmatprep.subr.bf16.mxu1 %v7534_v62  ;;  %v7612_v61 = vld [vmem:[#allocation5 + $0x60c] ss:$16 sps:$4 sm:$0xff]   ;;  %v7607_v62 = vld [vmem:[#allocation5 + $0x408] ss:$16 sps:$4 sm:$0xff]  }
 0x1b9   :  { %2845 = vmatpush2.bf16.msra.mxu0 %v7529_v63  ;;  %v7610_v63 = vld [vmem:[#allocation5 + $0x608] ss:$16 sps:$4 sm:$0xff]  }
 0x1ba   :  { %2886 = vmatpush2.bf16.msra.mxu1 %v7532_v0  ;;  %2846 = vmatprep.subr.bf16.mxu0 %v7537_v1  ;;  %v7615_v0 = vld [vmem:[#allocation5 + $0x5ec] ss:$16 sps:$4 sm:$0xff]  }
 0x1bb   :  { %2887 = vmatprep.subr.bf16.mxu1 %v7540_v2  ;;  %v7618_v1 = vld [vmem:[#allocation5 + $0x7ec] ss:$16 sps:$4 sm:$0xff]   ;;  %v7613_v2 = vld [vmem:[#allocation5 + $0x5e8] ss:$16 sps:$4 sm:$0xff]  }
 0x1bd   :  { %2847 = vmatpush2.bf16.msra.mxu0 %v7535_v3  ;;  %v7616_v3 = vld [vmem:[#allocation5 + $0x7e8] ss:$16 sps:$4 sm:$0xff]  }
 0x1be   :  { %2888 = vmatpush2.bf16.msra.mxu1 %v7538_v4  ;;  %2848 = vmatprep.subr.bf16.mxu0 %v7543_v5  ;;  %v7621_v4 = vld [vmem:[#allocation5 + $0x5cc] ss:$16 sps:$4 sm:$0xff]  }
 0x1bf   :  { %2889 = vmatprep.subr.bf16.mxu1 %v7546_v6  ;;  %v7624_v5 = vld [vmem:[#allocation5 + $0x7cc] ss:$16 sps:$4 sm:$0xff]   ;;  %v7619_v6 = vld [vmem:[#allocation5 + $0x5c8] ss:$16 sps:$4 sm:$0xff]  }
 0x1c1   :  { %2849 = vmatpush2.bf16.msra.mxu0 %v7541_v7  ;;  %v7622_v7 = vld [vmem:[#allocation5 + $0x7c8] ss:$16 sps:$4 sm:$0xff]  }
 0x1c2   :  { %2890 = vmatpush2.bf16.msra.mxu1 %v7544_v17  ;;  %2850 = vmatprep.subr.bf16.mxu0 %v7549_v20  ;;  %v7627_v17 = vld [vmem:[#allocation5 + $0x5ac] ss:$16 sps:$4 sm:$0xff]  }
 0x1c3   :  { %2891 = vmatprep.subr.bf16.mxu1 %v7552_v21  ;;  %v7630_v20 = vld [vmem:[#allocation5 + $0x7ac] ss:$16 sps:$4 sm:$0xff]   ;;  %v7625_v21 = vld [vmem:[#allocation5 + $0x5a8] ss:$16 sps:$4 sm:$0xff]  }
 0x1c5   :  { %2851 = vmatpush2.bf16.msra.mxu0 %v7547_v23  ;;  %v7628_v23 = vld [vmem:[#allocation5 + $0x7a8] ss:$16 sps:$4 sm:$0xff]  }
 0x1c6   :  { %2892 = vmatpush2.bf16.msra.mxu1 %v7550_v24  ;;  %2852 = vmatprep.subr.bf16.mxu0 %v7555_v25  ;;  %v7633_v24 = vld [vmem:[#allocation5 + $0x58c] ss:$16 sps:$4 sm:$0xff]  }
 0x1c7   :  { %2893 = vmatprep.subr.bf16.mxu1 %v7558_v27  ;;  %v7636_v25 = vld [vmem:[#allocation5 + $0x78c] ss:$16 sps:$4 sm:$0xff]   ;;  %v7631_v27 = vld [vmem:[#allocation5 + $0x588] ss:$16 sps:$4 sm:$0xff]  }
 0x1c9   :  { %2853 = vmatpush2.bf16.msra.mxu0 %v7553_v28  ;;  %v7634_v28 = vld [vmem:[#allocation5 + $0x788] ss:$16 sps:$4 sm:$0xff]  }
 0x1ca   :  { %2894 = vmatpush2.bf16.msra.mxu1 %v7556_v29  ;;  %2854 = vmatprep.subr.bf16.mxu0 %v7561_v30  ;;  %v7639_v29 = vld [vmem:[#allocation5 + $0x56c] ss:$16 sps:$4 sm:$0xff]  }
 0x1cb   :  { %2895 = vmatprep.subr.bf16.mxu1 %v7564_v31  ;;  %v7642_v30 = vld [vmem:[#allocation5 + $0x76c] ss:$16 sps:$4 sm:$0xff]   ;;  %v7637_v31 = vld [vmem:[#allocation5 + $0x568] ss:$16 sps:$4 sm:$0xff]  }
 0x1cd   :  { %2855 = vmatpush2.bf16.msra.mxu0 %v7559_v32  ;;  %v7640_v32 = vld [vmem:[#allocation5 + $0x768] ss:$16 sps:$4 sm:$0xff]  }
 0x1ce   :  { %2896 = vmatpush2.bf16.msra.mxu1 %v7562_v33  ;;  %2906 = vmatprep.subr.bf16.mxu0 %v7567_v35  ;;  %v7645_v33 = vld [vmem:[#allocation5 + $0x54c] ss:$16 sps:$4 sm:$0xff]  }
 0x1cf   :  { %2947 = vmatprep.subr.bf16.mxu1 %v7570_v36  ;;  %v7648_v35 = vld [vmem:[#allocation5 + $0x74c] ss:$16 sps:$4 sm:$0xff]   ;;  %v7643_v36 = vld [vmem:[#allocation5 + $0x548] ss:$16 sps:$4 sm:$0xff]  }
 0x1d0   :  { %2857 = vmatmul.mubr.bf16.vlgmr.msra.gmra.mxu0 %v8229_v37  ;;  %v7580_v37 = vld [vmem:[#allocation5 + $0x6a8] ss:$16 sps:$4 sm:$0xff]  }
 0x1d1   :  { %2898 = vmatmul.mubr.bf16.vlgmr.msra.gmra.mxu1 %v8225_v34  ;;  %2907 = vmatpush1.bf16.msra.mxu0 %v7565_v39  ;;  %v7588_v34 = vld [vmem:[#allocation5 + $0x68c] ss:$16 sps:$4 sm:$0xff]   ;;  %v7646_v39 = vld [vmem:[#allocation5 + $0x748] ss:$16 sps:$4 sm:$0xff]  }
 0x1d2   :  { %2938 = vmatprep.mubr.bf16.mxu0 %v8255_v16  ;;  %2948 = vmatpush1.bf16.msra.mxu1 %v7568_v38  ;;  %v7586_v16 = vld [vmem:[#allocation5 + $0x688] ss:$16 sps:$4 sm:$0xff]   ;;  %v7651_v38 = vld [vmem:[#allocation5 + $0x52c] ss:$16 sps:$4 sm:$0xff]  }
 0x1d3   :  { %2979 = vmatprep.mubr.bf16.mxu1 %v8259_v19  ;;  %2908 = vmatprep.subr.bf16.mxu0 %v7573_v40  ;;  %v7589_v19 = vld [vmem:[#allocation5 + $0x468] ss:$16 sps:$4 sm:$0xff]   ;;  %v7654_v40 = vld [vmem:[#allocation5 + $0x72c] ss:$16 sps:$4 sm:$0xff]  }
 0x1d4   :  { %2949 = vmatprep.subr.bf16.mxu1 %v7576_v41  ;;  %v7649_v41 = vld [vmem:[#allocation5 + $0x528] ss:$16 sps:$4 sm:$0xff]  }
 0x1d5   :  { %2909 = vmatpush1.bf16.msra.mxu0 %v7571_v57  ;;  %v7652_v57 = vld [vmem:[#allocation5 + $0x728] ss:$16 sps:$4 sm:$0xff]  }
 0x1d6   :  { %2950 = vmatpush1.bf16.msra.mxu1 %v7574_v42  ;;  %2910 = vmatprep.subr.bf16.mxu0 %v7579_v43  ;;  %v7657_v42 = vld [vmem:[#allocation5 + $0x50c] ss:$16 sps:$4 sm:$0xff]  }
 0x1d7   :  { %2951 = vmatprep.subr.bf16.mxu1 %v7582_v44  ;;  %v7660_v43 = vld [vmem:[#allocation5 + $0x70c] ss:$16 sps:$4 sm:$0xff]   ;;  %v7655_v44 = vld [vmem:[#allocation5 + $0x508] ss:$16 sps:$4 sm:$0xff]  }
 0x1d9   :  { %2911 = vmatpush1.bf16.msra.mxu0 %v7577_v45  ;;  %v7658_v45 = vld [vmem:[#allocation5 + $0x708] ss:$16 sps:$4 sm:$0xff]  }
 0x1da   :  { %2952 = vmatpush1.bf16.msra.mxu1 %v7580_v37  ;;  %2912 = vmatprep.subr.bf16.mxu0 %v7585_v46  ;;  %v7661_v37 = vld [vmem:[%s8487_s5 + $0x78] sm:$0xff]  }
 0x1db   :  { %2953 = vmatprep.subr.bf16.mxu1 %v7588_v34  ;;  %v7662_v46 = vld [vmem:[%s8487_s5 + $0x38] sm:$0xff]   ;;  %v7663_v34 = vld [vmem:[%s8487_s5 + $0x70] sm:$0xff]  }
 0x1dd   :  { %2913 = vmatpush1.bf16.msra.mxu0 %v7583_v47 }
 0x1de   :  { %2954 = vmatpush1.bf16.msra.mxu1 %v7586_v16  ;;  %2914 = vmatprep.subr.bf16.mxu0 %v7591_v48  ;;  %v7664_v48 = vld [vmem:[%s8487_s5 + $0x30] sm:$0xff]  }
 0x1df   :  { %2955 = vmatprep.subr.bf16.mxu1 %v7594_v49 }
 0x1e1   :  { %2915 = vmatpush1.bf16.msra.mxu0 %v7589_v19  ;;  %v7665_v19 = vld [vmem:[%s8487_s5 + $0x68] sm:$0xff]  }
 0x1e2   :  { %2956 = vmatpush1.bf16.msra.mxu1 %v7592_v50  ;;  %2916 = vmatprep.subr.bf16.mxu0 %v7597_v11 }
 0x1e3   :  { %2957 = vmatprep.subr.bf16.mxu1 %v7600_v51 }
 0x1e5   :  { %2917 = vmatpush1.bf16.msra.mxu0 %v7595_v52  ;;  %v7667_v52 = vld [vmem:[%s8487_s5 + $0x60] sm:$0xff]  }
 0x1e6   :  { %2958 = vmatpush1.bf16.msra.mxu1 %v7598_v54  ;;  %2918 = vmatprep.subr.bf16.mxu0 %v7603_v55  ;;  %v7677_v55 = vld [vmem:[%s8487_s5 + $0xf8] sm:$0xff]  }
 0x1e7   :  { %2959 = vmatprep.subr.bf16.mxu1 %v7606_v56  ;;  %v7678_v56 = vld [vmem:[%s8487_s5 + $0xb8] sm:$0xff]  }
 0x1e9   :  { %2919 = vmatpush1.bf16.msra.mxu0 %v7601_v58  ;;  %v7679_v58 = vld [vmem:[%s8487_s5 + $0xf0] sm:$0xff]  }
 0x1ea   :  { %2960 = vmatpush1.bf16.msra.mxu1 %v7604_v59  ;;  %2920 = vmatprep.subr.bf16.mxu0 %v7609_v60  ;;  %v7668_v59 = vld [vmem:[%s8487_s5 + $0x20] sm:$0xff]   ;;  %v7669_v60 = vld [vmem:[%s8487_s5 + $0x58] sm:$0xff]  }
 0x1eb   :  { %2961 = vmatprep.subr.bf16.mxu1 %v7612_v61  ;;  %v7680_v61 = vld [vmem:[%s8487_s5 + $0xb0] sm:$0xff]  }
 0x1ed   :  { %2921 = vmatpush1.bf16.msra.mxu0 %v7607_v62  ;;  %v7670_v62 = vld [vmem:[%s8487_s5 + $0x18] sm:$0xff]  }
 0x1ee   :  { %2962 = vmatpush1.bf16.msra.mxu1 %v7610_v63  ;;  %2922 = vmatprep.subr.bf16.mxu0 %v7615_v0  ;;  %v7671_v63 = vld [vmem:[%s8487_s5 + $0x50] sm:$0xff]  }
 0x1ef   :  { %2963 = vmatprep.subr.bf16.mxu1 %v7618_v1  ;;  %v7672_v0 = vld [vmem:[%s8487_s5 + $0x10] sm:$0xff]   ;;  %v7673_v1 = vld [vmem:[%s8487_s5 + $0x48] sm:$0xff]  }
 0x1f1   :  { %2923 = vmatpush2.bf16.msra.mxu0 %v7613_v2  ;;  %v7674_v2 = vld [vmem:[%s8487_s5 + $0x8] sm:$0xff]  }
 0x1f2   :  { %2964 = vmatpush2.bf16.msra.mxu1 %v7616_v3  ;;  %2924 = vmatprep.subr.bf16.mxu0 %v7621_v4  ;;  %v7675_v3 = vld [vmem:[%s8487_s5 + $0x40] sm:$0xff]  }
 0x1f3   :  { %2965 = vmatprep.subr.bf16.mxu1 %v7624_v5  ;;  %v7676_v4 = vld [vmem:[%s8487_s5] sm:$0xff]  }
 0x1f4   :  { %v8336_v5 = vld [vmem:[%s8486_s4] sm:$0xf] }
 0x1f5   :  { %2925 = vmatpush2.bf16.msra.mxu0 %v7619_v6  ;;  %v1363_v6 = vrot.slane %v8336_v5, %v8201_v10 }
 0x1f6   :  { %2966 = vmatpush2.bf16.msra.mxu1 %v7622_v7  ;;  %2926 = vmatprep.subr.bf16.mxu0 %v7627_v17  ;;  %v1367_v7 = vrot.slane %v8336_v5, %v8212_v14 }
 0x1f7   :  { %2967 = vmatprep.subr.bf16.mxu1 %v7630_v20 }
 0x1f9   :  { %2927 = vmatpush2.bf16.msra.mxu0 %v7625_v21 }
 0x1fa   :  { %2968 = vmatpush2.bf16.msra.mxu1 %v7628_v23  ;;  %2928 = vmatprep.subr.bf16.mxu0 %v7633_v24  ;;  %v7681_v24 = vld [vmem:[%s8487_s5 + $0xe8] sm:$0xff]  }
 0x1fb   :  { %2969 = vmatprep.subr.bf16.mxu1 %v7636_v25 }
 0x1fd   :  { %2929 = vmatpush2.bf16.msra.mxu0 %v7631_v27 }
 0x1fe   :  { %2970 = vmatpush2.bf16.msra.mxu1 %v7634_v28  ;;  %2930 = vmatprep.subr.bf16.mxu0 %v7639_v29  ;;  %v7682_v29 = vld [vmem:[%s8487_s5 + $0xa8] sm:$0xff]  }
 0x1ff   :  { %2971 = vmatprep.subr.bf16.mxu1 %v7642_v30 }
 0x201   :  { %2931 = vmatpush2.bf16.msra.mxu0 %v7637_v31 }
 0x202   :  { %2972 = vmatpush2.bf16.msra.mxu1 %v7640_v32  ;;  %2932 = vmatprep.subr.bf16.mxu0 %v7645_v33 }
 0x203   :  { %2973 = vmatprep.subr.bf16.mxu1 %v7648_v35 }
 0x205   :  { %2933 = vmatpush2.bf16.msra.mxu0 %v7643_v36  ;;  %v7683_v36 = vld [vmem:[%s8487_s5 + $0xe0] sm:$0xff]  }
 0x206   :  { %2974 = vmatpush2.bf16.msra.mxu1 %v7646_v39  ;;  %2934 = vmatprep.subr.bf16.mxu0 %v7651_v38 }
 0x207   :  { %2975 = vmatprep.subr.bf16.mxu1 %v7654_v40  ;;  %v7684_v40 = vld [vmem:[%s8487_s5 + $0xa0] sm:$0xff]  }
 0x209   :  { %2935 = vmatpush2.bf16.msra.mxu0 %v7649_v41 }
 0x20a   :  { %2976 = vmatpush2.bf16.msra.mxu1 %v7652_v57  ;;  %2936 = vmatprep.subr.bf16.mxu0 %v7657_v42  ;;  %v7685_v42 = vld [vmem:[%s8487_s5 + $0xd8] sm:$0xff]  }
 0x20b   :  { %2977 = vmatprep.subr.bf16.mxu1 %v7660_v43  ;;  %v7686_v43 = vld [vmem:[%s8487_s5 + $0x98] sm:$0xff]  }
 0x20d   :  { %2937 = vmatpush2.bf16.msra.mxu0 %v7655_v44  ;;  %v7687_v44 = vld [vmem:[%s8487_s5 + $0xd0] sm:$0xff]  }
 0x20e   :  { %2978 = vmatpush2.bf16.msra.mxu1 %v7658_v45  ;;  %7218 = vmatprep.subr.bf16.mxu0 %v7661_v37  ;;  %v7688_v45 = vld [vmem:[%s8487_s5 + $0x90] sm:$0xff]   ;;  %v7689_v37 = vld [vmem:[%s8487_s5 + $0xc8] sm:$0xff]  }
 0x20f   :  { %7240 = vmatprep.subr.bf16.mxu1 %v7677_v55 }
 0x210   :  { %2939 = vmatmul.mubr.bf16.vlgmr.msra.gmra.mxu0 %v8257_v18  ;;  %v2694_v47 = vpop.f32.mrf.mxu0 }
 0x211   :  { %2980 = vmatmul.mubr.bf16.vlgmr.msra.gmra.mxu1 %v8253_v8  ;;  %v2735_v16 = vpop.f32.mrf.mxu1  ;;  %7219 = vmatpush3.bf16.msra.mxu0 %v7662_v46  ;;  %v7666_v8 = vld [vmem:[%s8487_s5 + $0x28] sm:$0xff]   ;;  %v2695_v17 = vadd.f32 %v2694_v47, %v1363_v6  ;;  %v7691_v47 = vld [vmem:[%s8487_s5 + $0xc0] sm:$0xff]  }
 0x212   :  { %v2696_v49 = vpop.f32.mrf.mxu0  ;;  %7220 = vmatprep.subr.bf16.mxu0 %v7663_v34  ;;  %7241 = vmatpush3.bf16.msra.mxu1 %v7678_v56  ;;  %v7690_v46 = vld [vmem:[%s8487_s5 + $0x88] sm:$0xff]   ;;  %v1371_v56 = vrot.slane %v8336_v5, %v8209_v12 }
 0x213   :  { %v2737_v50 = vpop.f32.mrf.mxu1  ;;  %7242 = vmatprep.subr.bf16.mxu1 %v7679_v58  ;;  %v2697_v20 = vadd.f32 %v2696_v49, %v1367_v7  ;;  %v2736_v21 = vadd.f32 %v2735_v16, %v2695_v17  ;;  %v7692_v16 = vld [vmem:[%s8487_s5 + $0x80] sm:$0xff]   ;;  %v1375_v58 = vrot.slane %v8336_v5, %v8215_v15 }
 0x214   :  { %v2698_v11 = vpop.f32.mrf.mxu0 }
 0x215   :  { %v2739_v51 = vpop.f32.mrf.mxu1  ;;  %7221 = vmatpush3.bf16.msra.mxu0 %v7664_v48  ;;  %v2738_v25 = vadd.f32 %v2737_v50, %v2697_v20 }
 0x216   :  { %v2699_v18 = vpop.f32.mrf.mxu0  ;;  %7222 = vmatprep.subr.bf16.mxu0 %v7665_v19  ;;  %7243 = vmatpush3.bf16.msra.mxu1 %v7680_v61 }
 0x217   :  { %v2740_v54 = vpop.f32.mrf.mxu1  ;;  %7244 = vmatprep.subr.bf16.mxu1 %v7681_v24 }
 0x219   :  { %7223 = vmatpush3.bf16.msra.mxu0 %v7666_v8 }
 0x21a   :  { %7224 = vmatprep.subr.bf16.mxu0 %v7667_v52  ;;  %7245 = vmatpush3.bf16.msra.mxu1 %v7682_v29 }
 0x21b   :  { %7246 = vmatprep.subr.bf16.mxu1 %v7683_v36  ;;  %v7696_v36 = vld [vmem:[%s8489_s7 + $0x28] ss:$16 sps:$4 sm:$0xff]  }
 0x21d   :  { %7225 = vmatpush3.bf16.msra.mxu0 %v7668_v59 }
 0x21e   :  { %7226 = vmatprep.subr.bf16.mxu0 %v7669_v60  ;;  %7247 = vmatpush3.bf16.msra.mxu1 %v7684_v40  ;;  %v7704_v40 = vld [vmem:[%s8489_s7 + $0xc] ss:$16 sps:$4 sm:$0xff]  }
 0x21f   :  { %7248 = vmatprep.subr.bf16.mxu1 %v7685_v42  ;;  %v8087_v42 = vmov 0  }
 0x221   :  { %7227 = vmatpush3.bf16.msra.mxu0 %v7670_v62 }
 0x222   :  { %7228 = vmatprep.subr.bf16.mxu0 %v7671_v63  ;;  %7249 = vmatpush3.bf16.msra.mxu1 %v7686_v43  ;;  %v3562_v43 = vld [vmem:[#allocation7 + $0x1c0] sm:$0xff] }
 0x223   :  { %7250 = vmatprep.subr.bf16.mxu1 %v7687_v44  ;;  %v3566_v44 = vld [vmem:[#allocation7 + $0x1e0] sm:$0xff] }
 0x225   :  { %7229 = vmatpush3.bf16.msra.mxu0 %v7672_v0 }
 0x226   :  { %7230 = vmatprep.subr.bf16.mxu0 %v7673_v1  ;;  %7251 = vmatpush3.bf16.msra.mxu1 %v7688_v45  ;;  %v3690_v45 = vld [vmem:[#allocation7 + $0x5c0] sm:$0xff] }
 0x227   :  { %7252 = vmatprep.subr.bf16.mxu1 %v7689_v37  ;;  %v6890_v37 = vcombine.low %v3562_v43, %v3566_v44 }
 0x229   :  { %7231 = vmatpush3.bf16.msra.mxu0 %v7674_v2 }
 0x22a   :  { %7232 = vmatprep.subr.bf16.mxu0 %v7675_v3  ;;  %7253 = vmatpush3.bf16.msra.mxu1 %v7690_v46  ;;  %v6891_v46 = vcombine.high %v3562_v43, %v3566_v44  ;;  %v3514_v44 = vld [vmem:[#allocation7 + $0x40] sm:$0xff] }
 0x22b   :  { %7254 = vmatprep.subr.bf16.mxu1 %v7691_v47 }
 0x22d   :  { %7233 = vmatpush3.bf16.msra.mxu0 %v7676_v4 }
 0x22e   :  { %7255 = vmatpush3.bf16.msra.mxu1 %v7692_v16 }
 0x250   :  { %v2776_v23 = vpop.f32.mrf.mxu0 }
 0x251   :  { %v2777_v27 = vadd.f32 %v2776_v23, %v2736_v21  ;;  %v2817_v28 = vpop.f32.mrf.mxu1 }
 0x252   :  { %v2778_v30 = vpop.f32.mrf.mxu0 }
 0x253   :  { %v2818_v31 = vadd.f32 %v2817_v28, %v2777_v27  ;;  %v2779_v32 = vadd.f32 %v2778_v30, %v2738_v25  ;;  %v2819_v33 = vpop.f32.mrf.mxu1 }
 0x254   :  { %v2780_v35 = vpop.f32.mrf.mxu0 }
 0x255   :  { %v2820_v39 = vadd.f32 %v2819_v33, %v2779_v32  ;;  %v2821_v38 = vpop.f32.mrf.mxu1  ;;  %7913 = vtanh.f32 %v2818_v31  ;;  %v7693_v33 = vld [vmem:[%s8489_s7 + $0x20] ss:$16 sps:$4 sm:$0xff]   ;;  %v7695_v35 = vld [vmem:[%s8489_s7 + $0x24] ss:$16 sps:$4 sm:$0xff]  }
 0x256   :  { %v2781_v41 = vpop.f32.mrf.mxu0  ;;  %v7701_v38 = vld [vmem:[%s8489_s7 + $0x4] ss:$16 sps:$4 sm:$0xff]   ;;  %3428 = vmatprep.subr.bf16.mxu0 %v7695_v35 }
 0x257   :  { %7915 = vtanh.f32 %v2820_v39  ;;  %v2822_v57 = vpop.f32.mrf.mxu1  ;;  %v7698_v39 = vld [vmem:[%s8489_s7 + $0x2c] ss:$16 sps:$4 sm:$0xff]   ;;  %v7699_v41 = vld [vmem:[%s8489_s7] ss:$16 sps:$4 sm:$0xff]  }
 0x258   :  { %3469 = vmatprep.subr.bf16.mxu1 %v7698_v39  ;;  %v7702_v57 = vld [vmem:[%s8489_s7 + $0x8] ss:$16 sps:$4 sm:$0xff]   ;;  %v3526_v39 = vld [vmem:[#allocation7 + $0xa0] sm:$0xff] }
 0x262   :  { %v7914_v34 = vpop.eup %7913 }
 0x263   :  { %v2992_v19 = vpack.c.bf16 %v7914_v34, %v7914_v34  ;;  %v3694_v34 = vld [vmem:[#allocation7 + $0x5e0] sm:$0xff] }
 0x264   :  { %v7916_v48 = vpop.eup %7915  ;;  %v7018_v47 = vcombine.low %v3690_v45, %v3694_v34  ;;  %v7019_v16 = vcombine.high %v3690_v45, %v3694_v34  ;;  %v3518_v45 = vld [vmem:[#allocation7 + $0x60] sm:$0xff] }
 0x265   :  { %v2993_v49 = vpack.c.bf16 %v7916_v48, %v7916_v48  ;;  %v6791_v48 = vld [vmem:[%s8488_s6] ss:$0 sm:$0xff] }
 0x267   :  { %3291 = vmatprep.mubr.bf16.mxu0 %v2993_v49 }
 0x268   :  { %3292 = vmatmul.mubr.bf16.vlgmr.msra.gmra.mxu0 %v2992_v19 }
 0x269   :  { %3429 = vmatpush1.bf16.msra.mxu0 %v7693_v33  ;;  %3448 = vmatprep.mubr.bf16.mxu0 %v8087_v42 }
 0x26a   :  { %3430 = vmatprep.subr.bf16.mxu0 %v7701_v38  ;;  %v3650_v38 = vld [vmem:[#allocation7 + $0x480] sm:$0xff] }
 0x26d   :  { %3431 = vmatpush1.bf16.msra.mxu0 %v7699_v41 }
 0x26e   :  { %5084 = vmatprep.subr.bf16.mxu0 %v6891_v46  ;;  %v3646_v46 = vld [vmem:[#allocation7 + $0x460] sm:$0xff] }
 0x290   :  { %v2858_v50 = vpop.f32.mrf.mxu0 }
 0x291   :  { %v2899_v11 = vpop.f32.mrf.mxu1  ;;  %v2859_v59 = vadd.f32 %v2858_v50, %v1371_v56  ;;  %v3686_v56 = vld [vmem:[#allocation7 + $0x5a0] sm:$0xff] }
 0x292   :  { %v2860_v51 = vpop.f32.mrf.mxu0 }
 0x293   :  { %v2901_v8 = vpop.f32.mrf.mxu1  ;;  %v2861_v60 = vadd.f32 %v2860_v51, %v1375_v58  ;;  %v2900_v61 = vadd.f32 %v2899_v11, %v2859_v59 }
 0x294   :  { %v2862_v18 = vpop.f32.mrf.mxu0 }
 0x295   :  { %v2903_v52 = vpop.f32.mrf.mxu1  ;;  %v2902_v63 = vadd.f32 %v2901_v8, %v2861_v60 }
 0x296   :  { %v2863_v54 = vpop.f32.mrf.mxu0  ;;  %v3554_v52 = vld [vmem:[#allocation7 + $0x180] sm:$0xff] }
 0x297   :  { %v2904_v55 = vpop.f32.mrf.mxu1  ;;  %v3558_v54 = vld [vmem:[#allocation7 + $0x1a0] sm:$0xff] }
 0x298   :  { %v3682_v55 = vld [vmem:[#allocation7 + $0x580] sm:$0xff]  ;;  %v6883_v60 = vcombine.high %v3554_v52, %v3558_v54 }
 0x2d0   :  { %v2940_v62 = vpop.f32.mrf.mxu0 }
 0x2d1   :  { %v2941_v0 = vadd.f32 %v2940_v62, %v2900_v61  ;;  %v2981_v1 = vpop.f32.mrf.mxu1  ;;  %v7011_v61 = vcombine.high %v3682_v55, %v3686_v56  ;;  %v3546_v62 = vld [vmem:[#allocation7 + $0x140] sm:$0xff] }
 0x2d2   :  { %v2942_v2 = vpop.f32.mrf.mxu0 }
 0x2d3   :  { %v2982_v3 = vadd.f32 %v2981_v1, %v2941_v0  ;;  %v2943_v4 = vadd.f32 %v2942_v2, %v2902_v63  ;;  %v2983_v6 = vpop.f32.mrf.mxu1  ;;  %v3550_v63 = vld [vmem:[#allocation7 + $0x160] sm:$0xff]  ;;  %v6882_v2 = vcombine.low %v3554_v52, %v3558_v54 }
 0x2d4   :  { %v2944_v7 = vpop.f32.mrf.mxu0  ;;  %v3674_v0 = vld [vmem:[#allocation7 + $0x540] sm:$0xff] }
 0x2d5   :  { %v2984_v17 = vadd.f32 %v2983_v6, %v2943_v4  ;;  %v2985_v20 = vpop.f32.mrf.mxu1  ;;  %7917 = vtanh.f32 %v2982_v3  ;;  %v3678_v1 = vld [vmem:[#allocation7 + $0x560] sm:$0xff]  ;;  %v7010_v3 = vcombine.low %v3682_v55, %v3686_v56  ;;  %v6875_v4 = vcombine.high %v3546_v62, %v3550_v63 }
 0x2d6   :  { %v2945_v21 = vpop.f32.mrf.mxu0  ;;  %v7003_v6 = vcombine.high %v3674_v0, %v3678_v1  ;;  %v3538_v7 = vld [vmem:[#allocation7 + $0x100] sm:$0xff] }
 0x2d7   :  { %7919 = vtanh.f32 %v2984_v17  ;;  %v2986_v23 = vpop.f32.mrf.mxu1  ;;  %v3542_v17 = vld [vmem:[#allocation7 + $0x120] sm:$0xff] }
 0x2d8   :  { %v3666_v20 = vld [vmem:[#allocation7 + $0x500] sm:$0xff]  ;;  %v6874_v23 = vcombine.low %v3546_v62, %v3550_v63 }
 0x2d9   :  { %v3670_v21 = vld [vmem:[#allocation7 + $0x520] sm:$0xff] }
 0x2da   :  { %v3626_v54 = vld [vmem:[#allocation7 + $0x3c0] sm:$0xff] }
 0x2db   :  { %v3630_v55 = vld [vmem:[#allocation7 + $0x3e0] sm:$0xff] }
 0x2dc   :  { %v3754_v56 = vld [vmem:[#allocation7 + $0x7c0] sm:$0xff] }
 0x2dd   :  { %v3618_v63 = vld [vmem:[#allocation7 + $0x380] sm:$0xff] }
 0x2e2   :  { %v7918_v24 = vpop.eup %7917 }
 0x2e3   :  { %v2994_v27 = vpack.c.bf16 %v7918_v24, %v7918_v24  ;;  %v7002_v24 = vcombine.low %v3674_v0, %v3678_v1  ;;  %v3622_v0 = vld [vmem:[#allocation7 + $0x3a0] sm:$0xff] }
 0x2e4   :  { %v7920_v5 = vpop.eup %7919  ;;  %v3746_v1 = vld [vmem:[#allocation7 + $0x780] sm:$0xff] }
 0x2e5   :  { %v2995_v25 = vpack.c.bf16 %v7920_v5, %v7920_v5  ;;  %v6867_v5 = vcombine.high %v3538_v7, %v3542_v17 }
 0x2e7   :  { %3331 = vmatprep.mubr.bf16.mxu1 %v2995_v25  ;;  %v6995_v25 = vcombine.high %v3666_v20, %v3670_v21 }
 0x2e8   :  { %3332 = vmatmul.mubr.bf16.vlgmr.msra.gmra.mxu1 %v2994_v27  ;;  %v3530_v27 = vld [vmem:[#allocation7 + $0xc0] sm:$0xff] }
 0x2e9   :  { %3470 = vmatpush1.bf16.msra.mxu1 %v7696_v36  ;;  %3489 = vmatprep.mubr.bf16.mxu1 %v8087_v42  ;;  %v3522_v36 = vld [vmem:[#allocation7 + $0x80] sm:$0xff] }
 0x2ea   :  { %3471 = vmatprep.subr.bf16.mxu1 %v7704_v40  ;;  %v3654_v40 = vld [vmem:[#allocation7 + $0x4a0] sm:$0xff]  ;;  %v6851_v42 = vcombine.high %v3522_v36, %v3526_v39  ;;  %v6850_v34 = vcombine.low %v3522_v36, %v3526_v39 }
 0x2eb   :  { %v6979_v43 = vcombine.high %v3650_v38, %v3654_v40 }
 0x2ed   :  { %3472 = vmatpush1.bf16.msra.mxu1 %v7702_v57 }
 0x2ee   :  { %5125 = vmatprep.subr.bf16.mxu1 %v7019_v16  ;;  %v6843_v16 = vcombine.high %v3514_v44, %v3518_v45 }
 0x328   :  { %v7234_v28 = vpop.f32.mrf.mxu0 }
 0x32a   :  { %v7235_v29 = vpop.f32.mrf.mxu0 }
 0x32b   :  { %v7236_v30 = vadd.f32 %v7235_v29, %v7234_v28  ;;  %v3534_v28 = vld [vmem:[#allocation7 + $0xe0] sm:$0xff] }
 0x32c   :  { %v7237_v31 = vpop.f32.mrf.mxu0  ;;  %v3658_v29 = vld [vmem:[#allocation7 + $0x4c0] sm:$0xff]  ;;  %v6859_v33 = vcombine.high %v3530_v27, %v3534_v28  ;;  %v6858_v41 = vcombine.low %v3530_v27, %v3534_v28 }
 0x32d   :  { %v3294_v50 = vadd.f32 %v7236_v30, %v6791_v48  ;;  %v3662_v30 = vld [vmem:[#allocation7 + $0x4e0] sm:$0xff]  ;;  %v6866_v31 = vcombine.low %v3538_v7, %v3542_v17 }
 0x32e   :  { %v7238_v32 = vpop.f32.mrf.mxu0  ;;  %v6987_v35 = vcombine.high %v3658_v29, %v3662_v30  ;;  %v6986_v57 = vcombine.low %v3658_v29, %v3662_v30  ;;  %v3610_v17 = vld [vmem:[#allocation7 + $0x340] sm:$0xff] }
 0x32f   :  { %v6994_v32 = vcombine.low %v3666_v20, %v3670_v21  ;;  %v3614_v20 = vld [vmem:[#allocation7 + $0x360] sm:$0xff] }
 0x330   :  { %v3738_v21 = vld [vmem:[#allocation7 + $0x740] sm:$0xff]  ;;  %v6938_v28 = vcombine.low %v3610_v17, %v3614_v20 }
 0x331   :  { %v3602_v30 = vld [vmem:[#allocation7 + $0x300] sm:$0xff] }
 0x3a8   :  { %v7256_v49 = vpop.f32.mrf.mxu1 }
 0x3aa   :  { %v7257_v19 = vpop.f32.mrf.mxu1 }
 0x3ab   :  { %v7258_v11 = vadd.f32 %v7257_v19, %v7256_v49  ;;  %v3506_v49 = vld [vmem:[#allocation7] sm:$0xff] }
 0x3ac   :  { %v7259_v51 = vpop.f32.mrf.mxu1  ;;  %v3510_v19 = vld [vmem:[#allocation7 + $0x20] sm:$0xff] }
 0x3ad   :  { %v3334_v8 = vadd.f32 %v7258_v11, %v3294_v50  ;;  %v3634_v50 = vld [vmem:[#allocation7 + $0x400] sm:$0xff]  ;;  %v6842_v51 = vcombine.low %v3514_v44, %v3518_v45 }
 0x3ae   :  { %v7260_v18 = vpop.f32.mrf.mxu1  ;;  %v3638_v11 = vld [vmem:[#allocation7 + $0x420] sm:$0xff] }
 0x3af   :  { %7921 = vtanh.f32 %v3334_v8  ;;  %v6835_v18 = vcombine.high %v3506_v49, %v3510_v19  ;;  %v6963_v52 = vcombine.high %v3634_v50, %v3638_v11 }
 0x3bc   :  { %v7922_v58 = vpop.eup %7921 }
 0x3bd   :  { %v3342_v59 = vpack.c.bf16 %v7922_v58, %v7922_v58  ;;  %3341 = vst.msk [vmem:[#allocation11] sm:$0xff] %vm3340_vm0, %v7922_v58  ;;  %v3758_v58 = vld [vmem:[#allocation7 + $0x7e0] sm:$0xff] }
 0x3be   :  { %v7083_v62 = vcombine.high %v3754_v56, %v3758_v58 }
 0x3bf   :  { %6832 = vmatmul.mubr.msk.bf16.vlgmr.msra.gmra.mxu0 %vm3340_vm0, %v3342_v59  ;;  %6833 = vmatmul.mubr.msk.bf16.vlgmr.msra.gmra.mxu1 %vm3340_vm0, %v3342_v59  ;;  %v6834_v59 = vcombine.low %v3506_v49, %v3510_v19 }
 0x3c0   :  { %5085 = vmatpush1.bf16.msra.mxu0 %v6890_v37  ;;  %5126 = vmatpush1.bf16.msra.mxu1 %v7018_v47  ;;  %v3642_v37 = vld [vmem:[#allocation7 + $0x440] sm:$0xff]  ;;  %v6978_v47 = vcombine.low %v3650_v38, %v3654_v40 }
 0x3c1   :  { %5086 = vmatprep.subr.bf16.mxu0 %v6883_v60  ;;  %5127 = vmatprep.subr.bf16.mxu1 %v7011_v61  ;;  %v6971_v48 = vcombine.high %v3642_v37, %v3646_v46  ;;  %v6970_v8 = vcombine.low %v3642_v37, %v3646_v46  ;;  %v6962_v60 = vcombine.low %v3634_v50, %v3638_v11  ;;  %v3594_v40 = vld [vmem:[#allocation7 + $0x2c0] sm:$0xff] }
 0x3c2   :  { %v6955_v61 = vcombine.high %v3626_v54, %v3630_v55  ;;  %v3586_v46 = vld [vmem:[#allocation7 + $0x280] sm:$0xff] }
 0x3c3   :  { %v3578_v11 = vld [vmem:[#allocation7 + $0x240] sm:$0xff] }
 0x3c4   :  { %5087 = vmatpush1.bf16.msra.mxu0 %v6882_v2  ;;  %5128 = vmatpush1.bf16.msra.mxu1 %v7010_v3  ;;  %v3750_v2 = vld [vmem:[#allocation7 + $0x7a0] sm:$0xff]  ;;  %v6954_v3 = vcombine.low %v3626_v54, %v3630_v55 }
 0x3c5   :  { %5088 = vmatprep.subr.bf16.mxu0 %v6875_v4  ;;  %5129 = vmatprep.subr.bf16.mxu1 %v7003_v6  ;;  %v7082_v4 = vcombine.low %v3754_v56, %v3758_v58  ;;  %v6947_v6 = vcombine.high %v3618_v63, %v3622_v0  ;;  %v7075_v7 = vcombine.high %v3746_v1, %v3750_v2  ;;  %v3570_v58 = vld [vmem:[#allocation7 + $0x200] sm:$0xff] }
 0x3c8   :  { %5089 = vmatpush1.bf16.msra.mxu0 %v6874_v23  ;;  %5130 = vmatpush1.bf16.msra.mxu1 %v7002_v24  ;;  %v3742_v23 = vld [vmem:[#allocation7 + $0x760] sm:$0xff]  ;;  %v6946_v24 = vcombine.low %v3618_v63, %v3622_v0 }
 0x3c9   :  { %5090 = vmatprep.subr.bf16.mxu0 %v6867_v5  ;;  %5131 = vmatprep.subr.bf16.mxu1 %v6995_v25  ;;  %v7074_v5 = vcombine.low %v3746_v1, %v3750_v2  ;;  %v6939_v25 = vcombine.high %v3610_v17, %v3614_v20  ;;  %v7067_v27 = vcombine.high %v3738_v21, %v3742_v23  ;;  %v3563_v2 = vld [vmem:[#allocation7 + $0x1c8] sm:$0xff] }
 0x3ca   :  { %v7066_v29 = vcombine.low %v3738_v21, %v3742_v23  ;;  %v3351_v23 = vld [vmem:[%s8490_s8] sm:$0xf] }
 0x3cc   :  { %5091 = vmatpush1.bf16.msra.mxu0 %v6866_v31  ;;  %5132 = vmatpush1.bf16.msra.mxu1 %v6994_v32  ;;  %v3606_v31 = vld [vmem:[#allocation7 + $0x320] sm:$0xff] }
 0x3cd   :  { %5092 = vmatprep.subr.bf16.mxu0 %v6859_v33  ;;  %5133 = vmatprep.subr.bf16.mxu1 %v6987_v35  ;;  %v3730_v32 = vld [vmem:[#allocation7 + $0x700] sm:$0xff]  ;;  %v6931_v33 = vcombine.high %v3602_v30, %v3606_v31  ;;  %v6930_v36 = vcombine.low %v3602_v30, %v3606_v31 }
 0x3ce   :  { %v3734_v35 = vld [vmem:[#allocation7 + $0x720] sm:$0xff] }
 0x3cf   :  { %v7058_v39 = vcombine.low %v3730_v32, %v3734_v35  ;;  %v7059_v38 = vcombine.high %v3730_v32, %v3734_v35 }
 0x3d0   :  { %5093 = vmatpush1.bf16.msra.mxu0 %v6858_v41  ;;  %5134 = vmatpush1.bf16.msra.mxu1 %v6986_v57  ;;  %v3598_v41 = vld [vmem:[#allocation7 + $0x2e0] sm:$0xff] }
 0x3d1   :  { %5094 = vmatprep.subr.bf16.mxu0 %v6851_v42  ;;  %5135 = vmatprep.subr.bf16.mxu1 %v6979_v43  ;;  %v3722_v57 = vld [vmem:[#allocation7 + $0x6c0] sm:$0xff]  ;;  %v6923_v42 = vcombine.high %v3594_v40, %v3598_v41  ;;  %v6922_v44 = vcombine.low %v3594_v40, %v3598_v41 }
 0x3d2   :  { %v3726_v43 = vld [vmem:[#allocation7 + $0x6e0] sm:$0xff] }
 0x3d3   :  { %v7050_v45 = vcombine.low %v3722_v57, %v3726_v43  ;;  %v7051_v37 = vcombine.high %v3722_v57, %v3726_v43 }
 0x3d4   :  { %5095 = vmatpush1.bf16.msra.mxu0 %v6850_v34  ;;  %5136 = vmatpush1.bf16.msra.mxu1 %v6978_v47  ;;  %v3590_v34 = vld [vmem:[#allocation7 + $0x2a0] sm:$0xff] }
 0x3d5   :  { %5096 = vmatprep.subr.bf16.mxu0 %v6843_v16  ;;  %5137 = vmatprep.subr.bf16.mxu1 %v6971_v48  ;;  %v3714_v47 = vld [vmem:[#allocation7 + $0x680] sm:$0xff]  ;;  %v6915_v16 = vcombine.high %v3586_v46, %v3590_v34  ;;  %v6914_v49 = vcombine.low %v3586_v46, %v3590_v34  ;;  %v3683_v34 = vld [vmem:[#allocation7 + $0x588] sm:$0xff] }
 0x3d6   :  { %v3718_v48 = vld [vmem:[#allocation7 + $0x6a0] sm:$0xff] }
 0x3d7   :  { %v7042_v19 = vcombine.low %v3714_v47, %v3718_v48  ;;  %v7043_v50 = vcombine.high %v3714_v47, %v3718_v48  ;;  %v3687_v47 = vld [vmem:[#allocation7 + $0x5a8] sm:$0xff] }
 0x3d8   :  { %5097 = vmatpush1.bf16.msra.mxu0 %v6842_v51  ;;  %5138 = vmatpush1.bf16.msra.mxu1 %v6970_v8  ;;  %v3582_v51 = vld [vmem:[#allocation7 + $0x260] sm:$0xff] }
 0x3d9   :  { %5098 = vmatprep.subr.bf16.mxu0 %v6835_v18  ;;  %5139 = vmatprep.subr.bf16.mxu1 %v6963_v52  ;;  %v3706_v8 = vld [vmem:[#allocation7 + $0x640] sm:$0xff]  ;;  %v6907_v18 = vcombine.high %v3578_v11, %v3582_v51  ;;  %v6906_v54 = vcombine.low %v3578_v11, %v3582_v51  ;;  %v3551_v11 = vld [vmem:[#allocation7 + $0x168] sm:$0xff]  ;;  %v7013_v51 = vcombine.high %v3683_v34, %v3687_v47 }
 0x3da   :  { %v3710_v52 = vld [vmem:[#allocation7 + $0x660] sm:$0xff] }
 0x3db   :  { %v7034_v55 = vcombine.low %v3706_v8, %v3710_v52  ;;  %v7035_v56 = vcombine.high %v3706_v8, %v3710_v52  ;;  %v3675_v8 = vld [vmem:[#allocation7 + $0x548] sm:$0xff] }
 0x3dc   :  { %5099 = vmatpush1.bf16.msra.mxu0 %v6834_v59  ;;  %5140 = vmatpush1.bf16.msra.mxu1 %v6962_v60  ;;  %v3574_v59 = vld [vmem:[#allocation7 + $0x220] sm:$0xff] }
 0x3dd   :  { %5100 = vmatprep.subr.bf16.mxu0 %v6955_v61  ;;  %5141 = vmatprep.subr.bf16.mxu1 %v7083_v62  ;;  %v3698_v60 = vld [vmem:[#allocation7 + $0x600] sm:$0xff]  ;;  %v6899_v61 = vcombine.high %v3570_v58, %v3574_v59  ;;  %v6898_v63 = vcombine.low %v3570_v58, %v3574_v59  ;;  %v3539_v58 = vld [vmem:[#allocation7 + $0x108] sm:$0xff] }
 0x3de   :  { %v3702_v62 = vld [vmem:[#allocation7 + $0x620] sm:$0xff]  ;;  %v3543_v59 = vld [vmem:[#allocation7 + $0x128] sm:$0xff] }
 0x3df   :  { %v7026_v0 = vcombine.low %v3698_v60, %v3702_v62  ;;  %v7027_v1 = vcombine.high %v3698_v60, %v3702_v62  ;;  %v3667_v60 = vld [vmem:[#allocation7 + $0x508] sm:$0xff] }
 0x3e0   :  { %5101 = vmatpush2.bf16.msra.mxu0 %v6954_v3  ;;  %5142 = vmatpush2.bf16.msra.mxu1 %v7082_v4  ;;  %v3567_v3 = vld [vmem:[#allocation7 + $0x1e8] sm:$0xff] }
 0x3e1   :  { %5102 = vmatprep.subr.bf16.mxu0 %v6947_v6  ;;  %5143 = vmatprep.subr.bf16.mxu1 %v7075_v7  ;;  %v3691_v4 = vld [vmem:[#allocation7 + $0x5c8] sm:$0xff]  ;;  %v6893_v6 = vcombine.high %v3563_v2, %v3567_v3  ;;  %v6892_v17 = vcombine.low %v3563_v2, %v3567_v3 }
 0x3e2   :  { %v3695_v7 = vld [vmem:[#allocation7 + $0x5e8] sm:$0xff] }
 0x3e3   :  { %v7020_v20 = vcombine.low %v3691_v4, %v3695_v7  ;;  %v7021_v21 = vcombine.high %v3691_v4, %v3695_v7  ;;  %v3531_v2 = vld [vmem:[#allocation7 + $0xc8] sm:$0xff]  ;;  %v6868_v7 = vcombine.low %v3539_v58, %v3543_v59 }
 0x3e4   :  { %5103 = vmatpush2.bf16.msra.mxu0 %v6946_v24  ;;  %5144 = vmatpush2.bf16.msra.mxu1 %v7074_v5  ;;  %v3356_v24 = vrot.slane %v3351_v23, %v8201_v10  ;;  %v3364_v5 = vrot.slane %v3351_v23, %v8209_v12  ;;  %v3535_v3 = vld [vmem:[#allocation7 + $0xe8] sm:$0xff] }
 0x3e5   :  { %5104 = vmatprep.subr.bf16.mxu0 %v6939_v25  ;;  %5145 = vmatprep.subr.bf16.mxu1 %v7067_v27  ;;  %v3360_v25 = vrot.slane %v3351_v23, %v8212_v14  ;;  %v3368_v27 = vrot.slane %v3351_v23, %v8215_v15  ;;  %v3659_v4 = vld [vmem:[#allocation7 + $0x4c8] sm:$0xff] }
 0x3e6   :  { %v3523_v23 = vld [vmem:[#allocation7 + $0x88] sm:$0xff] }
 0x3e8   :  { %5105 = vmatpush2.bf16.msra.mxu0 %v6938_v28  ;;  %5146 = vmatpush2.bf16.msra.mxu1 %v7066_v29 }
 0x3e9   :  { %5106 = vmatprep.subr.bf16.mxu0 %v6931_v33  ;;  %5147 = vmatprep.subr.bf16.mxu1 %v7059_v38 }
 0x3ec   :  { %5107 = vmatpush2.bf16.msra.mxu0 %v6930_v36  ;;  %5148 = vmatpush2.bf16.msra.mxu1 %v7058_v39 }
 0x3ed   :  { %5108 = vmatprep.subr.bf16.mxu0 %v6923_v42  ;;  %5149 = vmatprep.subr.bf16.mxu1 %v7051_v37 }
 0x3f0   :  { %5109 = vmatpush2.bf16.msra.mxu0 %v6922_v44  ;;  %5150 = vmatpush2.bf16.msra.mxu1 %v7050_v45  ;;  %v3555_v44 = vld [vmem:[#allocation7 + $0x188] sm:$0xff] }
 0x3f1   :  { %5110 = vmatprep.subr.bf16.mxu0 %v6915_v16  ;;  %5151 = vmatprep.subr.bf16.mxu1 %v7043_v50  ;;  %v3559_v45 = vld [vmem:[#allocation7 + $0x1a8] sm:$0xff] }
 0x3f2   :  { %v3547_v50 = vld [vmem:[#allocation7 + $0x148] sm:$0xff]  ;;  %v6884_v52 = vcombine.low %v3555_v44, %v3559_v45 }
 0x3f3   :  { %v6876_v62 = vcombine.low %v3547_v50, %v3551_v11 }
 0x3f4   :  { %5111 = vmatpush2.bf16.msra.mxu0 %v6914_v49  ;;  %5152 = vmatpush2.bf16.msra.mxu1 %v7042_v19  ;;  %v6885_v19 = vcombine.high %v3555_v44, %v3559_v45 }
 0x3f5   :  { %5112 = vmatprep.subr.bf16.mxu0 %v6907_v18  ;;  %5153 = vmatprep.subr.bf16.mxu1 %v7035_v56  ;;  %v3679_v18 = vld [vmem:[#allocation7 + $0x568] sm:$0xff] }
 0x3f6   :  { %v7005_v56 = vcombine.high %v3675_v8, %v3679_v18 }
 0x3f8   :  { %5113 = vmatpush2.bf16.msra.mxu0 %v6906_v54  ;;  %5154 = vmatpush2.bf16.msra.mxu1 %v7034_v55  ;;  %v7012_v54 = vcombine.low %v3683_v34, %v3687_v47  ;;  %v6877_v55 = vcombine.high %v3547_v50, %v3551_v11  ;;  %v3627_v47 = vld [vmem:[#allocation7 + $0x3c8] sm:$0xff] }
 0x3f9   :  { %5114 = vmatprep.subr.bf16.mxu0 %v6899_v61  ;;  %5155 = vmatprep.subr.bf16.mxu1 %v7027_v1  ;;  %v3671_v61 = vld [vmem:[#allocation7 + $0x528] sm:$0xff] }
 0x3fa   :  { %v6997_v1 = vcombine.high %v3667_v60, %v3671_v61  ;;  %v3755_v50 = vld [vmem:[#allocation7 + $0x7c8] sm:$0xff] }
 0x3fb   :  { %v3759_v11 = vld [vmem:[#allocation7 + $0x7e8] sm:$0xff] }
 0x3fc   :  { %5115 = vmatpush2.bf16.msra.mxu0 %v6898_v63  ;;  %5156 = vmatpush2.bf16.msra.mxu1 %v7026_v0  ;;  %v7004_v63 = vcombine.low %v3675_v8, %v3679_v18  ;;  %v6869_v0 = vcombine.high %v3539_v58, %v3543_v59  ;;  %v3751_v58 = vld [vmem:[#allocation7 + $0x7a8] sm:$0xff] }
 0x3fd   :  { %5166 = vmatprep.subr.bf16.mxu0 %v6893_v6  ;;  %5207 = vmatprep.subr.bf16.mxu1 %v7021_v21  ;;  %v3663_v6 = vld [vmem:[#allocation7 + $0x4e8] sm:$0xff] }
 0x3fe   :  { %v6989_v21 = vcombine.high %v3659_v4, %v3663_v6 }
 0x47f   :  { %v3450_v28 = vpop.f32.mrf.mxu0  ;;  %v3491_v29 = vpop.f32.mrf.mxu1 }
 0x480   :  { %v3451_v30 = vadd.f32 %v3450_v28, %v3356_v24  ;;  %v3492_v31 = vadd.f32 %v3491_v29, %v3364_v5  ;;  %v3527_v24 = vld [vmem:[#allocation7 + $0xa8] sm:$0xff]  ;;  %v6988_v28 = vcombine.low %v3659_v4, %v3663_v6 }
 0x481   :  { %v3452_v32 = vpop.f32.mrf.mxu0  ;;  %v3493_v33 = vpop.f32.mrf.mxu1  ;;  %v3651_v5 = vld [vmem:[#allocation7 + $0x488] sm:$0xff]  ;;  %v6853_v29 = vcombine.high %v3523_v23, %v3527_v24 }
 0x482   :  { %7923 = vtanh.f32 %v3451_v30  ;;  %v3453_v35 = vadd.f32 %v3452_v32, %v3360_v25  ;;  %v3494_v36 = vadd.f32 %v3493_v33, %v3368_v27  ;;  %v3655_v25 = vld [vmem:[#allocation7 + $0x4a8] sm:$0xff]  ;;  %v6860_v27 = vcombine.low %v3531_v2, %v3535_v3 }
 0x483   :  { %7925 = vtanh.f32 %v3492_v31  ;;  %v3454_v39 = vpop.f32.mrf.mxu0  ;;  %v3495_v38 = vpop.f32.mrf.mxu1  ;;  %v6981_v30 = vcombine.high %v3651_v5, %v3655_v25  ;;  %v3515_v31 = vld [vmem:[#allocation7 + $0x48] sm:$0xff] }
 0x484   :  { %7927 = vtanh.f32 %v3453_v35  ;;  %v3519_v32 = vld [vmem:[#allocation7 + $0x68] sm:$0xff]  ;;  %v6980_v39 = vcombine.low %v3651_v5, %v3655_v25 }
 0x485   :  { %7929 = vtanh.f32 %v3494_v36  ;;  %v3455_v40 = vpop.f32.mrf.mxu0  ;;  %v3496_v41 = vpop.f32.mrf.mxu1  ;;  %v3643_v33 = vld [vmem:[#allocation7 + $0x448] sm:$0xff]  ;;  %v6852_v36 = vcombine.low %v3523_v23, %v3527_v24  ;;  %v6845_v38 = vcombine.high %v3515_v31, %v3519_v32  ;;  %v6844_v44 = vcombine.low %v3515_v31, %v3519_v32 }
 0x486   :  { %v3647_v35 = vld [vmem:[#allocation7 + $0x468] sm:$0xff] }
 0x487   :  { %v6973_v40 = vcombine.high %v3643_v33, %v3647_v35  ;;  %v3507_v41 = vld [vmem:[#allocation7 + $0x8] sm:$0xff]  ;;  %v6972_v45 = vcombine.low %v3643_v33, %v3647_v35 }
 0x488   :  { %v3735_v23 = vld [vmem:[#allocation7 + $0x728] sm:$0xff] }
 0x489   :  { %v3727_v31 = vld [vmem:[#allocation7 + $0x6e8] sm:$0xff] }
 0x48f   :  { %v7924_v57 = vpop.eup %7923 }
 0x490   :  { %v7926_v42 = vpop.eup %7925  ;;  %v8418_v16 = vpack.c.bf16 %v7924_v57, %v7924_v57  ;;  %v3511_v57 = vld [vmem:[#allocation7 + $0x28] sm:$0xff] }
 0x491   :  { %v7928_v43 = vpop.eup %7927  ;;  %v8422_v49 = vpack.c.bf16 %v7926_v42, %v7926_v42  ;;  %v3635_v42 = vld [vmem:[#allocation7 + $0x408] sm:$0xff] }
 0x492   :  { %v7930_v37 = vpop.eup %7929  ;;  %v8416_v46 = vpack.c.bf16 %v7928_v43, %v7928_v43  ;;  %v3639_v43 = vld [vmem:[#allocation7 + $0x428] sm:$0xff] }
 0x493   :  { %v8420_v48 = vpack.c.bf16 %v7930_v37, %v7930_v37  ;;  %v6837_v37 = vcombine.high %v3507_v41, %v3511_v57  ;;  %v6965_v34 = vcombine.high %v3635_v42, %v3639_v43  ;;  %v6964_v8 = vcombine.low %v3635_v42, %v3639_v43 }
 0x494   :  { %5116 = vmatprep.mubr.bf16.mxu0 %v8416_v46 }
 0x495   :  { %5157 = vmatprep.mubr.bf16.mxu1 %v8420_v48  ;;  %5117 = vmatmul.mubr.bf16.vlgmr.msra.gmra.mxu0 %v8418_v16 }
 0x496   :  { %5158 = vmatmul.mubr.bf16.vlgmr.msra.gmra.mxu1 %v8422_v49  ;;  %5167 = vmatpush1.bf16.msra.mxu0 %v6892_v17  ;;  %v6996_v17 = vcombine.low %v3667_v60, %v3671_v61  ;;  %v7084_v60 = vcombine.low %v3755_v50, %v3759_v11 }
 0x497   :  { %5208 = vmatpush1.bf16.msra.mxu1 %v7020_v20  ;;  %5198 = vmatprep.mubr.bf16.mxu0 %v8416_v46  ;;  %v6861_v20 = vcombine.high %v3531_v2, %v3535_v3  ;;  %v3743_v2 = vld [vmem:[#allocation7 + $0x768] sm:$0xff] }
 0x498   :  { %5239 = vmatprep.mubr.bf16.mxu1 %v8420_v48  ;;  %5168 = vmatprep.subr.bf16.mxu0 %v6885_v19  ;;  %v3631_v19 = vld [vmem:[#allocation7 + $0x3e8] sm:$0xff] }
 0x499   :  { %5209 = vmatprep.subr.bf16.mxu1 %v7013_v51  ;;  %v6836_v51 = vcombine.low %v3507_v41, %v3511_v57  ;;  %v6957_v18 = vcombine.high %v3627_v47, %v3631_v19  ;;  %v6956_v59 = vcombine.low %v3627_v47, %v3631_v19  ;;  %v3719_v41 = vld [vmem:[#allocation7 + $0x6a8] sm:$0xff] }
 0x49a   :  { %5169 = vmatpush1.bf16.msra.mxu0 %v6884_v52  ;;  %v7085_v52 = vcombine.high %v3755_v50, %v3759_v11  ;;  %v3711_v47 = vld [vmem:[#allocation7 + $0x668] sm:$0xff] }
 0x49b   :  { %5210 = vmatpush1.bf16.msra.mxu1 %v7012_v54  ;;  %5170 = vmatprep.subr.bf16.mxu0 %v6877_v55  ;;  %v3619_v54 = vld [vmem:[#allocation7 + $0x388] sm:$0xff] }
 0x49c   :  { %5211 = vmatprep.subr.bf16.mxu1 %v7005_v56  ;;  %v3623_v55 = vld [vmem:[#allocation7 + $0x3a8] sm:$0xff] }
 0x49d   :  { %v3747_v56 = vld [vmem:[#allocation7 + $0x788] sm:$0xff]  ;;  %v6949_v61 = vcombine.high %v3619_v54, %v3623_v55  ;;  %v6948_v3 = vcombine.low %v3619_v54, %v3623_v55 }
 0x49e   :  { %5171 = vmatpush1.bf16.msra.mxu0 %v6876_v62  ;;  %v7077_v62 = vcombine.high %v3747_v56, %v3751_v58  ;;  %v7076_v4 = vcombine.low %v3747_v56, %v3751_v58  ;;  %v3703_v54 = vld [vmem:[#allocation7 + $0x628] sm:$0xff] }
 0x49f   :  { %5212 = vmatpush1.bf16.msra.mxu1 %v7004_v63  ;;  %5172 = vmatprep.subr.bf16.mxu0 %v6869_v0  ;;  %v3611_v63 = vld [vmem:[#allocation7 + $0x348] sm:$0xff] }
 0x4a0   :  { %5213 = vmatprep.subr.bf16.mxu1 %v6997_v1  ;;  %v3615_v0 = vld [vmem:[#allocation7 + $0x368] sm:$0xff] }
 0x4a1   :  { %v3739_v1 = vld [vmem:[#allocation7 + $0x748] sm:$0xff]  ;;  %v6941_v6 = vcombine.high %v3611_v63, %v3615_v0  ;;  %v6940_v24 = vcombine.low %v3611_v63, %v3615_v0  ;;  %v3696_v63 = vld [vmem:[#allocation7 + $0x5f0] sm:$0xff] }
 0x4a2   :  { %5173 = vmatpush1.bf16.msra.mxu0 %v6868_v7  ;;  %v7069_v7 = vcombine.high %v3739_v1, %v3743_v2  ;;  %v7068_v5 = vcombine.low %v3739_v1, %v3743_v2 }
 0x4a3   :  { %5214 = vmatpush1.bf16.msra.mxu1 %v6996_v17  ;;  %5174 = vmatprep.subr.bf16.mxu0 %v6861_v20  ;;  %v3603_v17 = vld [vmem:[#allocation7 + $0x308] sm:$0xff] }
 0x4a4   :  { %5215 = vmatprep.subr.bf16.mxu1 %v6989_v21  ;;  %v3607_v20 = vld [vmem:[#allocation7 + $0x328] sm:$0xff] }
 0x4a5   :  { %v3731_v21 = vld [vmem:[#allocation7 + $0x708] sm:$0xff]  ;;  %v6933_v25 = vcombine.high %v3603_v17, %v3607_v20  ;;  %v6932_v32 = vcombine.low %v3603_v17, %v3607_v20  ;;  %v3684_v17 = vld [vmem:[#allocation7 + $0x590] sm:$0xff] }
 0x4a6   :  { %5175 = vmatpush1.bf16.msra.mxu0 %v6860_v27  ;;  %v7061_v27 = vcombine.high %v3731_v21, %v3735_v23  ;;  %v7060_v33 = vcombine.low %v3731_v21, %v3735_v23  ;;  %v3688_v20 = vld [vmem:[#allocation7 + $0x5b0] sm:$0xff] }
 0x4a7   :  { %5216 = vmatpush1.bf16.msra.mxu1 %v6988_v28  ;;  %5176 = vmatprep.subr.bf16.mxu0 %v6853_v29  ;;  %v3595_v28 = vld [vmem:[#allocation7 + $0x2c8] sm:$0xff] }
 0x4a8   :  { %5217 = vmatprep.subr.bf16.mxu1 %v6981_v30  ;;  %v3599_v29 = vld [vmem:[#allocation7 + $0x2e8] sm:$0xff] }
 0x4a9   :  { %v3723_v30 = vld [vmem:[#allocation7 + $0x6c8] sm:$0xff]  ;;  %v6925_v35 = vcombine.high %v3595_v28, %v3599_v29  ;;  %v6924_v57 = vcombine.low %v3595_v28, %v3599_v29  ;;  %v3680_v28 = vld [vmem:[#allocation7 + $0x570] sm:$0xff] }
 0x4aa   :  { %5177 = vmatpush1.bf16.msra.mxu0 %v6852_v36  ;;  %v7053_v36 = vcombine.high %v3723_v30, %v3727_v31  ;;  %v7052_v42 = vcombine.low %v3723_v30, %v3727_v31  ;;  %v7014_v30 = vcombine.low %v3684_v17, %v3688_v20 }
 0x4ab   :  { %5218 = vmatpush1.bf16.msra.mxu1 %v6980_v39  ;;  %5178 = vmatprep.subr.bf16.mxu0 %v6845_v38  ;;  %v3587_v39 = vld [vmem:[#allocation7 + $0x288] sm:$0xff] }
 0x4ac   :  { %5219 = vmatprep.subr.bf16.mxu1 %v6973_v40  ;;  %v3591_v38 = vld [vmem:[#allocation7 + $0x2a8] sm:$0xff] }
 0x4ad   :  { %v3715_v40 = vld [vmem:[#allocation7 + $0x688] sm:$0xff]  ;;  %v6917_v43 = vcombine.high %v3587_v39, %v3591_v38  ;;  %v6916_v19 = vcombine.low %v3587_v39, %v3591_v38  ;;  %v3672_v39 = vld [vmem:[#allocation7 + $0x530] sm:$0xff] }
 0x4ae   :  { %5179 = vmatpush1.bf16.msra.mxu0 %v6844_v44  ;;  %v7045_v44 = vcombine.high %v3715_v40, %v3719_v41  ;;  %v7044_v50 = vcombine.low %v3715_v40, %v3719_v41 }
 0x4af   :  { %5220 = vmatpush1.bf16.msra.mxu1 %v6972_v45  ;;  %5180 = vmatprep.subr.bf16.mxu0 %v6837_v37  ;;  %v3579_v45 = vld [vmem:[#allocation7 + $0x248] sm:$0xff] }
 0x4b0   :  { %5221 = vmatprep.subr.bf16.mxu1 %v6965_v34  ;;  %v3583_v37 = vld [vmem:[#allocation7 + $0x268] sm:$0xff] }
 0x4b1   :  { %v3707_v34 = vld [vmem:[#allocation7 + $0x648] sm:$0xff]  ;;  %v6909_v11 = vcombine.high %v3579_v45, %v3583_v37  ;;  %v6908_v55 = vcombine.low %v3579_v45, %v3583_v37  ;;  %v3664_v45 = vld [vmem:[#allocation7 + $0x4f0] sm:$0xff] }
 0x4b2   :  { %5181 = vmatpush1.bf16.msra.mxu0 %v6836_v51  ;;  %v7037_v51 = vcombine.high %v3707_v34, %v3711_v47  ;;  %v7036_v56 = vcombine.low %v3707_v34, %v3711_v47 }
 0x4b3   :  { %5222 = vmatpush1.bf16.msra.mxu1 %v6964_v8  ;;  %5182 = vmatprep.subr.bf16.mxu0 %v6957_v18  ;;  %v3571_v8 = vld [vmem:[#allocation7 + $0x208] sm:$0xff] }
 0x4b4   :  { %5223 = vmatprep.subr.bf16.mxu1 %v7085_v52  ;;  %v3575_v18 = vld [vmem:[#allocation7 + $0x228] sm:$0xff] }
 0x4b5   :  { %v3699_v52 = vld [vmem:[#allocation7 + $0x608] sm:$0xff]  ;;  %v6901_v58 = vcombine.high %v3571_v8, %v3575_v18  ;;  %v6900_v0 = vcombine.low %v3571_v8, %v3575_v18  ;;  %v3656_v8 = vld [vmem:[#allocation7 + $0x4b0] sm:$0xff] }
 0x4b6   :  { %5183 = vmatpush2.bf16.msra.mxu0 %v6956_v59  ;;  %v7029_v59 = vcombine.high %v3699_v52, %v3703_v54  ;;  %v7028_v1 = vcombine.low %v3699_v52, %v3703_v54 }
 0x4b7   :  { %5224 = vmatpush2.bf16.msra.mxu1 %v7084_v60  ;;  %5184 = vmatprep.subr.bf16.mxu0 %v6949_v61  ;;  %v3564_v60 = vld [vmem:[#allocation7 + $0x1d0] sm:$0xff] }
 0x4b8   :  { %5225 = vmatprep.subr.bf16.mxu1 %v7077_v62  ;;  %v3568_v61 = vld [vmem:[#allocation7 + $0x1f0] sm:$0xff] }
 0x4b9   :  { %v3692_v62 = vld [vmem:[#allocation7 + $0x5d0] sm:$0xff]  ;;  %v6895_v2 = vcombine.high %v3564_v60, %v3568_v61 }
 0x4ba   :  { %5185 = vmatpush2.bf16.msra.mxu0 %v6948_v3  ;;  %v7023_v3 = vcombine.high %v3692_v62, %v3696_v63  ;;  %v7022_v21 = vcombine.low %v3692_v62, %v3696_v63 }
 0x4bb   :  { %5226 = vmatpush2.bf16.msra.mxu1 %v7076_v4  ;;  %5186 = vmatprep.subr.bf16.mxu0 %v6941_v6  ;;  %v3556_v4 = vld [vmem:[#allocation7 + $0x190] sm:$0xff] }
 0x4bc   :  { %5227 = vmatprep.subr.bf16.mxu1 %v7069_v7  ;;  %v3560_v6 = vld [vmem:[#allocation7 + $0x1b0] sm:$0xff]  ;;  %v6894_v7 = vcombine.low %v3564_v60, %v3568_v61 }
 0x4bd   :  { %v6887_v23 = vcombine.high %v3556_v4, %v3560_v6  ;;  %v6886_v29 = vcombine.low %v3556_v4, %v3560_v6  ;;  %v3648_v60 = vld [vmem:[#allocation7 + $0x470] sm:$0xff] }
 0x4be   :  { %5187 = vmatpush2.bf16.msra.mxu0 %v6940_v24  ;;  %v3548_v24 = vld [vmem:[#allocation7 + $0x150] sm:$0xff] }
 0x4bf   :  { %5228 = vmatpush2.bf16.msra.mxu1 %v7068_v5  ;;  %5188 = vmatprep.subr.bf16.mxu0 %v6933_v25  ;;  %v3552_v5 = vld [vmem:[#allocation7 + $0x170] sm:$0xff]  ;;  %v7015_v25 = vcombine.high %v3684_v17, %v3688_v20 }
 0x4c0   :  { %5229 = vmatprep.subr.bf16.mxu1 %v7061_v27  ;;  %v3676_v27 = vld [vmem:[#allocation7 + $0x550] sm:$0xff]  ;;  %v6879_v31 = vcombine.high %v3548_v24, %v3552_v5  ;;  %v6878_v38 = vcombine.low %v3548_v24, %v3552_v5 }
 0x4c1   :  { %v7006_v40 = vcombine.low %v3676_v27, %v3680_v28  ;;  %v3640_v4 = vld [vmem:[#allocation7 + $0x430] sm:$0xff] }
 0x4c2   :  { %5189 = vmatpush2.bf16.msra.mxu0 %v6932_v32  ;;  %v7007_v32 = vcombine.high %v3676_v27, %v3680_v28  ;;  %v3756_v24 = vld [vmem:[#allocation7 + $0x7d0] sm:$0xff] }
 0x4c3   :  { %5230 = vmatpush2.bf16.msra.mxu1 %v7060_v33  ;;  %5190 = vmatprep.subr.bf16.mxu0 %v6925_v35  ;;  %v3540_v33 = vld [vmem:[#allocation7 + $0x110] sm:$0xff] }
 0x4c4   :  { %5231 = vmatprep.subr.bf16.mxu1 %v7053_v36  ;;  %v3544_v35 = vld [vmem:[#allocation7 + $0x130] sm:$0xff] }
 0x4c5   :  { %v3668_v36 = vld [vmem:[#allocation7 + $0x510] sm:$0xff]  ;;  %v6871_v41 = vcombine.high %v3540_v33, %v3544_v35  ;;  %v6870_v37 = vcombine.low %v3540_v33, %v3544_v35 }
 0x4c6   :  { %5191 = vmatpush2.bf16.msra.mxu0 %v6924_v57  ;;  %v6999_v57 = vcombine.high %v3668_v36, %v3672_v39  ;;  %v6998_v34 = vcombine.low %v3668_v36, %v3672_v39  ;;  %v3760_v5 = vld [vmem:[#allocation7 + $0x7f0] sm:$0xff] }
 0x4c7   :  { %5232 = vmatpush2.bf16.msra.mxu1 %v7052_v42  ;;  %5192 = vmatprep.subr.bf16.mxu0 %v6917_v43  ;;  %v3532_v42 = vld [vmem:[#allocation7 + $0xd0] sm:$0xff]  ;;  %v7086_v36 = vcombine.low %v3756_v24, %v3760_v5 }
 0x4c8   :  { %5233 = vmatprep.subr.bf16.mxu1 %v7045_v44  ;;  %v3536_v43 = vld [vmem:[#allocation7 + $0xf0] sm:$0xff] }
 0x4c9   :  { %v3660_v44 = vld [vmem:[#allocation7 + $0x4d0] sm:$0xff]  ;;  %v6863_v47 = vcombine.high %v3532_v42, %v3536_v43  ;;  %v6862_v18 = vcombine.low %v3532_v42, %v3536_v43 }
 0x4ca   :  { %5193 = vmatpush2.bf16.msra.mxu0 %v6916_v19  ;;  %v6991_v19 = vcombine.high %v3660_v44, %v3664_v45  ;;  %v6990_v52 = vcombine.low %v3660_v44, %v3664_v45  ;;  %v3752_v33 = vld [vmem:[#allocation7 + $0x7b0] sm:$0xff] }
 0x4cb   :  { %5234 = vmatpush2.bf16.msra.mxu1 %v7044_v50  ;;  %5194 = vmatprep.subr.bf16.mxu0 %v6909_v11  ;;  %v3524_v50 = vld [vmem:[#allocation7 + $0x90] sm:$0xff] }
 0x4cc   :  { %5235 = vmatprep.subr.bf16.mxu1 %v7037_v51  ;;  %v3528_v11 = vld [vmem:[#allocation7 + $0xb0] sm:$0xff] }
 0x4cd   :  { %v3652_v51 = vld [vmem:[#allocation7 + $0x490] sm:$0xff]  ;;  %v6855_v54 = vcombine.high %v3524_v50, %v3528_v11  ;;  %v6854_v61 = vcombine.low %v3524_v50, %v3528_v11 }
 0x4ce   :  { %5195 = vmatpush2.bf16.msra.mxu0 %v6908_v55  ;;  %v6983_v55 = vcombine.high %v3652_v51, %v3656_v8  ;;  %v6982_v62 = vcombine.low %v3652_v51, %v3656_v8  ;;  %v3744_v42 = vld [vmem:[#allocation7 + $0x770] sm:$0xff] }
 0x4cf   :  { %5236 = vmatpush2.bf16.msra.mxu1 %v7036_v56  ;;  %5196 = vmatprep.subr.bf16.mxu0 %v6901_v58  ;;  %v3516_v56 = vld [vmem:[#allocation7 + $0x50] sm:$0xff] }
 0x4d0   :  { %5237 = vmatprep.subr.bf16.mxu1 %v7029_v59  ;;  %v3520_v58 = vld [vmem:[#allocation7 + $0x70] sm:$0xff] }
 0x4d1   :  { %v3644_v59 = vld [vmem:[#allocation7 + $0x450] sm:$0xff]  ;;  %v6847_v63 = vcombine.high %v3516_v56, %v3520_v58  ;;  %v6846_v6 = vcombine.low %v3516_v56, %v3520_v58 }
 0x4d2   :  { %5197 = vmatpush2.bf16.msra.mxu0 %v6900_v0  ;;  %v6975_v0 = vcombine.high %v3644_v59, %v3648_v60  ;;  %v3736_v50 = vld [vmem:[#allocation7 + $0x730] sm:$0xff] }
 0x4d3   :  { %5238 = vmatpush2.bf16.msra.mxu1 %v7028_v1  ;;  %5248 = vmatprep.subr.bf16.mxu0 %v6895_v2  ;;  %v3508_v1 = vld [vmem:[#allocation7 + $0x10] sm:$0xff] }
 0x4d4   :  { %5289 = vmatprep.subr.bf16.mxu1 %v7023_v3  ;;  %v3512_v2 = vld [vmem:[#allocation7 + $0x30] sm:$0xff] }
 0x4d5   :  { %5199 = vmatmul.mubr.bf16.vlgmr.msra.gmra.mxu0 %v8418_v16  ;;  %v3636_v3 = vld [vmem:[#allocation7 + $0x410] sm:$0xff]  ;;  %v6839_v17 = vcombine.high %v3508_v1, %v3512_v2 }
 0x4d6   :  { %5240 = vmatmul.mubr.bf16.vlgmr.msra.gmra.mxu1 %v8422_v49  ;;  %5249 = vmatpush1.bf16.msra.mxu0 %v6894_v7  ;;  %v6974_v7 = vcombine.low %v3644_v59, %v3648_v60  ;;  %v6967_v20 = vcombine.high %v3636_v3, %v3640_v4  ;;  %v6966_v27 = vcombine.low %v3636_v3, %v3640_v4  ;;  %v3728_v56 = vld [vmem:[#allocation7 + $0x6f0] sm:$0xff] }
 0x4d7   :  { %5280 = vmatprep.mubr.bf16.mxu0 %v8416_v46  ;;  %5290 = vmatpush1.bf16.msra.mxu1 %v7022_v21  ;;  %v3628_v21 = vld [vmem:[#allocation7 + $0x3d0] sm:$0xff] }
 0x4d8   :  { %5321 = vmatprep.mubr.bf16.mxu1 %v8420_v48  ;;  %5250 = vmatprep.subr.bf16.mxu0 %v6887_v23  ;;  %v3632_v23 = vld [vmem:[#allocation7 + $0x3f0] sm:$0xff] }
 0x4d9   :  { %5291 = vmatprep.subr.bf16.mxu1 %v7015_v25  ;;  %v6838_v25 = vcombine.low %v3508_v1, %v3512_v2  ;;  %v6959_v28 = vcombine.high %v3628_v21, %v3632_v23  ;;  %v6958_v35 = vcombine.low %v3628_v21, %v3632_v23  ;;  %v3720_v1 = vld [vmem:[#allocation7 + $0x6b0] sm:$0xff] }
 0x4da   :  { %5251 = vmatpush1.bf16.msra.mxu0 %v6886_v29  ;;  %v7087_v29 = vcombine.high %v3756_v24, %v3760_v5  ;;  %v3712_v21 = vld [vmem:[#allocation7 + $0x670] sm:$0xff] }
 0x4db   :  { %5292 = vmatpush1.bf16.msra.mxu1 %v7014_v30  ;;  %5252 = vmatprep.subr.bf16.mxu0 %v6879_v31  ;;  %v3620_v30 = vld [vmem:[#allocation7 + $0x390] sm:$0xff] }
 0x4dc   :  { %5293 = vmatprep.subr.bf16.mxu1 %v7007_v32  ;;  %v3624_v31 = vld [vmem:[#allocation7 + $0x3b0] sm:$0xff] }
 0x4dd   :  { %v3748_v32 = vld [vmem:[#allocation7 + $0x790] sm:$0xff]  ;;  %v6951_v39 = vcombine.high %v3620_v30, %v3624_v31  ;;  %v6950_v43 = vcombine.low %v3620_v30, %v3624_v31 }
 0x4de   :  { %5253 = vmatpush1.bf16.msra.mxu0 %v6878_v38  ;;  %v7079_v38 = vcombine.high %v3748_v32, %v3752_v33  ;;  %v7078_v44 = vcombine.low %v3748_v32, %v3752_v33  ;;  %v3704_v30 = vld [vmem:[#allocation7 + $0x630] sm:$0xff] }
 0x4df   :  { %5294 = vmatpush1.bf16.msra.mxu1 %v7006_v40  ;;  %5254 = vmatprep.subr.bf16.mxu0 %v6871_v41  ;;  %v3612_v40 = vld [vmem:[#allocation7 + $0x350] sm:$0xff] }
 0x4e0   :  { %5295 = vmatprep.subr.bf16.mxu1 %v6999_v57  ;;  %v3616_v41 = vld [vmem:[#allocation7 + $0x370] sm:$0xff] }
 0x4e1   :  { %v3740_v57 = vld [vmem:[#allocation7 + $0x750] sm:$0xff]  ;;  %v6943_v45 = vcombine.high %v3612_v40, %v3616_v41  ;;  %v6942_v11 = vcombine.low %v3612_v40, %v3616_v41  ;;  %v3697_v40 = vld [vmem:[#allocation7 + $0x5f8] sm:$0xff] }
 0x4e2   :  { %5255 = vmatpush1.bf16.msra.mxu0 %v6870_v37  ;;  %v7071_v37 = vcombine.high %v3740_v57, %v3744_v42  ;;  %v7070_v51 = vcombine.low %v3740_v57, %v3744_v42 }
 0x4e3   :  { %5296 = vmatpush1.bf16.msra.mxu1 %v6998_v34  ;;  %5256 = vmatprep.subr.bf16.mxu0 %v6863_v47  ;;  %v3604_v34 = vld [vmem:[#allocation7 + $0x310] sm:$0xff] }
 0x4e4   :  { %5297 = vmatprep.subr.bf16.mxu1 %v6991_v19  ;;  %v3608_v47 = vld [vmem:[#allocation7 + $0x330] sm:$0xff] }
 0x4e5   :  { %v3732_v19 = vld [vmem:[#allocation7 + $0x710] sm:$0xff]  ;;  %v6935_v8 = vcombine.high %v3604_v34, %v3608_v47  ;;  %v6934_v58 = vcombine.low %v3604_v34, %v3608_v47  ;;  %v3685_v34 = vld [vmem:[#allocation7 + $0x598] sm:$0xff] }
 0x4e6   :  { %5257 = vmatpush1.bf16.msra.mxu0 %v6862_v18  ;;  %v7063_v18 = vcombine.high %v3732_v19, %v3736_v50  ;;  %v7062_v59 = vcombine.low %v3732_v19, %v3736_v50  ;;  %v3689_v47 = vld [vmem:[#allocation7 + $0x5b8] sm:$0xff] }
 0x4e7   :  { %5298 = vmatpush1.bf16.msra.mxu1 %v6990_v52  ;;  %5258 = vmatprep.subr.bf16.mxu0 %v6855_v54  ;;  %v3596_v52 = vld [vmem:[#allocation7 + $0x2d0] sm:$0xff] }
 0x4e8   :  { %5299 = vmatprep.subr.bf16.mxu1 %v6983_v55  ;;  %v3600_v54 = vld [vmem:[#allocation7 + $0x2f0] sm:$0xff] }
 0x4e9   :  { %v3724_v55 = vld [vmem:[#allocation7 + $0x6d0] sm:$0xff]  ;;  %v6927_v60 = vcombine.high %v3596_v52, %v3600_v54  ;;  %v6926_v2 = vcombine.low %v3596_v52, %v3600_v54  ;;  %v3681_v52 = vld [vmem:[#allocation7 + $0x578] sm:$0xff] }
 0x4ea   :  { %5259 = vmatpush1.bf16.msra.mxu0 %v6854_v61  ;;  %v7055_v61 = vcombine.high %v3724_v55, %v3728_v56  ;;  %v7054_v3 = vcombine.low %v3724_v55, %v3728_v56  ;;  %v7016_v55 = vcombine.low %v3685_v34, %v3689_v47 }
 0x4eb   :  { %5300 = vmatpush1.bf16.msra.mxu1 %v6982_v62  ;;  %5260 = vmatprep.subr.bf16.mxu0 %v6847_v63  ;;  %v3588_v62 = vld [vmem:[#allocation7 + $0x290] sm:$0xff] }
 0x4ec   :  { %5301 = vmatprep.subr.bf16.mxu1 %v6975_v0  ;;  %v3592_v63 = vld [vmem:[#allocation7 + $0x2b0] sm:$0xff] }
 0x4ed   :  { %v3716_v0 = vld [vmem:[#allocation7 + $0x690] sm:$0xff]  ;;  %v6919_v4 = vcombine.high %v3588_v62, %v3592_v63  ;;  %v6918_v23 = vcombine.low %v3588_v62, %v3592_v63  ;;  %v3673_v62 = vld [vmem:[#allocation7 + $0x538] sm:$0xff] }
 0x4ee   :  { %5261 = vmatpush1.bf16.msra.mxu0 %v6846_v6  ;;  %v7047_v6 = vcombine.high %v3716_v0, %v3720_v1  ;;  %v7046_v24 = vcombine.low %v3716_v0, %v3720_v1 }
 0x4ef   :  { %5302 = vmatpush1.bf16.msra.mxu1 %v6974_v7  ;;  %5262 = vmatprep.subr.bf16.mxu0 %v6839_v17  ;;  %v3580_v7 = vld [vmem:[#allocation7 + $0x250] sm:$0xff] }
 0x4f0   :  { %5303 = vmatprep.subr.bf16.mxu1 %v6967_v20  ;;  %v3584_v17 = vld [vmem:[#allocation7 + $0x270] sm:$0xff] }
 0x4f1   :  { %v3708_v20 = vld [vmem:[#allocation7 + $0x650] sm:$0xff]  ;;  %v6911_v5 = vcombine.high %v3580_v7, %v3584_v17  ;;  %v6910_v31 = vcombine.low %v3580_v7, %v3584_v17 }
 0x4f2   :  { %5263 = vmatpush1.bf16.msra.mxu0 %v6838_v25  ;;  %v7039_v25 = vcombine.high %v3708_v20, %v3712_v21  ;;  %v7038_v32 = vcombine.low %v3708_v20, %v3712_v21  ;;  %v3525_v21 = vld [vmem:[#allocation7 + $0x98] sm:$0xff] }
 0x4f3   :  { %5304 = vmatpush1.bf16.msra.mxu1 %v6966_v27  ;;  %5264 = vmatprep.subr.bf16.mxu0 %v6959_v28  ;;  %v3572_v27 = vld [vmem:[#allocation7 + $0x210] sm:$0xff] }
 0x4f4   :  { %5305 = vmatprep.subr.bf16.mxu1 %v7087_v29  ;;  %v3576_v28 = vld [vmem:[#allocation7 + $0x230] sm:$0xff] }
 0x4f5   :  { %v3700_v29 = vld [vmem:[#allocation7 + $0x610] sm:$0xff]  ;;  %v6903_v33 = vcombine.high %v3572_v27, %v3576_v28  ;;  %v6902_v41 = vcombine.low %v3572_v27, %v3576_v28 }
 0x4f6   :  { %5265 = vmatpush2.bf16.msra.mxu0 %v6958_v35  ;;  %v7031_v35 = vcombine.high %v3700_v29, %v3704_v30  ;;  %v7030_v57 = vcombine.low %v3700_v29, %v3704_v30  ;;  %v3517_v30 = vld [vmem:[#allocation7 + $0x58] sm:$0xff] }
 0x4f7   :  { %5306 = vmatpush2.bf16.msra.mxu1 %v7086_v36  ;;  %5266 = vmatprep.subr.bf16.mxu0 %v6951_v39  ;;  %v3565_v36 = vld [vmem:[#allocation7 + $0x1d8] sm:$0xff] }
 0x4f8   :  { %5307 = vmatprep.subr.bf16.mxu1 %v7079_v38  ;;  %v3569_v39 = vld [vmem:[#allocation7 + $0x1f8] sm:$0xff] }
 0x4f9   :  { %v3693_v38 = vld [vmem:[#allocation7 + $0x5d8] sm:$0xff]  ;;  %v6897_v42 = vcombine.high %v3565_v36, %v3569_v39 }
 0x4fa   :  { %5267 = vmatpush2.bf16.msra.mxu0 %v6950_v43  ;;  %v7025_v43 = vcombine.high %v3693_v38, %v3697_v40  ;;  %v7024_v19 = vcombine.low %v3693_v38, %v3697_v40  ;;  %v3509_v40 = vld [vmem:[#allocation7 + $0x18] sm:$0xff] }
 0x4fb   :  { %5308 = vmatpush2.bf16.msra.mxu1 %v7078_v44  ;;  %5268 = vmatprep.subr.bf16.mxu0 %v6943_v45  ;;  %v3557_v44 = vld [vmem:[#allocation7 + $0x198] sm:$0xff] }
 0x4fc   :  { %5309 = vmatprep.subr.bf16.mxu1 %v7071_v37  ;;  %v3561_v45 = vld [vmem:[#allocation7 + $0x1b8] sm:$0xff]  ;;  %v6896_v37 = vcombine.low %v3565_v36, %v3569_v39 }
 0x4fd   :  { %v6889_v50 = vcombine.high %v3557_v44, %v3561_v45  ;;  %v6888_v54 = vcombine.low %v3557_v44, %v3561_v45 }
 0x4fe   :  { %5269 = vmatpush2.bf16.msra.mxu0 %v6942_v11  ;;  %v3549_v11 = vld [vmem:[#allocation7 + $0x158] sm:$0xff] }
 0x4ff   :  { %5310 = vmatpush2.bf16.msra.mxu1 %v7070_v51  ;;  %5270 = vmatprep.subr.bf16.mxu0 %v6935_v8  ;;  %v3553_v51 = vld [vmem:[#allocation7 + $0x178] sm:$0xff]  ;;  %v7017_v8 = vcombine.high %v3685_v34, %v3689_v47 }
 0x500   :  { %5311 = vmatprep.subr.bf16.mxu1 %v7063_v18  ;;  %v3677_v18 = vld [vmem:[#allocation7 + $0x558] sm:$0xff]  ;;  %v6881_v56 = vcombine.high %v3549_v11, %v3553_v51  ;;  %v6880_v63 = vcombine.low %v3549_v11, %v3553_v51 }
 0x501   :  { %v7008_v0 = vcombine.low %v3677_v18, %v3681_v52  ;;  %v3629_v34 = vld [vmem:[#allocation7 + $0x3d8] sm:$0xff] }
 0x502   :  { %5271 = vmatpush2.bf16.msra.mxu0 %v6934_v58  ;;  %v7009_v58 = vcombine.high %v3677_v18, %v3681_v52  ;;  %v3633_v47 = vld [vmem:[#allocation7 + $0x3f8] sm:$0xff] }
 0x503   :  { %5312 = vmatpush2.bf16.msra.mxu1 %v7062_v59  ;;  %5272 = vmatprep.subr.bf16.mxu0 %v6927_v60  ;;  %v3541_v59 = vld [vmem:[#allocation7 + $0x118] sm:$0xff] }
 0x504   :  { %5313 = vmatprep.subr.bf16.mxu1 %v7055_v61  ;;  %v3545_v60 = vld [vmem:[#allocation7 + $0x138] sm:$0xff] }
 0x505   :  { %v3669_v61 = vld [vmem:[#allocation7 + $0x518] sm:$0xff]  ;;  %v6873_v1 = vcombine.high %v3541_v59, %v3545_v60 }
 0x506   :  { %5273 = vmatpush2.bf16.msra.mxu0 %v6926_v2  ;;  %v3533_v2 = vld [vmem:[#allocation7 + $0xd8] sm:$0xff]  ;;  %v7000_v7 = vcombine.low %v3669_v61, %v3673_v62 }
 0x507   :  { %5314 = vmatpush2.bf16.msra.mxu1 %v7054_v3  ;;  %5274 = vmatprep.subr.bf16.mxu0 %v6919_v4  ;;  %v3537_v3 = vld [vmem:[#allocation7 + $0xf8] sm:$0xff] }
 0x508   :  { %5315 = vmatprep.subr.bf16.mxu1 %v7047_v6  ;;  %v3661_v4 = vld [vmem:[#allocation7 + $0x4d8] sm:$0xff]  ;;  %v6865_v17 = vcombine.high %v3533_v2, %v3537_v3 }
 0x509   :  { %v3665_v6 = vld [vmem:[#allocation7 + $0x4f8] sm:$0xff] }
 0x50a   :  { %5275 = vmatpush2.bf16.msra.mxu0 %v6918_v23  ;;  %v6993_v20 = vcombine.high %v3661_v4, %v3665_v6  ;;  %v3529_v23 = vld [vmem:[#allocation7 + $0xb8] sm:$0xff]  ;;  %v6992_v27 = vcombine.low %v3661_v4, %v3665_v6 }
 0x50b   :  { %5316 = vmatpush2.bf16.msra.mxu1 %v7046_v24  ;;  %5276 = vmatprep.subr.bf16.mxu0 %v6911_v5  ;;  %v3653_v24 = vld [vmem:[#allocation7 + $0x498] sm:$0xff]  ;;  %v6857_v28 = vcombine.high %v3525_v21, %v3529_v23 }
 0x50c   :  { %5317 = vmatprep.subr.bf16.mxu1 %v7039_v25  ;;  %v3657_v5 = vld [vmem:[#allocation7 + $0x4b8] sm:$0xff]  ;;  %v6864_v25 = vcombine.low %v3533_v2, %v3537_v3 }
 0x50d   :  { %v6985_v29 = vcombine.high %v3653_v24, %v3657_v5  ;;  %v6984_v36 = vcombine.low %v3653_v24, %v3657_v5  ;;  %v3621_v52 = vld [vmem:[#allocation7 + $0x398] sm:$0xff] }
 0x50e   :  { %5277 = vmatpush2.bf16.msra.mxu0 %v6910_v31  ;;  %v3521_v31 = vld [vmem:[#allocation7 + $0x78] sm:$0xff] }
 0x50f   :  { %5318 = vmatpush2.bf16.msra.mxu1 %v7038_v32  ;;  %5278 = vmatprep.subr.bf16.mxu0 %v6903_v33  ;;  %v3645_v32 = vld [vmem:[#allocation7 + $0x458] sm:$0xff]  ;;  %v6849_v39 = vcombine.high %v3517_v30, %v3521_v31 }
 0x510   :  { %5319 = vmatprep.subr.bf16.mxu1 %v7031_v35  ;;  %v3649_v33 = vld [vmem:[#allocation7 + $0x478] sm:$0xff]  ;;  %v6856_v35 = vcombine.low %v3525_v21, %v3529_v23 }
 0x511   :  { %v6977_v38 = vcombine.high %v3645_v32, %v3649_v33  ;;  %v6976_v44 = vcombine.low %v3645_v32, %v3649_v33  ;;  %v3605_v6 = vld [vmem:[#allocation7 + $0x318] sm:$0xff] }
 0x512   :  { %5279 = vmatpush2.bf16.msra.mxu0 %v6902_v41  ;;  %v3513_v41 = vld [vmem:[#allocation7 + $0x38] sm:$0xff] }
 0x513   :  { %5320 = vmatpush2.bf16.msra.mxu1 %v7030_v57  ;;  %5330 = vmatprep.subr.bf16.mxu0 %v6897_v42  ;;  %v3637_v57 = vld [vmem:[#allocation7 + $0x418] sm:$0xff]  ;;  %v6841_v45 = vcombine.high %v3509_v40, %v3513_v41  ;;  %v6840_v11 = vcombine.low %v3509_v40, %v3513_v41 }
 0x514   :  { %5371 = vmatprep.subr.bf16.mxu1 %v7025_v43  ;;  %v3641_v42 = vld [vmem:[#allocation7 + $0x438] sm:$0xff]  ;;  %v6848_v43 = vcombine.low %v3517_v30, %v3521_v31 }
 0x515   :  { %5281 = vmatmul.mubr.bf16.vlgmr.msra.gmra.mxu0 %v8418_v16  ;;  %v6968_v51 = vcombine.low %v3637_v57, %v3641_v42  ;;  %v3597_v5 = vld [vmem:[#allocation7 + $0x2d8] sm:$0xff] }
 0x516   :  { %5322 = vmatmul.mubr.bf16.vlgmr.msra.gmra.mxu1 %v8422_v49  ;;  %5331 = vmatpush1.bf16.msra.mxu0 %v6896_v37  ;;  %v6969_v37 = vcombine.high %v3637_v57, %v3641_v42  ;;  %v3589_v33 = vld [vmem:[#allocation7 + $0x298] sm:$0xff] }
 0x517   :  { %5362 = vmatprep.mubr.bf16.mxu0 %v8416_v46  ;;  %5372 = vmatpush1.bf16.msra.mxu1 %v7024_v19  ;;  %v7001_v46 = vcombine.high %v3669_v61, %v3673_v62  ;;  %v3757_v19 = vld [vmem:[#allocation7 + $0x7d8] sm:$0xff] }
 0x518   :  { %5403 = vmatprep.mubr.bf16.mxu1 %v8420_v48  ;;  %5332 = vmatprep.subr.bf16.mxu0 %v6889_v50  ;;  %v6872_v48 = vcombine.low %v3541_v59, %v3545_v60  ;;  %v3761_v50 = vld [vmem:[#allocation7 + $0x7f8] sm:$0xff] }
 0x519   :  { %5373 = vmatprep.subr.bf16.mxu1 %v7017_v8  ;;  %v6961_v8 = vcombine.high %v3629_v34, %v3633_v47  ;;  %v7089_v18 = vcombine.high %v3757_v19, %v3761_v50  ;;  %v7088_v59 = vcombine.low %v3757_v19, %v3761_v50  ;;  %v3613_v62 = vld [vmem:[#allocation7 + $0x358] sm:$0xff] }
 0x51a   :  { %5333 = vmatpush1.bf16.msra.mxu0 %v6888_v54  ;;  %v3625_v54 = vld [vmem:[#allocation7 + $0x3b8] sm:$0xff] }
 0x51b   :  { %5374 = vmatpush1.bf16.msra.mxu1 %v7016_v55  ;;  %5334 = vmatprep.subr.bf16.mxu0 %v6881_v56  ;;  %v3749_v55 = vld [vmem:[#allocation7 + $0x798] sm:$0xff]  ;;  %v6953_v60 = vcombine.high %v3621_v52, %v3625_v54 }
 0x51c   :  { %5375 = vmatprep.subr.bf16.mxu1 %v7009_v58  ;;  %v3753_v56 = vld [vmem:[#allocation7 + $0x7b8] sm:$0xff]  ;;  %v6960_v58 = vcombine.low %v3629_v34, %v3633_v47 }
 0x51d   :  { %v7081_v61 = vcombine.high %v3749_v55, %v3753_v56  ;;  %v7080_v2 = vcombine.low %v3749_v55, %v3753_v56  ;;  %v3581_v42 = vld [vmem:[#allocation7 + $0x258] sm:$0xff] }
 0x51e   :  { %5335 = vmatpush1.bf16.msra.mxu0 %v6880_v63  ;;  %v3617_v63 = vld [vmem:[#allocation7 + $0x378] sm:$0xff] }
 0x51f   :  { %5376 = vmatpush1.bf16.msra.mxu1 %v7008_v0  ;;  %5336 = vmatprep.subr.bf16.mxu0 %v6873_v1  ;;  %v3741_v0 = vld [vmem:[#allocation7 + $0x758] sm:$0xff]  ;;  %v6945_v3 = vcombine.high %v3613_v62, %v3617_v63 }
 0x520   :  { %5377 = vmatprep.subr.bf16.mxu1 %v7001_v46  ;;  %v3745_v1 = vld [vmem:[#allocation7 + $0x778] sm:$0xff]  ;;  %v6952_v46 = vcombine.low %v3621_v52, %v3625_v54 }
 0x521   :  { %v7073_v4 = vcombine.high %v3741_v0, %v3745_v1  ;;  %v7072_v21 = vcombine.low %v3741_v0, %v3745_v1  ;;  %v3573_v50 = vld [vmem:[#allocation7 + $0x218] sm:$0xff] }
 0x522   :  { %5337 = vmatpush1.bf16.msra.mxu0 %v6872_v48  ;;  %v3609_v48 = vld [vmem:[#allocation7 + $0x338] sm:$0xff] }
 0x523   :  { %5378 = vmatpush1.bf16.msra.mxu1 %v7000_v7  ;;  %5338 = vmatprep.subr.bf16.mxu0 %v6865_v17  ;;  %v3733_v7 = vld [vmem:[#allocation7 + $0x718] sm:$0xff]  ;;  %v6937_v23 = vcombine.high %v3605_v6, %v3609_v48 }
 0x524   :  { %5379 = vmatprep.subr.bf16.mxu1 %v6993_v20  ;;  %v3737_v17 = vld [vmem:[#allocation7 + $0x738] sm:$0xff]  ;;  %v6944_v20 = vcombine.low %v3613_v62, %v3617_v63  ;;  %v8441_v62 = vld [vmem:[%s8492_s10] sm:$0xff] }
 0x525   :  { %v7065_v24 = vcombine.high %v3733_v7, %v3737_v17  ;;  %v7064_v30 = vcombine.low %v3733_v7, %v3737_v17  ;;  %v7710_v63 = vld [vmem:[#allocation8 + $0x64] ss:$8 sps:$4 sm:$0xff]   ;;  %v7726_v0 = vld [vmem:[#allocation8 + $0x170] ss:$8 sps:$4 sm:$0xff]   ;;  %v3771_v1 = vrot.slane %v8441_v62, %v8212_v14  ;;  %v7732_v7 = vld [vmem:[#allocation8 + $0x160] ss:$8 sps:$4 sm:$0xff]  }
 0x526   :  { %5339 = vmatpush1.bf16.msra.mxu0 %v6864_v25  ;;  %v3601_v25 = vld [vmem:[#allocation7 + $0x2f8] sm:$0xff] }
 0x527   :  { %5380 = vmatpush1.bf16.msra.mxu1 %v6992_v27  ;;  %5340 = vmatprep.subr.bf16.mxu0 %v6857_v28  ;;  %v3725_v27 = vld [vmem:[#allocation7 + $0x6d8] sm:$0xff]  ;;  %v6929_v31 = vcombine.high %v3597_v5, %v3601_v25 }
 0x528   :  { %5381 = vmatprep.subr.bf16.mxu1 %v6985_v29  ;;  %v3729_v28 = vld [vmem:[#allocation7 + $0x6f8] sm:$0xff]  ;;  %v6936_v29 = vcombine.low %v3605_v6, %v3609_v48 }
 0x529   :  { %v7057_v32 = vcombine.high %v3725_v27, %v3729_v28  ;;  %v7056_v40 = vcombine.low %v3725_v27, %v3729_v28  ;;  %v7713_v48 = vld [vmem:[#allocation8 + $0x54] ss:$8 sps:$4 sm:$0xff]   ;;  %v7738_v27 = vld [vmem:[#allocation8 + $0x150] ss:$8 sps:$4 sm:$0xff]  }
 0x52a   :  { %5341 = vmatpush1.bf16.msra.mxu0 %v6856_v35  ;;  %v3593_v35 = vld [vmem:[#allocation7 + $0x2b8] sm:$0xff] }
 0x52b   :  { %5382 = vmatpush1.bf16.msra.mxu1 %v6984_v36  ;;  %5342 = vmatprep.subr.bf16.mxu0 %v6849_v39  ;;  %v3717_v36 = vld [vmem:[#allocation7 + $0x698] sm:$0xff]  ;;  %v6921_v41 = vcombine.high %v3589_v33, %v3593_v35 }
 0x52c   :  { %5383 = vmatprep.subr.bf16.mxu1 %v6977_v38  ;;  %v3721_v39 = vld [vmem:[#allocation7 + $0x6b8] sm:$0xff]  ;;  %v6928_v38 = vcombine.low %v3597_v5, %v3601_v25 }
 0x52d   :  { %v7049_v57 = vcombine.high %v3717_v36, %v3721_v39  ;;  %v7048_v34 = vcombine.low %v3717_v36, %v3721_v39  ;;  %v7711_v5 = vld [vmem:[#allocation8 + $0x50] ss:$8 sps:$4 sm:$0xff]   ;;  %v7722_v36 = vld [vmem:[#allocation8 + $0x24] ss:$8 sps:$4 sm:$0xff]  }
 0x52e   :  { %5343 = vmatpush1.bf16.msra.mxu0 %v6848_v43  ;;  %v3585_v43 = vld [vmem:[#allocation7 + $0x278] sm:$0xff] }
 0x52f   :  { %5384 = vmatpush1.bf16.msra.mxu1 %v6976_v44  ;;  %5344 = vmatprep.subr.bf16.mxu0 %v6841_v45  ;;  %v3709_v44 = vld [vmem:[#allocation7 + $0x658] sm:$0xff]  ;;  %v6913_v47 = vcombine.high %v3581_v42, %v3585_v43 }
 0x530   :  { %5385 = vmatprep.subr.bf16.mxu1 %v6969_v37  ;;  %v3713_v45 = vld [vmem:[#allocation7 + $0x678] sm:$0xff]  ;;  %v6920_v37 = vcombine.low %v3589_v33, %v3593_v35 }
 0x531   :  { %v7041_v19 = vcombine.high %v3709_v44, %v3713_v45  ;;  %v7040_v52 = vcombine.low %v3709_v44, %v3713_v45  ;;  %v7752_v33 = vld [vmem:[#allocation8 + $0x134] ss:$8 sps:$4 sm:$0xff]   ;;  %v7717_v35 = vld [vmem:[#allocation8 + $0x30] ss:$8 sps:$4 sm:$0xff]  }
 0x532   :  { %5345 = vmatpush1.bf16.msra.mxu0 %v6840_v11  ;;  %v3577_v11 = vld [vmem:[#allocation7 + $0x238] sm:$0xff] }
 0x533   :  { %5386 = vmatpush1.bf16.msra.mxu1 %v6968_v51  ;;  %5346 = vmatprep.subr.bf16.mxu0 %v6961_v8  ;;  %v3701_v51 = vld [vmem:[#allocation7 + $0x618] sm:$0xff]  ;;  %v6905_v54 = vcombine.high %v3573_v50, %v3577_v11  ;;  %v6904_v56 = vcombine.low %v3573_v50, %v3577_v11  ;;  %v7768_v11 = vld [vmem:[#allocation8 + $0x100] ss:$8 sps:$4 sm:$0xff]  }
 0x534   :  { %5387 = vmatprep.subr.bf16.mxu1 %v7089_v18  ;;  %v3705_v8 = vld [vmem:[#allocation7 + $0x638] sm:$0xff]  ;;  %v6912_v18 = vcombine.low %v3581_v42, %v3585_v43 }
 0x535   :  { %v7033_v55 = vcombine.high %v3701_v51, %v3705_v8  ;;  %v7750_v39 = vld [vmem:[#allocation8 + $0x130] ss:$8 sps:$4 sm:$0xff]   ;;  %v7764_v42 = vld [vmem:[#allocation8 + $0x114] ss:$8 sps:$4 sm:$0xff]  }
 0x536   :  { %5347 = vmatpush2.bf16.msra.mxu0 %v6960_v58  ;;  %v7032_v58 = vcombine.low %v3701_v51, %v3705_v8  ;;  %v7723_v44 = vld [vmem:[#allocation8 + $0x10] ss:$8 sps:$4 sm:$0xff]   ;;  %v7737_v50 = vld [vmem:[#allocation8 + $0xf4] ss:$8 sps:$4 sm:$0xff]  }
 0x537   :  { %5388 = vmatpush2.bf16.msra.mxu1 %v7088_v59  ;;  %5348 = vmatprep.subr.bf16.mxu0 %v6953_v60  ;;  %v7707_v59 = vld [vmem:[#allocation8 + $0x74] ss:$8 sps:$4 sm:$0xff]   ;;  %v7735_v8 = vld [vmem:[#allocation8 + $0xf0] ss:$8 sps:$4 sm:$0xff]  }
 0x538   :  { %5389 = vmatprep.subr.bf16.mxu1 %v7081_v61  ;;  %v7728_v60 = vld [vmem:[#allocation8 + $0x174] ss:$8 sps:$4 sm:$0xff]   ;;  %v7705_v61 = vld [vmem:[#allocation8 + $0x70] ss:$8 sps:$4 sm:$0xff]  }
 0x539   :  { %v7776_v51 = vld [vmem:[#allocation8 + $0x1f4] ss:$8 sps:$4 sm:$0xff]  }
 0x53a   :  { %5349 = vmatpush2.bf16.msra.mxu0 %v6952_v46  ;;  %v7734_v46 = vld [vmem:[#allocation8 + $0x164] ss:$8 sps:$4 sm:$0xff]  }
 0x53b   :  { %5390 = vmatpush2.bf16.msra.mxu1 %v7080_v2  ;;  %5350 = vmatprep.subr.bf16.mxu0 %v6945_v3 }
 0x53c   :  { %5391 = vmatprep.subr.bf16.mxu1 %v7073_v4  ;;  %v7708_v4 = vld [vmem:[#allocation8 + $0x60] ss:$8 sps:$4 sm:$0xff]  }
 0x53e   :  { %5351 = vmatpush2.bf16.msra.mxu0 %v6944_v20 }
 0x53f   :  { %5392 = vmatpush2.bf16.msra.mxu1 %v7072_v21  ;;  %5352 = vmatprep.subr.bf16.mxu0 %v6937_v23  ;;  %v7740_v21 = vld [vmem:[#allocation8 + $0x154] ss:$8 sps:$4 sm:$0xff]  }
 0x540   :  { %5393 = vmatprep.subr.bf16.mxu1 %v7065_v24 }
 0x542   :  { %5353 = vmatpush2.bf16.msra.mxu0 %v6936_v29  ;;  %v7746_v29 = vld [vmem:[#allocation8 + $0x144] ss:$8 sps:$4 sm:$0xff]  }
 0x543   :  { %5394 = vmatpush2.bf16.msra.mxu1 %v7064_v30  ;;  %5354 = vmatprep.subr.bf16.mxu0 %v6929_v31  ;;  %v7714_v30 = vld [vmem:[#allocation8 + $0x40] ss:$8 sps:$4 sm:$0xff]   ;;  %v7719_v31 = vld [vmem:[#allocation8 + $0x34] ss:$8 sps:$4 sm:$0xff]  }
 0x544   :  { %5395 = vmatprep.subr.bf16.mxu1 %v7057_v32  ;;  %v7744_v32 = vld [vmem:[#allocation8 + $0x140] ss:$8 sps:$4 sm:$0xff]  }
 0x546   :  { %5355 = vmatpush2.bf16.msra.mxu0 %v6928_v38  ;;  %v7758_v38 = vld [vmem:[#allocation8 + $0x124] ss:$8 sps:$4 sm:$0xff]  }
 0x547   :  { %5396 = vmatpush2.bf16.msra.mxu1 %v7056_v40  ;;  %5356 = vmatprep.subr.bf16.mxu0 %v6921_v41  ;;  %v7720_v40 = vld [vmem:[#allocation8 + $0x20] ss:$8 sps:$4 sm:$0xff]   ;;  %v7725_v41 = vld [vmem:[#allocation8 + $0x14] ss:$8 sps:$4 sm:$0xff]  }
 0x548   :  { %5397 = vmatprep.subr.bf16.mxu1 %v7049_v57  ;;  %v7756_v57 = vld [vmem:[#allocation8 + $0x120] ss:$8 sps:$4 sm:$0xff]  }
 0x54a   :  { %5357 = vmatpush2.bf16.msra.mxu0 %v6920_v37  ;;  %v7731_v37 = vld [vmem:[#allocation8 + $0x4] ss:$8 sps:$4 sm:$0xff]  }
 0x54b   :  { %5398 = vmatpush2.bf16.msra.mxu1 %v7048_v34  ;;  %5358 = vmatprep.subr.bf16.mxu0 %v6913_v47  ;;  %v7762_v34 = vld [vmem:[#allocation8 + $0x110] ss:$8 sps:$4 sm:$0xff]   ;;  %v7770_v47 = vld [vmem:[#allocation8 + $0x104] ss:$8 sps:$4 sm:$0xff]  }
 0x54c   :  { %5399 = vmatprep.subr.bf16.mxu1 %v7041_v19  ;;  %v7729_v19 = vld [vmem:[#allocation8] ss:$8 sps:$4 sm:$0xff]  }
 0x54e   :  { %5359 = vmatpush2.bf16.msra.mxu0 %v6912_v18  ;;  %v7743_v18 = vld [vmem:[#allocation8 + $0xe4] ss:$8 sps:$4 sm:$0xff]  }
 0x54f   :  { %5400 = vmatpush2.bf16.msra.mxu1 %v7040_v52  ;;  %5360 = vmatprep.subr.bf16.mxu0 %v6905_v54  ;;  %v7774_v52 = vld [vmem:[#allocation8 + $0x1f0] ss:$8 sps:$4 sm:$0xff]   ;;  %v7782_v54 = vld [vmem:[#allocation8 + $0x1e4] ss:$8 sps:$4 sm:$0xff]  }
 0x550   :  { %5401 = vmatprep.subr.bf16.mxu1 %v7033_v55  ;;  %v7741_v55 = vld [vmem:[#allocation8 + $0xe0] ss:$8 sps:$4 sm:$0xff]  }
 0x552   :  { %5361 = vmatpush2.bf16.msra.mxu0 %v6904_v56  ;;  %v3767_v56 = vrot.slane %v8441_v62, %v8201_v10 }
 0x553   :  { %5402 = vmatpush2.bf16.msra.mxu1 %v7032_v58  ;;  %6208 = vmatprep.subr.bf16.mxu0 %v7707_v59  ;;  %v7749_v58 = vld [vmem:[#allocation8 + $0xd4] ss:$8 sps:$4 sm:$0xff]   ;;  %v7780_v59 = vld [vmem:[#allocation8 + $0x1e0] ss:$8 sps:$4 sm:$0xff]  }
 0x554   :  { %6249 = vmatprep.subr.bf16.mxu1 %v7728_v60  ;;  %v7785_v60 = vld [vmem:[#allocation8 + $0x1d4] ss:$8 sps:$4 sm:$0xff]  }
 0x555   :  { %5363 = vmatmul.mubr.bf16.vlgmr.msra.gmra.mxu0 %v8418_v16  ;;  %v8446_v2 = vpop.f32.mrf.mxu0 }
 0x556   :  { %5404 = vmatmul.mubr.bf16.vlgmr.msra.gmra.mxu1 %v8422_v49  ;;  %v8449_v3 = vpop.f32.mrf.mxu1  ;;  %6209 = vmatpush1.bf16.msra.mxu0 %v7705_v61  ;;  %v7716_v49 = vld [vmem:[#allocation8 + $0x44] ss:$8 sps:$4 sm:$0xff]   ;;  %v7747_v61 = vld [vmem:[#allocation8 + $0xd0] ss:$8 sps:$4 sm:$0xff]  }
 0x557   :  { %v5120_v6 = vpop.f32.mrf.mxu0  ;;  %6210 = vmatprep.subr.bf16.mxu0 %v7710_v63  ;;  %6250 = vmatpush1.bf16.msra.mxu1 %v7726_v0  ;;  %v5119_v63 = vadd.f32 %v8446_v2, %v3767_v56  ;;  %v7755_v0 = vld [vmem:[#allocation8 + $0xc4] ss:$8 sps:$4 sm:$0xff]   ;;  %v7816_v56 = vld [vmem:[#allocation8 + $0x220] ss:$8 sps:$4 sm:$0xff]  }
 0x558   :  { %v5121_v17 = vadd.f32 %v5120_v6, %v3771_v1  ;;  %v5161_v20 = vpop.f32.mrf.mxu1  ;;  %6251 = vmatprep.subr.bf16.mxu1 %v7734_v46  ;;  %v7783_v1 = vld [vmem:[#allocation8 + $0x1d0] ss:$8 sps:$4 sm:$0xff]   ;;  %v7788_v46 = vld [vmem:[#allocation8 + $0x1c4] ss:$8 sps:$4 sm:$0xff]  }
 0x559   :  { %v5122_v23 = vpop.f32.mrf.mxu0  ;;  %v5160_v6 = vadd.f32 %v8449_v3, %v5119_v63  ;;  %v7767_v2 = vld [vmem:[#allocation8 + $0xa4] ss:$8 sps:$4 sm:$0xff]   ;;  %v7792_v3 = vld [vmem:[#allocation8 + $0x1a0] ss:$8 sps:$4 sm:$0xff]   ;;  %v7819_v63 = vld [vmem:[#allocation8 + $0x210] ss:$8 sps:$4 sm:$0xff]  }
 0x55a   :  { %v5162_v24 = vadd.f32 %v5161_v20, %v5121_v17  ;;  %v5163_v16 = vpop.f32.mrf.mxu1  ;;  %6211 = vmatpush1.bf16.msra.mxu0 %v7708_v4  ;;  %v7753_v4 = vld [vmem:[#allocation8 + $0xc0] ss:$8 sps:$4 sm:$0xff]   ;;  %v7791_v17 = vld [vmem:[#allocation8 + $0x1b4] ss:$8 sps:$4 sm:$0xff]   ;;  %v7759_v20 = vld [vmem:[#allocation8 + $0xb0] ss:$8 sps:$4 sm:$0xff]  }
 0x55b   :  { %v5123_v25 = vpop.f32.mrf.mxu0  ;;  %6212 = vmatprep.subr.bf16.mxu0 %v7713_v48  ;;  %6252 = vmatpush1.bf16.msra.mxu1 %v7732_v7  ;;  %v7761_v48 = vld [vmem:[#allocation8 + $0xb4] ss:$8 sps:$4 sm:$0xff]   ;;  %v7786_v7 = vld [vmem:[#allocation8 + $0x1c0] ss:$8 sps:$4 sm:$0xff]   ;;  %v7794_v23 = vld [vmem:[#allocation8 + $0x1a4] ss:$8 sps:$4 sm:$0xff]  }
 0x55c   :  { %7931 = vtanh.f32 %v5162_v24  ;;  %v5164_v28 = vpop.f32.mrf.mxu1  ;;  %6253 = vmatprep.subr.bf16.mxu1 %v7740_v21  ;;  %v7789_v21 = vld [vmem:[#allocation8 + $0x1b0] ss:$8 sps:$4 sm:$0xff]   ;;  %v7765_v24 = vld [vmem:[#allocation8 + $0xa0] ss:$8 sps:$4 sm:$0xff]   ;;  %v7773_v16 = vld [vmem:[#allocation8 + $0x94] ss:$8 sps:$4 sm:$0xff]  }
 0x55d   :  { %7933 = vtanh.f32 %v5160_v6  ;;  %v7771_v25 = vld [vmem:[#allocation8 + $0x90] ss:$8 sps:$4 sm:$0xff]   ;;  %v7800_v28 = vld [vmem:[#allocation8 + $0x184] ss:$8 sps:$4 sm:$0xff]   ;;  %v7822_v6 = vld [vmem:[#allocation8 + $0x200] ss:$8 sps:$4 sm:$0xff]  }
 0x55e   :  { %6213 = vmatpush1.bf16.msra.mxu0 %v7711_v5  ;;  %v7797_v5 = vld [vmem:[#allocation8 + $0x194] ss:$8 sps:$4 sm:$0xff]  }
 0x55f   :  { %6214 = vmatprep.subr.bf16.mxu0 %v7716_v49  ;;  %6254 = vmatpush1.bf16.msra.mxu1 %v7738_v27  ;;  %v7779_v49 = vld [vmem:[#allocation8 + $0x84] ss:$8 sps:$4 sm:$0xff]   ;;  %v7795_v27 = vld [vmem:[#allocation8 + $0x190] ss:$8 sps:$4 sm:$0xff]  }
 0x560   :  { %6255 = vmatprep.subr.bf16.mxu1 %v7746_v29  ;;  %v7777_v29 = vld [vmem:[#allocation8 + $0x80] ss:$8 sps:$4 sm:$0xff]  }
 0x562   :  { %6215 = vmatpush1.bf16.msra.mxu0 %v7714_v30  ;;  %v7798_v30 = vld [vmem:[#allocation8 + $0x180] ss:$8 sps:$4 sm:$0xff]  }
 0x563   :  { %6216 = vmatprep.subr.bf16.mxu0 %v7719_v31  ;;  %6256 = vmatpush1.bf16.msra.mxu1 %v7744_v32  ;;  %v7803_v31 = vld [vmem:[#allocation8 + $0x274] ss:$8 sps:$4 sm:$0xff]  }
 0x564   :  { %6257 = vmatprep.subr.bf16.mxu1 %v7752_v33  ;;  %v7851_v33 = vld [vmem:[#allocation8 + $0x374] ss:$8 sps:$4 sm:$0xff]  }
 0x566   :  { %6217 = vmatpush1.bf16.msra.mxu0 %v7717_v35  ;;  %v3775_v35 = vrot.slane %v8441_v62, %v8209_v12 }
 0x567   :  { %6218 = vmatprep.subr.bf16.mxu0 %v7722_v36  ;;  %6258 = vmatpush1.bf16.msra.mxu1 %v7750_v39  ;;  %v7801_v36 = vld [vmem:[#allocation8 + $0x270] ss:$8 sps:$4 sm:$0xff]  }
 0x568   :  { %6259 = vmatprep.subr.bf16.mxu1 %v7758_v38  ;;  %v7806_v38 = vld [vmem:[#allocation8 + $0x264] ss:$8 sps:$4 sm:$0xff]  }
 0x569   :  { %v7932_v43 = vpop.eup %7931 }
 0x56a   :  { %6219 = vmatpush1.bf16.msra.mxu0 %v7720_v40  ;;  %v5421_v45 = vpack.c.bf16 %v7932_v43, %v7932_v43  ;;  %v7934_v32 = vpop.eup %7933  ;;  %v3779_v40 = vrot.slane %v8441_v62, %v8215_v15  ;;  %v7804_v43 = vld [vmem:[#allocation8 + $0x260] ss:$8 sps:$4 sm:$0xff]  }
 0x56b   :  { %6220 = vmatprep.subr.bf16.mxu0 %v7725_v41  ;;  %6260 = vmatpush1.bf16.msra.mxu1 %v7756_v57  ;;  %v5420_v39 = vpack.c.bf16 %v7934_v32, %v7934_v32  ;;  %v7869_v32 = vld [vmem:[#allocation8 + $0x314] ss:$8 sps:$4 sm:$0xff]  }
 0x56c   :  { %6240 = vmatprep.mubr.bf16.mxu0 %v5421_v45  ;;  %6261 = vmatprep.subr.bf16.mxu1 %v7764_v42  ;;  %v7809_v45 = vld [vmem:[#allocation8 + $0x254] ss:$8 sps:$4 sm:$0xff]  }
 0x56e   :  { %6221 = vmatpush1.bf16.msra.mxu0 %v7723_v44 }
 0x56f   :  { %6222 = vmatprep.subr.bf16.mxu0 %v7731_v37  ;;  %6262 = vmatpush1.bf16.msra.mxu1 %v7762_v34 }
 0x570   :  { %6263 = vmatprep.subr.bf16.mxu1 %v7770_v47 }
 0x572   :  { %6223 = vmatpush1.bf16.msra.mxu0 %v7729_v19 }
 0x573   :  { %6224 = vmatprep.subr.bf16.mxu0 %v7737_v50  ;;  %6264 = vmatpush1.bf16.msra.mxu1 %v7768_v11  ;;  %v7807_v11 = vld [vmem:[#allocation8 + $0x250] ss:$8 sps:$4 sm:$0xff]  }
 0x574   :  { %6265 = vmatprep.subr.bf16.mxu1 %v7776_v51  ;;  %v7812_v51 = vld [vmem:[#allocation8 + $0x244] ss:$8 sps:$4 sm:$0xff]  }
 0x576   :  { %6225 = vmatpush2.bf16.msra.mxu0 %v7735_v8 }
 0x577   :  { %6226 = vmatprep.subr.bf16.mxu0 %v7743_v18  ;;  %6266 = vmatpush2.bf16.msra.mxu1 %v7774_v52  ;;  %v7810_v18 = vld [vmem:[#allocation8 + $0x240] ss:$8 sps:$4 sm:$0xff]   ;;  %v7815_v52 = vld [vmem:[#allocation8 + $0x234] ss:$8 sps:$4 sm:$0xff]  }
 0x578   :  { %6267 = vmatprep.subr.bf16.mxu1 %v7782_v54  ;;  %v7813_v54 = vld [vmem:[#allocation8 + $0x230] ss:$8 sps:$4 sm:$0xff]  }
 0x57a   :  { %6227 = vmatpush2.bf16.msra.mxu0 %v7741_v55  ;;  %v7818_v55 = vld [vmem:[#allocation8 + $0x224] ss:$8 sps:$4 sm:$0xff]  }
 0x57b   :  { %6228 = vmatprep.subr.bf16.mxu0 %v7749_v58  ;;  %6268 = vmatpush2.bf16.msra.mxu1 %v7780_v59  ;;  %v7821_v58 = vld [vmem:[#allocation8 + $0x214] ss:$8 sps:$4 sm:$0xff]  }
 0x57c   :  { %6269 = vmatprep.subr.bf16.mxu1 %v7785_v60 }
 0x57e   :  { %6229 = vmatpush2.bf16.msra.mxu0 %v7747_v61 }
 0x57f   :  { %6230 = vmatprep.subr.bf16.mxu0 %v7755_v0  ;;  %6270 = vmatpush2.bf16.msra.mxu1 %v7783_v1  ;;  %v7849_v0 = vld [vmem:[#allocation8 + $0x370] ss:$8 sps:$4 sm:$0xff]  }
 0x580   :  { %6271 = vmatprep.subr.bf16.mxu1 %v7788_v46  ;;  %v7824_v46 = vld [vmem:[#allocation8 + $0x204] ss:$8 sps:$4 sm:$0xff]  }
 0x582   :  { %6231 = vmatpush2.bf16.msra.mxu0 %v7753_v4  ;;  %v7854_v4 = vld [vmem:[#allocation8 + $0x364] ss:$8 sps:$4 sm:$0xff]  }
 0x583   :  { %6232 = vmatprep.subr.bf16.mxu0 %v7761_v48  ;;  %6272 = vmatpush2.bf16.msra.mxu1 %v7786_v7  ;;  %v7852_v48 = vld [vmem:[#allocation8 + $0x360] ss:$8 sps:$4 sm:$0xff]   ;;  %v7827_v7 = vld [vmem:[#allocation8 + $0x2f4] ss:$8 sps:$4 sm:$0xff]  }
 0x584   :  { %6273 = vmatprep.subr.bf16.mxu1 %v7791_v17  ;;  %v7857_v17 = vld [vmem:[#allocation8 + $0x354] ss:$8 sps:$4 sm:$0xff]  }
 0x586   :  { %6233 = vmatpush2.bf16.msra.mxu0 %v7759_v20  ;;  %v7825_v20 = vld [vmem:[#allocation8 + $0x2f0] ss:$8 sps:$4 sm:$0xff]  }
 0x587   :  { %6234 = vmatprep.subr.bf16.mxu0 %v7767_v2  ;;  %6274 = vmatpush2.bf16.msra.mxu1 %v7789_v21  ;;  %v7855_v2 = vld [vmem:[#allocation8 + $0x350] ss:$8 sps:$4 sm:$0xff]   ;;  %v7830_v21 = vld [vmem:[#allocation8 + $0x2e4] ss:$8 sps:$4 sm:$0xff]  }
 0x588   :  { %6275 = vmatprep.subr.bf16.mxu1 %v7794_v23  ;;  %v7860_v23 = vld [vmem:[#allocation8 + $0x344] ss:$8 sps:$4 sm:$0xff]  }
 0x58a   :  { %6235 = vmatpush2.bf16.msra.mxu0 %v7765_v24  ;;  %v7828_v24 = vld [vmem:[#allocation8 + $0x2e0] ss:$8 sps:$4 sm:$0xff]  }
 0x58b   :  { %6236 = vmatprep.subr.bf16.mxu0 %v7773_v16  ;;  %6276 = vmatpush2.bf16.msra.mxu1 %v7792_v3  ;;  %v7858_v16 = vld [vmem:[#allocation8 + $0x340] ss:$8 sps:$4 sm:$0xff]   ;;  %v7833_v3 = vld [vmem:[#allocation8 + $0x2d4] ss:$8 sps:$4 sm:$0xff]  }
 0x58c   :  { %6277 = vmatprep.subr.bf16.mxu1 %v7797_v5  ;;  %v7863_v5 = vld [vmem:[#allocation8 + $0x334] ss:$8 sps:$4 sm:$0xff]  }
 0x58e   :  { %6237 = vmatpush2.bf16.msra.mxu0 %v7771_v25  ;;  %v7831_v25 = vld [vmem:[#allocation8 + $0x2d0] ss:$8 sps:$4 sm:$0xff]  }
 0x58f   :  { %6238 = vmatprep.subr.bf16.mxu0 %v7779_v49  ;;  %6278 = vmatpush2.bf16.msra.mxu1 %v7795_v27  ;;  %v7861_v49 = vld [vmem:[#allocation8 + $0x330] ss:$8 sps:$4 sm:$0xff]   ;;  %v7836_v27 = vld [vmem:[#allocation8 + $0x2c4] ss:$8 sps:$4 sm:$0xff]  }
 0x590   :  { %6279 = vmatprep.subr.bf16.mxu1 %v7800_v28  ;;  %v7866_v28 = vld [vmem:[#allocation8 + $0x324] ss:$8 sps:$4 sm:$0xff]  }
 0x592   :  { %6239 = vmatpush2.bf16.msra.mxu0 %v7777_v29  ;;  %v7834_v29 = vld [vmem:[#allocation8 + $0x2c0] ss:$8 sps:$4 sm:$0xff]  }
 0x593   :  { %6280 = vmatpush2.bf16.msra.mxu1 %v7798_v30  ;;  %6290 = vmatprep.subr.bf16.mxu0 %v7803_v31  ;;  %v7864_v30 = vld [vmem:[#allocation8 + $0x320] ss:$8 sps:$4 sm:$0xff]   ;;  %v7839_v31 = vld [vmem:[#allocation8 + $0x2b4] ss:$8 sps:$4 sm:$0xff]  }
 0x594   :  { %6331 = vmatprep.subr.bf16.mxu1 %v7851_v33  ;;  %v7837_v33 = vld [vmem:[#allocation8 + $0x2b0] ss:$8 sps:$4 sm:$0xff]  }
 0x595   :  { %v5200_v41 = vpop.f32.mrf.mxu0  ;;  %6241 = vmatmul.mubr.bf16.vlgmr.msra.gmra.mxu0 %v5420_v39  ;;  %v7872_v39 = vld [vmem:[#allocation8 + $0x304] ss:$8 sps:$4 sm:$0xff]  }
 0x596   :  { %v5201_v57 = vadd.f32 %v5200_v41, %v3775_v35  ;;  %v5241_v42 = vpop.f32.mrf.mxu1  ;;  %6291 = vmatpush1.bf16.msra.mxu0 %v7801_v36  ;;  %v7867_v35 = vld [vmem:[#allocation8 + $0x310] ss:$8 sps:$4 sm:$0xff]   ;;  %v7842_v36 = vld [vmem:[#allocation8 + $0x2a4] ss:$8 sps:$4 sm:$0xff]   ;;  %v7845_v41 = vld [vmem:[#allocation8 + $0x294] ss:$8 sps:$4 sm:$0xff]  }
 0x597   :  { %v5202_v44 = vpop.f32.mrf.mxu0  ;;  %6292 = vmatprep.subr.bf16.mxu0 %v7806_v38  ;;  %v7840_v38 = vld [vmem:[#allocation8 + $0x2a0] ss:$8 sps:$4 sm:$0xff]  }
 0x598   :  { %v5242_v37 = vadd.f32 %v5241_v42, %v5201_v57  ;;  %v5203_v12 = vadd.f32 %v5202_v44, %v3779_v40  ;;  %v5243_v34 = vpop.f32.mrf.mxu1  ;;  %v7870_v40 = vld [vmem:[#allocation8 + $0x300] ss:$8 sps:$4 sm:$0xff]   ;;  %v7875_v57 = vld [vmem:[#allocation8 + $0x3f4] ss:$8 sps:$4 sm:$0xff]   ;;  %v7843_v42 = vld [vmem:[#allocation8 + $0x290] ss:$8 sps:$4 sm:$0xff]  }
 0x599   :  { %v5204_v47 = vpop.f32.mrf.mxu0  ;;  %v7848_v44 = vld [vmem:[#allocation8 + $0x284] ss:$8 sps:$4 sm:$0xff]  }
 0x59a   :  { %v5244_v19 = vadd.f32 %v5243_v34, %v5203_v12  ;;  %v5245_v50 = vpop.f32.mrf.mxu1  ;;  %6293 = vmatpush1.bf16.msra.mxu0 %v7804_v43  ;;  %7935 = vtanh.f32 %v5242_v37  ;;  %v7873_v43 = vld [vmem:[#allocation8 + $0x3f0] ss:$8 sps:$4 sm:$0xff]   ;;  %v7846_v37 = vld [vmem:[#allocation8 + $0x280] ss:$8 sps:$4 sm:$0xff]   ;;  %v7881_v34 = vld [vmem:[#allocation8 + $0x3d4] ss:$8 sps:$4 sm:$0xff]   ;;  %v3783_v47 = vrot.slane %v8441_v62, %v253_v22 }
 0x59b   :  { %v5205_v15 = vpop.f32.mrf.mxu0  ;;  %6294 = vmatprep.subr.bf16.mxu0 %v7809_v45  ;;  %v7878_v45 = vld [vmem:[#allocation8 + $0x3e4] ss:$8 sps:$4 sm:$0xff]   ;;  %v7876_v12 = vld [vmem:[#allocation8 + $0x3e0] ss:$8 sps:$4 sm:$0xff]  }
 0x59c   :  { %7937 = vtanh.f32 %v5244_v19  ;;  %v5246_v8 = vpop.f32.mrf.mxu1  ;;  %v7879_v19 = vld [vmem:[#allocation8 + $0x3d0] ss:$8 sps:$4 sm:$0xff]   ;;  %v7884_v50 = vld [vmem:[#allocation8 + $0x3c4] ss:$8 sps:$4 sm:$0xff]  }
 0x59e   :  { %6295 = vmatpush1.bf16.msra.mxu0 %v7807_v11  ;;  %v3787_v11 = vrot.slane %v8441_v62, %v257_v13  ;;  %v7890_v13 = vld [vmem:[#allocation8 + $0x3a4] ss:$8 sps:$4 sm:$0xff]  }
 0x59f   :  { %6296 = vmatprep.subr.bf16.mxu0 %v7812_v51 }
 0x5a2   :  { %6297 = vmatpush1.bf16.msra.mxu0 %v7810_v18  ;;  %v7882_v18 = vld [vmem:[#allocation8 + $0x3c0] ss:$8 sps:$4 sm:$0xff]  }
 0x5a3   :  { %6298 = vmatprep.subr.bf16.mxu0 %v7815_v52 }
 0x5a6   :  { %6299 = vmatpush1.bf16.msra.mxu0 %v7813_v54  ;;  %v7887_v54 = vld [vmem:[#allocation8 + $0x3b4] ss:$8 sps:$4 sm:$0xff]  }
 0x5a7   :  { %6300 = vmatprep.subr.bf16.mxu0 %v7818_v55  ;;  %v7936_v59 = vpop.eup %7935 }
 0x5a8   :  { %v5422_v1 = vpack.c.bf16 %v7936_v59, %v7936_v59 }
 0x5a9   :  { %v7938_v60 = vpop.eup %7937 }
 0x5aa   :  { %v5423_v61 = vpack.c.bf16 %v7938_v60, %v7938_v60  ;;  %6301 = vmatpush1.bf16.msra.mxu0 %v7816_v56 }
 0x5ab   :  { %6302 = vmatprep.subr.bf16.mxu0 %v7821_v58 }
 0x5ac   :  { %6281 = vmatprep.mubr.bf16.mxu1 %v5423_v61  ;;  %v7885_v61 = vld [vmem:[#allocation8 + $0x3b0] ss:$8 sps:$4 sm:$0xff]  }
 0x5ad   :  { %6282 = vmatmul.mubr.bf16.vlgmr.msra.gmra.mxu1 %v5422_v1  ;;  %v7888_v1 = vld [vmem:[#allocation8 + $0x3a0] ss:$8 sps:$4 sm:$0xff]  }
 0x5ae   :  { %6303 = vmatpush1.bf16.msra.mxu0 %v7819_v63  ;;  %6332 = vmatpush1.bf16.msra.mxu1 %v7849_v0 }
 0x5af   :  { %6304 = vmatprep.subr.bf16.mxu0 %v7824_v46  ;;  %6333 = vmatprep.subr.bf16.mxu1 %v7854_v4  ;;  %v7893_v46 = vld [vmem:[#allocation8 + $0x394] ss:$8 sps:$4 sm:$0xff]   ;;  %v7891_v4 = vld [vmem:[#allocation8 + $0x390] ss:$8 sps:$4 sm:$0xff]  }
 0x5b2   :  { %6305 = vmatpush1.bf16.msra.mxu0 %v7822_v6  ;;  %6334 = vmatpush1.bf16.msra.mxu1 %v7852_v48  ;;  %v7896_v6 = vld [vmem:[#allocation8 + $0x384] ss:$8 sps:$4 sm:$0xff]   ;;  %v7894_v48 = vld [vmem:[#allocation8 + $0x380] ss:$8 sps:$4 sm:$0xff]  }
 0x5b3   :  { %6306 = vmatprep.subr.bf16.mxu0 %v7827_v7  ;;  %6335 = vmatprep.subr.bf16.mxu1 %v7857_v17 }
 0x5b6   :  { %6307 = vmatpush2.bf16.msra.mxu0 %v7825_v20  ;;  %6336 = vmatpush1.bf16.msra.mxu1 %v7855_v2 }
 0x5b7   :  { %6308 = vmatprep.subr.bf16.mxu0 %v7830_v21  ;;  %6337 = vmatprep.subr.bf16.mxu1 %v7860_v23  ;;  %v3791_v21 = vrot.slane %v8441_v62, %v261_v53  ;;  %v3795_v23 = vrot.slane %v8441_v62, %v265_v26 }
 0x5ba   :  { %6309 = vmatpush2.bf16.msra.mxu0 %v7828_v24  ;;  %6338 = vmatpush1.bf16.msra.mxu1 %v7858_v16 }
 0x5bb   :  { %6310 = vmatprep.subr.bf16.mxu0 %v7833_v3  ;;  %6339 = vmatprep.subr.bf16.mxu1 %v7863_v5 }
 0x5be   :  { %6311 = vmatpush2.bf16.msra.mxu0 %v7831_v25  ;;  %6340 = vmatpush1.bf16.msra.mxu1 %v7861_v49 }
 0x5bf   :  { %6312 = vmatprep.subr.bf16.mxu0 %v7836_v27  ;;  %6341 = vmatprep.subr.bf16.mxu1 %v7866_v28 }
 0x5c2   :  { %6313 = vmatpush2.bf16.msra.mxu0 %v7834_v29  ;;  %6342 = vmatpush1.bf16.msra.mxu1 %v7864_v30 }
 0x5c3   :  { %6314 = vmatprep.subr.bf16.mxu0 %v7839_v31  ;;  %6343 = vmatprep.subr.bf16.mxu1 %v7869_v32 }
 0x5c6   :  { %6315 = vmatpush2.bf16.msra.mxu0 %v7837_v33  ;;  %6344 = vmatpush1.bf16.msra.mxu1 %v7867_v35 }
 0x5c7   :  { %6316 = vmatprep.subr.bf16.mxu0 %v7842_v36  ;;  %6345 = vmatprep.subr.bf16.mxu1 %v7872_v39 }
 0x5ca   :  { %6317 = vmatpush2.bf16.msra.mxu0 %v7840_v38  ;;  %6346 = vmatpush1.bf16.msra.mxu1 %v7870_v40  ;;  %v5556_v38 = vld [vmem:[%s8494_s12] sm:$0x3] }
 0x5cb   :  { %6318 = vmatprep.subr.bf16.mxu0 %v7845_v41  ;;  %6347 = vmatprep.subr.bf16.mxu1 %v7875_v57  ;;  %v5561_v40 = vrot.slane %v5556_v38, %v8201_v10  ;;  %v5565_v41 = vrot.slane %v5556_v38, %v8212_v14 }
 0x5ce   :  { %6319 = vmatpush2.bf16.msra.mxu0 %v7843_v42  ;;  %6348 = vmatpush2.bf16.msra.mxu1 %v7873_v43 }
 0x5cf   :  { %6320 = vmatprep.subr.bf16.mxu0 %v7848_v44  ;;  %6349 = vmatprep.subr.bf16.mxu1 %v7878_v45 }
 0x5d2   :  { %6321 = vmatpush2.bf16.msra.mxu0 %v7846_v37  ;;  %6350 = vmatpush2.bf16.msra.mxu1 %v7876_v12 }
 0x5d3   :  { %6351 = vmatprep.subr.bf16.mxu1 %v7881_v34 }
 0x5d5   :  { %v5282_v15 = vpop.f32.mrf.mxu0 }
 0x5d6   :  { %v5283_v51 = vadd.f32 %v5282_v15, %v3783_v47  ;;  %v5323_v8 = vpop.f32.mrf.mxu1  ;;  %6352 = vmatpush2.bf16.msra.mxu1 %v7879_v19 }
 0x5d7   :  { %v5284_v52 = vpop.f32.mrf.mxu0  ;;  %6353 = vmatprep.subr.bf16.mxu1 %v7884_v50 }
 0x5d8   :  { %v5324_v55 = vadd.f32 %v5323_v8, %v5283_v51  ;;  %v5285_v56 = vadd.f32 %v5284_v52, %v3787_v11  ;;  %v5325_v22 = vpop.f32.mrf.mxu1 }
 0x5d9   :  { %v5286_v58 = vpop.f32.mrf.mxu0 }
 0x5da   :  { %v5326_v59 = vadd.f32 %v5325_v22, %v5285_v56  ;;  %v5327_v60 = vpop.f32.mrf.mxu1  ;;  %6354 = vmatpush2.bf16.msra.mxu1 %v7882_v18  ;;  %7939 = vtanh.f32 %v5324_v55 }
 0x5db   :  { %v5287_v63 = vpop.f32.mrf.mxu0  ;;  %6355 = vmatprep.subr.bf16.mxu1 %v7887_v54 }
 0x5dc   :  { %7941 = vtanh.f32 %v5326_v59  ;;  %v5328_v0 = vpop.f32.mrf.mxu1 }
 0x5de   :  { %6356 = vmatpush2.bf16.msra.mxu1 %v7885_v61 }
 0x5df   :  { %6357 = vmatprep.subr.bf16.mxu1 %v7890_v13 }
 0x5e2   :  { %6358 = vmatpush2.bf16.msra.mxu1 %v7888_v1 }
 0x5e3   :  { %6359 = vmatprep.subr.bf16.mxu1 %v7893_v46 }
 0x5e6   :  { %6360 = vmatpush2.bf16.msra.mxu1 %v7891_v4 }
 0x5e7   :  { %6361 = vmatprep.subr.bf16.mxu1 %v7896_v6  ;;  %v7940_v7 = vpop.eup %7939 }
 0x5e8   :  { %v5424_v2 = vpack.c.bf16 %v7940_v7, %v7940_v7 }
 0x5e9   :  { %v7942_v17 = vpop.eup %7941 }
 0x5ea   :  { %v5425_v20 = vpack.c.bf16 %v7942_v17, %v7942_v17  ;;  %6362 = vmatpush2.bf16.msra.mxu1 %v7894_v48 }
 0x5ec   :  { %6322 = vmatprep.mubr.bf16.mxu0 %v5425_v20 }
 0x5ed   :  { %6323 = vmatmul.mubr.bf16.vlgmr.msra.gmra.mxu0 %v5424_v2 }
 0x615   :  { %v5364_v24 = vpop.f32.mrf.mxu0 }
 0x616   :  { %v5365_v16 = vadd.f32 %v5364_v24, %v3791_v21  ;;  %v5405_v3 = vpop.f32.mrf.mxu1 }
 0x617   :  { %v5366_v5 = vpop.f32.mrf.mxu0 }
 0x618   :  { %v5406_v25 = vadd.f32 %v5405_v3, %v5365_v16  ;;  %v5367_v49 = vadd.f32 %v5366_v5, %v3795_v23  ;;  %v5407_v27 = vpop.f32.mrf.mxu1 }
 0x619   :  { %v5368_v28 = vpop.f32.mrf.mxu0 }
 0x61a   :  { %v5408_v29 = vadd.f32 %v5407_v27, %v5367_v49  ;;  %v5409_v30 = vpop.f32.mrf.mxu1  ;;  %7943 = vtanh.f32 %v5406_v25 }
 0x61b   :  { %v5369_v31 = vpop.f32.mrf.mxu0 }
 0x61c   :  { %7945 = vtanh.f32 %v5408_v29  ;;  %v5410_v32 = vpop.f32.mrf.mxu1 }
 0x627   :  { %v7944_v33 = vpop.eup %7943 }
 0x628   :  { %v5426_v9 = vpack.c.bf16 %v7944_v33, %v7944_v33 }
 0x629   :  { %v7946_v53 = vpop.eup %7945 }
 0x62a   :  { %v5427_v35 = vpack.c.bf16 %v7946_v53, %v7946_v53 }
 0x62c   :  { %6363 = vmatprep.mubr.bf16.mxu1 %v5427_v35 }
 0x62d   :  { %6364 = vmatmul.mubr.bf16.vlgmr.msra.gmra.mxu1 %v5426_v9 }
 0x655   :  { %v6242_v26 = vpop.f32.mrf.mxu0 }
 0x656   :  { %v6243_v57 = vadd.f32 %v6242_v26, %v5561_v40 }
 0x657   :  { %v6244_v62 = vpop.f32.mrf.mxu0 }
 0x658   :  { %v6245_v43 = vadd.f32 %v6244_v62, %v5565_v41 }
 0x659   :  { %v6246_v36 = vpop.f32.mrf.mxu0 }
 0x65b   :  { %v6247_v39 = vpop.f32.mrf.mxu0 }
 0x66d   :  { %v6283_v42 = vpop.f32.mrf.mxu1 }
 0x66e   :  { %v6284_v44 = vadd.f32 %v6283_v42, %v6243_v57 }
 0x66f   :  { %v6285_v45 = vpop.f32.mrf.mxu1 }
 0x670   :  { %v6286_v37 = vadd.f32 %v6285_v45, %v6245_v43 }
 0x671   :  { %v6287_v12 = vpop.f32.mrf.mxu1 }
 0x673   :  { %v6288_v34 = vpop.f32.mrf.mxu1 }
 0x674   :  { %8038 = shalt.err (!%p8035_p10)
}
 0x675   :  { %6393 = dma.vmem_to_hbm [thread:$0]  %s6391_s9, 128, %s8496_s14, [#allocation12]  }
 0x676   :  { %s8089_s5 = smov [#allocation10]  }
 0x677   :  { %s6380_s21 = sshll.u32 %s8089_s5, 4  ;;  %s6381_s21 = int_to_ptr.vmem [resolvable:$true] %s6380_s21 }
 0x678   :  { %s8047_s2 = scalar_lea.vmem %s6381_s21, 256  ;;  %p8052_p12 = scmp.lt.s32.totalorder %s6381_s21, %s6381_s21 }
 0x679   :  { %p8048_p11 = scmp.ne.s32.totalorder %s6381_s21, %s8047_s2  ;;  %p8053_p13 = scmp.lt.s32.totalorder %s8047_s2, %s8047_s2 }
 0x67b   :  { %p8054_p0 = por %p8053_p13, %p8052_p12 }
 0x67d   :  { %p8055_p1 = pnand %p8054_p0, %p8048_p11 }
 0x6ad   :  { %v6324_v10 = vpop.f32.mrf.mxu0 }
 0x6ae   :  { %v6325_v50 = vadd.f32 %v6324_v10, %v6284_v44 }
 0x6af   :  { %v6326_v14 = vpop.f32.mrf.mxu0 }
 0x6b0   :  { %v6327_v15 = vadd.f32 %v6326_v14, %v6286_v37 }
 0x6b1   :  { %v6328_v47 = vpop.f32.mrf.mxu0 }
 0x6b3   :  { %v6329_v19 = vpop.f32.mrf.mxu0 }
 0x6ed   :  { %v6365_v11 = vpop.f32.mrf.mxu1 }
 0x6ee   :  { %v6366_v51 = vadd.f32 %v6365_v11, %v6325_v50 }
 0x6ef   :  { %v6367_v8 = vpop.f32.mrf.mxu1 }
 0x6f0   :  { %6372 = vst [vmem:[#allocation10] sm:$0xff] %v6366_v51  ;;  %v6368_v18 = vadd.f32 %v6367_v8, %v6327_v15 }
 0x6f1   :  { %v6369_v52 = vpop.f32.mrf.mxu1 }
 0x6f2   :  { %6373 = vst [vmem:[#allocation10 + $0x8] sm:$0xff] %v6368_v18 }
 0x6f3   :  { %v6370_v54 = vpop.f32.mrf.mxu1 }
 0x6f4   :  { %8058 = shalt.err (!%p8055_p1)
}
 0x6f5   :  { %6383 = dma.vmem_to_hbm [thread:$0]  %s6381_s21, 256, %s8495_s13, [#allocation4]  }
 0x6f6   :  { %8073 = dma.done.wait [#allocation4], 256  }
 0x6f7   :  { %8074 = vsyncadd [#allocation4], 4294967040 }
 0x6f8   :  { %8075 = dma.done.wait [#allocation12], 128  }
 0x6f9   :  { %8076 = vsyncadd [#allocation12], 4294967168 }
 0x6fa   :  { %6400 = vsyncpa [#allocation3], 1 }
 0x6fb   :  { %6401 = vsyncpa [#allocation6], 1 }
 0x6fc   :  { %6402 = vsyncpa [#allocation9], 1 }
 0x6fd   :  { %6403 = vsyncpa [#allocation4], 1 }
 0x6fe   :  { %6404 = vsyncpa [#allocation12], 1 }

</bundles_post_ra>
